<compile_context>
chip_gen: v7x
topology: tpu7x:2x2x1
jax: 0.10.0
libtpu: 0.0.40
codegen_flags: <defaults>
</compile_context>

<pallas_src>
import jax
import jax.numpy as jnp
from jax import lax
from jax.experimental import pallas as pl
from jax.experimental.pallas import tpu as pltpu

VMEM = pltpu.MemorySpace.VMEM


# --------------------------------------------------------------------------
# fused whole-network kernel factory (static T, B, H, num_layers)
# --------------------------------------------------------------------------
def make_bilstm_kernel(T, B, H, num_layers):
    H4 = 4 * H
    H8 = 8 * H
    inv_t = 1.0 / T

    def kernel(*refs):
        emb_ref = refs[0]
        lstm_refs = refs[1:1 + 4 * num_layers]
        idx = 1 + 4 * num_layers
        w1_ref, fb1_ref, w2_ref, fb2_ref = refs[idx:idx + 4]
        out_ref = refs[idx + 4]
        xp_scr = refs[idx + 5]        # (T*B, 8H) fused gate pre-activations
        hseq_scr = refs[idx + 6]      # (T*B, 2H) previous layer's output

        pools = None
        for l in range(num_layers):
            w_ih_ref, b_ref, whf_ref, whb_ref = lstm_refs[4 * l:4 * l + 4]
            last = (l == num_layers - 1)

            # input projection for the whole sequence, both directions at once:
            # (T*B, in) @ (in, 8H) + (b_ih + b_hh)  ->  lane-dense (T*B, 256) in VMEM
            xin = emb_ref[...] if l == 0 else hseq_scr[...]
            xp_scr[...] = (
                jnp.dot(xin, w_ih_ref[...], preferred_element_type=jnp.float32)
                + b_ref[...])

            whf = whf_ref[...]        # (H, 4H) fused [i|f|g|o] hidden weights, fwd
            whb = whb_ref[...]        # (H, 4H) bwd

            h_f = jnp.zeros((B, H), jnp.float32)
            c_f = jnp.zeros((B, H), jnp.float32)
            h_b = jnp.zeros((B, H), jnp.float32)
            c_b = jnp.zeros((B, H), jnp.float32)
            if last:
                s_f = jnp.zeros((B, H), jnp.float32)
                s_b = jnp.zeros((B, H), jnp.float32)
                m_f = jnp.full((B, H), -jnp.inf, jnp.float32)
                m_b = jnp.full((B, H), -jnp.inf, jnp.float32)

            # statically unrolled serial recurrence; fwd and bwd interleaved in one
            # body so the scheduler can overlap one direction's EUP (sigmoid/tanh)
            # with the other's MXU matmul.
            for t in range(T):
                tb = T - 1 - t        # in-kernel time reversal for the bwd direction

                gf = (xp_scr[t * B:(t + 1) * B, 0:H4]
                      + jnp.dot(h_f, whf, preferred_element_type=jnp.float32))
                gb = (xp_scr[tb * B:(tb + 1) * B, H4:H8]
                      + jnp.dot(h_b, whb, preferred_element_type=jnp.float32))

                i_f = jax.nn.sigmoid(gf[:, 0:H])
                f_f = jax.nn.sigmoid(gf[:, H:2 * H])
                g_f = jnp.tanh(gf[:, 2 * H:3 * H])
                o_f = jax.nn.sigmoid(gf[:, 3 * H:4 * H])
                c_f = f_f * c_f + i_f * g_f
                h_f = o_f * jnp.tanh(c_f)

                i_b = jax.nn.sigmoid(gb[:, 0:H])
                f_b = jax.nn.sigmoid(gb[:, H:2 * H])
                g_b = jnp.tanh(gb[:, 2 * H:3 * H])
                o_b = jax.nn.sigmoid(gb[:, 3 * H:4 * H])
                c_b = f_b * c_b + i_b * g_b
                h_b = o_b * jnp.tanh(c_b)

                if last:
                    # on-the-fly avg/max pooling (order-independent per direction)
                    s_f = s_f + h_f
                    s_b = s_b + h_b
                    m_f = jnp.maximum(m_f, h_f)
                    m_b = jnp.maximum(m_b, h_b)
                else:
                    hseq_scr[t * B:(t + 1) * B, 0:H] = h_f
                    hseq_scr[tb * B:(tb + 1) * B, H:2 * H] = h_b

            if last:
                pools = (s_f, s_b, m_f, m_b)
            # TODO(synk): inter-layer LSTM dropout (dropout1) is identity in eval mode.

        # head: conc = [avg_f, avg_b, max_f, max_b]; fc1 done as 4 row-block matmuls
        # of W1 = fc1.weight.T to avoid an in-kernel lane concat.
        s_f, s_b, m_f, m_b = pools
        w1 = w1_ref[...]              # (4H, H2)
        z = (jnp.dot(s_f * inv_t, w1[0:H, :], preferred_element_type=jnp.float32)
             + jnp.dot(s_b * inv_t, w1[H:2 * H, :], preferred_element_type=jnp.float32)
             + jnp.dot(m_f, w1[2 * H:3 * H, :], preferred_element_type=jnp.float32)
             + jnp.dot(m_b, w1[3 * H:4 * H, :], preferred_element_type=jnp.float32)
             + fb1_ref[...])
        z = jnp.maximum(z, 0.0)       # ReLU
        # TODO(synk): dropout2 after fc1 is identity in eval/inference mode.
        out_ref[...] = (jnp.dot(z, w2_ref[...], preferred_element_type=jnp.float32)
                        + fb2_ref[...])

    return kernel


# --------------------------------------------------------------------------
# forward pass wrapper (embedding gather is the only JAX-side op)
# --------------------------------------------------------------------------
def bilstm_forward(params, x):
    B, T = x.shape
    H = params["H"]
    num_layers = params["num_layers"]
    E = params["embedding"].shape[1]
    C = params["w2"].shape[1]

    # embedding gather laid out time-major and flattened to (T*B, E) (glue op)
    emb_flat = params["embedding"][x.T].reshape(T * B, E)

    lstm_args = []
    for l in range(num_layers):
        p = params["lstm"][l]
        lstm_args += [p["w_ih"], p["b"], p["w_hh_f"], p["w_hh_b"]]

    n_in = 1 + 4 * num_layers + 4
    return pl.pallas_call(
        make_bilstm_kernel(T, B, H, num_layers),
        out_shape=jax.ShapeDtypeStruct((B, C), jnp.float32),
        in_specs=[pl.BlockSpec(memory_space=VMEM)] * n_in,
        out_specs=pl.BlockSpec(memory_space=VMEM),
        scratch_shapes=[
            pltpu.VMEM((T * B, 8 * H), jnp.float32),   # fused gate pre-activations
            pltpu.VMEM((T * B, 2 * H), jnp.float32),   # previous layer output
        ],
    )(emb_flat, *lstm_args,
      params["w1"], params["b1"], params["w2"], params["b2"])


# --------------------------------------------------------------------------
# pure-JAX reference (mirrors the PyTorch module exactly) for validation
# --------------------------------------------------------------------------
def ref_forward(raw, x):
    emb = raw["embedding"][x]
    B, T, _ = emb.shape
    H = raw["H"]
    layer_in = emb
    for l in range(raw["num_layers"]):
        outs = []
        for d in (0, 1):
            w_ih, w_hh, b_ih, b_hh = raw["lstm"][(l, d)]
            seq = layer_in if d == 0 else layer_in[:, ::-1, :]

            def step(carry, x_t, w_ih=w_ih, w_hh=w_hh, b_ih=b_ih, b_hh=b_hh):
                h, c = carry
                gates = x_t @ w_ih.T + h @ w_hh.T + b_ih + b_hh
                i, f, g, o = jnp.split(gates, 4, axis=-1)
                c = jax.nn.sigmoid(f) * c + jax.nn.sigmoid(i) * jnp.tanh(g)
                h = jax.nn.sigmoid(o) * jnp.tanh(c)
                return (h, c), h

            h0 = jnp.zeros((B, H), jnp.float32)
            c0 = jnp.zeros((B, H), jnp.float32)
            _, hs = lax.scan(step, (h0, c0), jnp.transpose(seq, (1, 0, 2)))
            hs = jnp.transpose(hs, (1, 0, 2))
            if d == 1:
                hs = hs[:, ::-1, :]
            outs.append(hs)
        layer_in = jnp.concatenate(outs, axis=-1)
    avg = jnp.mean(layer_in, axis=1)
    mx = jnp.max(layer_in, axis=1)
    conc = jnp.concatenate([avg, mx], axis=1)
    z = jnp.maximum(conc @ raw["fc1_w"].T + raw["fc1_b"], 0.0)
    return z @ raw["fc2_w"].T + raw["fc2_b"]


if __name__ == "__main__":
    # config (small shapes consistent with the module)
    n_vocab, E, H, num_layers, H2, C = 50, 32, 32, 2, 64, 4
    B, T = 2, 8

    key = jax.random.PRNGKey(0)
    keys = iter(jax.random.split(key, 64))

    def rnd(shape, scale=0.1):
        return (scale * jax.random.normal(next(keys), shape)).astype(jnp.float32)

    # raw (PyTorch-layout) parameters, deterministic init
    raw = {
        "embedding": rnd((n_vocab, E), 1.0),   # frozen pretrained embedding
        "num_layers": num_layers,
        "H": H,
        "lstm": {},
        "fc1_w": rnd((H2, H * 4)),             # hidden_size1 * 4 -> hidden_size2
        "fc1_b": rnd((H2,)),
        "fc2_w": rnd((C, H2)),
        "fc2_b": rnd((C,)),
    }
    for l in range(num_layers):
        in_size = E if l == 0 else 2 * H
        for d in (0, 1):
            w_ih = rnd((4 * H, in_size))
            w_hh = rnd((4 * H, H))
            b_ih = rnd((4 * H,))
            b_hh = rnd((4 * H,))
            raw["lstm"][(l, d)] = (w_ih, w_hh, b_ih, b_hh)

    # derived (kernel-layout) parameters
    params = {
        "embedding": raw["embedding"],
        "num_layers": num_layers,
        "H": H,
        "lstm": [],
        "w1": raw["fc1_w"].T,                  # (4H, H2): [avg_f|avg_b|max_f|max_b] rows
        "b1": raw["fc1_b"].reshape(1, -1),
        "w2": raw["fc2_w"].T,                  # (H2, C)
        "b2": raw["fc2_b"].reshape(1, -1),
    }
    for l in range(num_layers):
        wf_ih, wf_hh, bf_ih, bf_hh = raw["lstm"][(l, 0)]
        wb_ih, wb_hh, bb_ih, bb_hh = raw["lstm"][(l, 1)]
        params["lstm"].append({
            "w_ih": jnp.concatenate([wf_ih.T, wb_ih.T], axis=1),              # (in, 8H)
            "b": jnp.concatenate([bf_ih + bf_hh, bb_ih + bb_hh]).reshape(1, -1),  # (1, 8H)
            "w_hh_f": wf_hh.T,                                                # (H, 4H)
            "w_hh_b": wb_hh.T,                                                # (H, 4H)
        })

    # inputs
    x = jax.random.randint(next(keys), (B, T), 0, n_vocab, dtype=jnp.int32)

    out = bilstm_forward(params, x)
    out = jax.block_until_ready(out)

    ref = ref_forward(raw, x)
    assert out.shape == (B, C), out.shape
    assert jnp.allclose(out, ref, atol=1e-4, rtol=1e-4), (
        float(jnp.max(jnp.abs(out - ref))))

    print("KERNEL_OK")
</pallas_src>

<mosaic_0001>
module attributes {stable_mosaic.version = 11 : i64} {
  func.func @kernel(%arg0: memref<16x32xf32, #tpu.memory_space<vmem>>, %arg1: memref<32x256xf32, #tpu.memory_space<vmem>>, %arg2: memref<1x256xf32, #tpu.memory_space<vmem>>, %arg3: memref<32x128xf32, #tpu.memory_space<vmem>>, %arg4: memref<32x128xf32, #tpu.memory_space<vmem>>, %arg5: memref<64x256xf32, #tpu.memory_space<vmem>>, %arg6: memref<1x256xf32, #tpu.memory_space<vmem>>, %arg7: memref<32x128xf32, #tpu.memory_space<vmem>>, %arg8: memref<32x128xf32, #tpu.memory_space<vmem>>, %arg9: memref<128x64xf32, #tpu.memory_space<vmem>>, %arg10: memref<1x64xf32, #tpu.memory_space<vmem>>, %arg11: memref<64x4xf32, #tpu.memory_space<vmem>>, %arg12: memref<1x4xf32, #tpu.memory_space<vmem>>, %arg13: memref<2x4xf32, #tpu.memory_space<vmem>>, %arg14: memref<16x256xf32, #tpu.memory_space<vmem>>, %arg15: memref<16x64xf32, #tpu.memory_space<vmem>>) attributes {dimension_semantics = [], scalar_prefetch = 0 : i64, scratch_operands = 2 : i64, tpu.core_type = #tpu.core_type<tc>} {
    %c0 = arith.constant 0 : index
    %c0_0 = arith.constant 0 : index
    %0 = vector.load %arg0[%c0, %c0_0] : memref<16x32xf32, #tpu.memory_space<vmem>>, vector<16x32xf32>
    %c0_1 = arith.constant 0 : index
    %c0_2 = arith.constant 0 : index
    %1 = vector.load %arg1[%c0_1, %c0_2] : memref<32x256xf32, #tpu.memory_space<vmem>>, vector<32x256xf32>
    %cst = arith.constant dense<0.000000e+00> : vector<16x256xf32>
    %2 = tpu.matmul %0, %1, %cst {dimension_numbers = #tpu.dot_dimension_numbers<[1], [0], [0], [1], [0, 0, 1, 1], [], []>} : vector<16x32xf32>, vector<32x256xf32>, vector<16x256xf32> -> vector<16x256xf32>
    %c0_3 = arith.constant 0 : index
    %c0_4 = arith.constant 0 : index
    %3 = vector.load %arg2[%c0_3, %c0_4] : memref<1x256xf32, #tpu.memory_space<vmem>>, vector<1x256xf32>
    %4 = vector.broadcast %3 : vector<1x256xf32> to vector<16x256xf32>
    %5 = arith.addf %2, %4 : vector<16x256xf32>
    %c0_5 = arith.constant 0 : index
    %c0_6 = arith.constant 0 : index
    %6 = vector.load %arg14[%c0_5, %c0_6] : memref<16x256xf32, #tpu.memory_space<vmem>>, vector<16x256xf32>
    tpu.vector_store %arg14[%c0_5, %c0_6], %5 {strides = array<i32>} : memref<16x256xf32, #tpu.memory_space<vmem>>, vector<16x256xf32>,
    %c0_7 = arith.constant 0 : index
    %c0_8 = arith.constant 0 : index
    %7 = vector.load %arg3[%c0_7, %c0_8] : memref<32x128xf32, #tpu.memory_space<vmem>>, vector<32x128xf32>
    %c0_9 = arith.constant 0 : index
    %c0_10 = arith.constant 0 : index
    %8 = vector.load %arg4[%c0_9, %c0_10] : memref<32x128xf32, #tpu.memory_space<vmem>>, vector<32x128xf32>
    %cst_11 = arith.constant 0.000000e+00 : f32
    %9 = vector.broadcast %cst_11 : f32 to vector<2x32xf32>
    %cst_12 = arith.constant 0.000000e+00 : f32
    %10 = vector.broadcast %cst_12 : f32 to vector<2x32xf32>
    %cst_13 = arith.constant 0.000000e+00 : f32
    %11 = vector.broadcast %cst_13 : f32 to vector<2x32xf32>
    %cst_14 = arith.constant 0.000000e+00 : f32
    %12 = vector.broadcast %cst_14 : f32 to vector<2x32xf32>
    %c0_15 = arith.constant 0 : index
    %c0_16 = arith.constant 0 : index
    %13 = vector.load %arg14[%c0_15, %c0_16] : memref<16x256xf32, #tpu.memory_space<vmem>>, vector<2x128xf32>
    %cst_17 = arith.constant dense<0.000000e+00> : vector<2x128xf32>
    %14 = tpu.matmul %9, %7, %cst_17 {dimension_numbers = #tpu.dot_dimension_numbers<[1], [0], [0], [1], [0, 0, 1, 1], [], []>} : vector<2x32xf32>, vector<32x128xf32>, vector<2x128xf32> -> vector<2x128xf32>
    %15 = arith.addf %13, %14 : vector<2x128xf32>
    %c14 = arith.constant 14 : index
    %c128 = arith.constant 128 : index
    %16 = vector.load %arg14[%c14, %c128] : memref<16x256xf32, #tpu.memory_space<vmem>>, vector<2x128xf32>
    %cst_18 = arith.constant dense<0.000000e+00> : vector<2x128xf32>
    %17 = tpu.matmul %11, %8, %cst_18 {dimension_numbers = #tpu.dot_dimension_numbers<[1], [0], [0], [1], [0, 0, 1, 1], [], []>} : vector<2x32xf32>, vector<32x128xf32>, vector<2x128xf32> -> vector<2x128xf32>
    %18 = arith.addf %16, %17 : vector<2x128xf32>
    %19 = vector.extract_strided_slice %15 {offsets = [0, 0], sizes = [2, 32], strides = [1, 1]} : vector<2x128xf32> to vector<2x32xf32>
    %20 = arith.negf %19 : vector<2x32xf32>
    %21 = math.exp %20 : vector<2x32xf32>
    %cst_19 = arith.constant 1.000000e+00 : f32
    %22 = vector.broadcast %cst_19 : f32 to vector<2x32xf32>
    %23 = arith.addf %22, %21 : vector<2x32xf32>
    %24 = arith.divf %22, %23 : vector<2x32xf32>
    %25 = vector.extract_strided_slice %15 {offsets = [0, 32], sizes = [2, 32], strides = [1, 1]} : vector<2x128xf32> to vector<2x32xf32>
    %26 = arith.negf %25 : vector<2x32xf32>
    %27 = math.exp %26 : vector<2x32xf32>
    %cst_20 = arith.constant 1.000000e+00 : f32
    %28 = vector.broadcast %cst_20 : f32 to vector<2x32xf32>
    %29 = arith.addf %28, %27 : vector<2x32xf32>
    %30 = arith.divf %28, %29 : vector<2x32xf32>
    %31 = vector.extract_strided_slice %15 {offsets = [0, 64], sizes = [2, 32], strides = [1, 1]} : vector<2x128xf32> to vector<2x32xf32>
    %32 = math.tanh %31 : vector<2x32xf32>
    %33 = vector.extract_strided_slice %15 {offsets = [0, 96], sizes = [2, 32], strides = [1, 1]} : vector<2x128xf32> to vector<2x32xf32>
    %34 = arith.negf %33 : vector<2x32xf32>
    %35 = math.exp %34 : vector<2x32xf32>
    %cst_21 = arith.constant 1.000000e+00 : f32
    %36 = vector.broadcast %cst_21 : f32 to vector<2x32xf32>
    %37 = arith.addf %36, %35 : vector<2x32xf32>
    %38 = arith.divf %36, %37 : vector<2x32xf32>
    %39 = arith.mulf %30, %10 : vector<2x32xf32>
    %40 = arith.mulf %24, %32 : vector<2x32xf32>
    %41 = arith.addf %39, %40 : vector<2x32xf32>
    %42 = math.tanh %41 : vector<2x32xf32>
    %43 = arith.mulf %38, %42 : vector<2x32xf32>
    %44 = vector.extract_strided_slice %18 {offsets = [0, 0], sizes = [2, 32], strides = [1, 1]} : vector<2x128xf32> to vector<2x32xf32>
    %45 = arith.negf %44 : vector<2x32xf32>
    %46 = math.exp %45 : vector<2x32xf32>
    %cst_22 = arith.constant 1.000000e+00 : f32
    %47 = vector.broadcast %cst_22 : f32 to vector<2x32xf32>
    %48 = arith.addf %47, %46 : vector<2x32xf32>
    %49 = arith.divf %47, %48 : vector<2x32xf32>
    %50 = vector.extract_strided_slice %18 {offsets = [0, 32], sizes = [2, 32], strides = [1, 1]} : vector<2x128xf32> to vector<2x32xf32>
    %51 = arith.negf %50 : vector<2x32xf32>
    %52 = math.exp %51 : vector<2x32xf32>
    %cst_23 = arith.constant 1.000000e+00 : f32
    %53 = vector.broadcast %cst_23 : f32 to vector<2x32xf32>
    %54 = arith.addf %53, %52 : vector<2x32xf32>
    %55 = arith.divf %53, %54 : vector<2x32xf32>
    %56 = vector.extract_strided_slice %18 {offsets = [0, 64], sizes = [2, 32], strides = [1, 1]} : vector<2x128xf32> to vector<2x32xf32>
    %57 = math.tanh %56 : vector<2x32xf32>
    %58 = vector.extract_strided_slice %18 {offsets = [0, 96], sizes = [2, 32], strides = [1, 1]} : vector<2x128xf32> to vector<2x32xf32>
    %59 = arith.negf %58 : vector<2x32xf32>
    %60 = math.exp %59 : vector<2x32xf32>
    %cst_24 = arith.constant 1.000000e+00 : f32
    %61 = vector.broadcast %cst_24 : f32 to vector<2x32xf32>
    %62 = arith.addf %61, %60 : vector<2x32xf32>
    %63 = arith.divf %61, %62 : vector<2x32xf32>
    %64 = arith.mulf %55, %12 : vector<2x32xf32>
    %65 = arith.mulf %49, %57 : vector<2x32xf32>
    %66 = arith.addf %64, %65 : vector<2x32xf32>
    %67 = math.tanh %66 : vector<2x32xf32>
    %68 = arith.mulf %63, %67 : vector<2x32xf32>
    %c0_25 = arith.constant 0 : index
    %c0_26 = arith.constant 0 : index
    %69 = vector.load %arg15[%c0_25, %c0_26] : memref<16x64xf32, #tpu.memory_space<vmem>>, vector<2x32xf32>
    tpu.vector_store %arg15[%c0_25, %c0_26], %43 {strides = array<i32>} : memref<16x64xf32, #tpu.memory_space<vmem>>, vector<2x32xf32>,
    %c14_27 = arith.constant 14 : index
    %c32 = arith.constant 32 : index
    %70 = vector.load %arg15[%c14_27, %c32] : memref<16x64xf32, #tpu.memory_space<vmem>>, vector<2x32xf32>
    tpu.vector_store %arg15[%c14_27, %c32], %68 {strides = array<i32>} : memref<16x64xf32, #tpu.memory_space<vmem>>, vector<2x32xf32>,
    %c2 = arith.constant 2 : index
    %c0_28 = arith.constant 0 : index
    %71 = vector.load %arg14[%c2, %c0_28] : memref<16x256xf32, #tpu.memory_space<vmem>>, vector<2x128xf32>
    %cst_29 = arith.constant dense<0.000000e+00> : vector<2x128xf32>
    %72 = tpu.matmul %43, %7, %cst_29 {dimension_numbers = #tpu.dot_dimension_numbers<[1], [0], [0], [1], [0, 0, 1, 1], [], []>} : vector<2x32xf32>, vector<32x128xf32>, vector<2x128xf32> -> vector<2x128xf32>
    %73 = arith.addf %71, %72 : vector<2x128xf32>
    %c12 = arith.constant 12 : index
    %c128_30 = arith.constant 128 : index
    %74 = vector.load %arg14[%c12, %c128_30] : memref<16x256xf32, #tpu.memory_space<vmem>>, vector<2x128xf32>
    %cst_31 = arith.constant dense<0.000000e+00> : vector<2x128xf32>
    %75 = tpu.matmul %68, %8, %cst_31 {dimension_numbers = #tpu.dot_dimension_numbers<[1], [0], [0], [1], [0, 0, 1, 1], [], []>} : vector<2x32xf32>, vector<32x128xf32>, vector<2x128xf32> -> vector<2x128xf32>
    %76 = arith.addf %74, %75 : vector<2x128xf32>
    %77 = vector.extract_strided_slice %73 {offsets = [0, 0], sizes = [2, 32], strides = [1, 1]} : vector<2x128xf32> to vector<2x32xf32>
    %78 = arith.negf %77 : vector<2x32xf32>
    %79 = math.exp %78 : vector<2x32xf32>
    %cst_32 = arith.constant 1.000000e+00 : f32
    %80 = vector.broadcast %cst_32 : f32 to vector<2x32xf32>
    %81 = arith.addf %80, %79 : vector<2x32xf32>
    %82 = arith.divf %80, %81 : vector<2x32xf32>
    %83 = vector.extract_strided_slice %73 {offsets = [0, 32], sizes = [2, 32], strides = [1, 1]} : vector<2x128xf32> to vector<2x32xf32>
    %84 = arith.negf %83 : vector<2x32xf32>
    %85 = math.exp %84 : vector<2x32xf32>
    %cst_33 = arith.constant 1.000000e+00 : f32
    %86 = vector.broadcast %cst_33 : f32 to vector<2x32xf32>
    %87 = arith.addf %86, %85 : vector<2x32xf32>
    %88 = arith.divf %86, %87 : vector<2x32xf32>
    %89 = vector.extract_strided_slice %73 {offsets = [0, 64], sizes = [2, 32], strides = [1, 1]} : vector<2x128xf32> to vector<2x32xf32>
    %90 = math.tanh %89 : vector<2x32xf32>
    %91 = vector.extract_strided_slice %73 {offsets = [0, 96], sizes = [2, 32], strides = [1, 1]} : vector<2x128xf32> to vector<2x32xf32>
    %92 = arith.negf %91 : vector<2x32xf32>
    %93 = math.exp %92 : vector<2x32xf32>
    %cst_34 = arith.constant 1.000000e+00 : f32
    %94 = vector.broadcast %cst_34 : f32 to vector<2x32xf32>
    %95 = arith.addf %94, %93 : vector<2x32xf32>
    %96 = arith.divf %94, %95 : vector<2x32xf32>
    %97 = arith.mulf %88, %41 : vector<2x32xf32>
    %98 = arith.mulf %82, %90 : vector<2x32xf32>
    %99 = arith.addf %97, %98 : vector<2x32xf32>
    %100 = math.tanh %99 : vector<2x32xf32>
    %101 = arith.mulf %96, %100 : vector<2x32xf32>
    %102 = vector.extract_strided_slice %76 {offsets = [0, 0], sizes = [2, 32], strides = [1, 1]} : vector<2x128xf32> to vector<2x32xf32>
    %103 = arith.negf %102 : vector<2x32xf32>
    %104 = math.exp %103 : vector<2x32xf32>
    %cst_35 = arith.constant 1.000000e+00 : f32
    %105 = vector.broadcast %cst_35 : f32 to vector<2x32xf32>
    %106 = arith.addf %105, %104 : vector<2x32xf32>
    %107 = arith.divf %105, %106 : vector<2x32xf32>
    %108 = vector.extract_strided_slice %76 {offsets = [0, 32], sizes = [2, 32], strides = [1, 1]} : vector<2x128xf32> to vector<2x32xf32>
    %109 = arith.negf %108 : vector<2x32xf32>
    %110 = math.exp %109 : vector<2x32xf32>
    %cst_36 = arith.constant 1.000000e+00 : f32
    %111 = vector.broadcast %cst_36 : f32 to vector<2x32xf32>
    %112 = arith.addf %111, %110 : vector<2x32xf32>
    %113 = arith.divf %111, %112 : vector<2x32xf32>
    %114 = vector.extract_strided_slice %76 {offsets = [0, 64], sizes = [2, 32], strides = [1, 1]} : vector<2x128xf32> to vector<2x32xf32>
    %115 = math.tanh %114 : vector<2x32xf32>
    %116 = vector.extract_strided_slice %76 {offsets = [0, 96], sizes = [2, 32], strides = [1, 1]} : vector<2x128xf32> to vector<2x32xf32>
    %117 = arith.negf %116 : vector<2x32xf32>
    %118 = math.exp %117 : vector<2x32xf32>
    %cst_37 = arith.constant 1.000000e+00 : f32
    %119 = vector.broadcast %cst_37 : f32 to vector<2x32xf32>
    %120 = arith.addf %119, %118 : vector<2x32xf32>
    %121 = arith.divf %119, %120 : vector<2x32xf32>
    %122 = arith.mulf %113, %66 : vector<2x32xf32>
    %123 = arith.mulf %107, %115 : vector<2x32xf32>
    %124 = arith.addf %122, %123 : vector<2x32xf32>
    %125 = math.tanh %124 : vector<2x32xf32>
    %126 = arith.mulf %121, %125 : vector<2x32xf32>
    %c2_38 = arith.constant 2 : index
    %c0_39 = arith.constant 0 : index
    %127 = vector.load %arg15[%c2_38, %c0_39] : memref<16x64xf32, #tpu.memory_space<vmem>>, vector<2x32xf32>
    tpu.vector_store %arg15[%c2_38, %c0_39], %101 {strides = array<i32>} : memref<16x64xf32, #tpu.memory_space<vmem>>, vector<2x32xf32>,
    %c12_40 = arith.constant 12 : index
    %c32_41 = arith.constant 32 : index
    %128 = vector.load %arg15[%c12_40, %c32_41] : memref<16x64xf32, #tpu.memory_space<vmem>>, vector<2x32xf32>
    tpu.vector_store %arg15[%c12_40, %c32_41], %126 {strides = array<i32>} : memref<16x64xf32, #tpu.memory_space<vmem>>, vector<2x32xf32>,
    %c4 = arith.constant 4 : index
    %c0_42 = arith.constant 0 : index
    %129 = vector.load %arg14[%c4, %c0_42] : memref<16x256xf32, #tpu.memory_space<vmem>>, vector<2x128xf32>
    %cst_43 = arith.constant dense<0.000000e+00> : vector<2x128xf32>
    %130 = tpu.matmul %101, %7, %cst_43 {dimension_numbers = #tpu.dot_dimension_numbers<[1], [0], [0], [1], [0, 0, 1, 1], [], []>} : vector<2x32xf32>, vector<32x128xf32>, vector<2x128xf32> -> vector<2x128xf32>
    %131 = arith.addf %129, %130 : vector<2x128xf32>
    %c10 = arith.constant 10 : index
    %c128_44 = arith.constant 128 : index
    %132 = vector.load %arg14[%c10, %c128_44] : memref<16x256xf32, #tpu.memory_space<vmem>>, vector<2x128xf32>
    %cst_45 = arith.constant dense<0.000000e+00> : vector<2x128xf32>
    %133 = tpu.matmul %126, %8, %cst_45 {dimension_numbers = #tpu.dot_dimension_numbers<[1], [0], [0], [1], [0, 0, 1, 1], [], []>} : vector<2x32xf32>, vector<32x128xf32>, vector<2x128xf32> -> vector<2x128xf32>
    %134 = arith.addf %132, %133 : vector<2x128xf32>
    %135 = vector.extract_strided_slice %131 {offsets = [0, 0], sizes = [2, 32], strides = [1, 1]} : vector<2x128xf32> to vector<2x32xf32>
    %136 = arith.negf %135 : vector<2x32xf32>
    %137 = math.exp %136 : vector<2x32xf32>
    %cst_46 = arith.constant 1.000000e+00 : f32
    %138 = vector.broadcast %cst_46 : f32 to vector<2x32xf32>
    %139 = arith.addf %138, %137 : vector<2x32xf32>
    %140 = arith.divf %138, %139 : vector<2x32xf32>
    %141 = vector.extract_strided_slice %131 {offsets = [0, 32], sizes = [2, 32], strides = [1, 1]} : vector<2x128xf32> to vector<2x32xf32>
    %142 = arith.negf %141 : vector<2x32xf32>
    %143 = math.exp %142 : vector<2x32xf32>
    %cst_47 = arith.constant 1.000000e+00 : f32
    %144 = vector.broadcast %cst_47 : f32 to vector<2x32xf32>
    %145 = arith.addf %144, %143 : vector<2x32xf32>
    %146 = arith.divf %144, %145 : vector<2x32xf32>
    %147 = vector.extract_strided_slice %131 {offsets = [0, 64], sizes = [2, 32], strides = [1, 1]} : vector<2x128xf32> to vector<2x32xf32>
    %148 = math.tanh %147 : vector<2x32xf32>
    %149 = vector.extract_strided_slice %131 {offsets = [0, 96], sizes = [2, 32], strides = [1, 1]} : vector<2x128xf32> to vector<2x32xf32>
    %150 = arith.negf %149 : vector<2x32xf32>
    %151 = math.exp %150 : vector<2x32xf32>
    %cst_48 = arith.constant 1.000000e+00 : f32
    %152 = vector.broadcast %cst_48 : f32 to vector<2x32xf32>
    %153 = arith.addf %152, %151 : vector<2x32xf32>
    %154 = arith.divf %152, %153 : vector<2x32xf32>
    %155 = arith.mulf %146, %99 : vector<2x32xf32>
    %156 = arith.mulf %140, %148 : vector<2x32xf32>
    %157 = arith.addf %155, %156 : vector<2x32xf32>
    %158 = math.tanh %157 : vector<2x32xf32>
    %159 = arith.mulf %154, %158 : vector<2x32xf32>
    %160 = vector.extract_strided_slice %134 {offsets = [0, 0], sizes = [2, 32], strides = [1, 1]} : vector<2x128xf32> to vector<2x32xf32>
    %161 = arith.negf %160 : vector<2x32xf32>
    %162 = math.exp %161 : vector<2x32xf32>
    %cst_49 = arith.constant 1.000000e+00 : f32
    %163 = vector.broadcast %cst_49 : f32 to vector<2x32xf32>
    %164 = arith.addf %163, %162 : vector<2x32xf32>
    %165 = arith.divf %163, %164 : vector<2x32xf32>
    %166 = vector.extract_strided_slice %134 {offsets = [0, 32], sizes = [2, 32], strides = [1, 1]} : vector<2x128xf32> to vector<2x32xf32>
    %167 = arith.negf %166 : vector<2x32xf32>
    %168 = math.exp %167 : vector<2x32xf32>
    %cst_50 = arith.constant 1.000000e+00 : f32
    %169 = vector.broadcast %cst_50 : f32 to vector<2x32xf32>
    %170 = arith.addf %169, %168 : vector<2x32xf32>
    %171 = arith.divf %169, %170 : vector<2x32xf32>
    %172 = vector.extract_strided_slice %134 {offsets = [0, 64], sizes = [2, 32], strides = [1, 1]} : vector<2x128xf32> to vector<2x32xf32>
    %173 = math.tanh %172 : vector<2x32xf32>
    %174 = vector.extract_strided_slice %134 {offsets = [0, 96], sizes = [2, 32], strides = [1, 1]} : vector<2x128xf32> to vector<2x32xf32>
    %175 = arith.negf %174 : vector<2x32xf32>
    %176 = math.exp %175 : vector<2x32xf32>
    %cst_51 = arith.constant 1.000000e+00 : f32
    %177 = vector.broadcast %cst_51 : f32 to vector<2x32xf32>
    %178 = arith.addf %177, %176 : vector<2x32xf32>
    %179 = arith.divf %177, %178 : vector<2x32xf32>
    %180 = arith.mulf %171, %124 : vector<2x32xf32>
    %181 = arith.mulf %165, %173 : vector<2x32xf32>
    %182 = arith.addf %180, %181 : vector<2x32xf32>
    %183 = math.tanh %182 : vector<2x32xf32>
    %184 = arith.mulf %179, %183 : vector<2x32xf32>
    %c4_52 = arith.constant 4 : index
    %c0_53 = arith.constant 0 : index
    %185 = vector.load %arg15[%c4_52, %c0_53] : memref<16x64xf32, #tpu.memory_space<vmem>>, vector<2x32xf32>
    tpu.vector_store %arg15[%c4_52, %c0_53], %159 {strides = array<i32>} : memref<16x64xf32, #tpu.memory_space<vmem>>, vector<2x32xf32>,
    %c10_54 = arith.constant 10 : index
    %c32_55 = arith.constant 32 : index
    %186 = vector.load %arg15[%c10_54, %c32_55] : memref<16x64xf32, #tpu.memory_space<vmem>>, vector<2x32xf32>
    tpu.vector_store %arg15[%c10_54, %c32_55], %184 {strides = array<i32>} : memref<16x64xf32, #tpu.memory_space<vmem>>, vector<2x32xf32>,
    %c6 = arith.constant 6 : index
    %c0_56 = arith.constant 0 : index
    %187 = vector.load %arg14[%c6, %c0_56] : memref<16x256xf32, #tpu.memory_space<vmem>>, vector<2x128xf32>
    %cst_57 = arith.constant dense<0.000000e+00> : vector<2x128xf32>
    %188 = tpu.matmul %159, %7, %cst_57 {dimension_numbers = #tpu.dot_dimension_numbers<[1], [0], [0], [1], [0, 0, 1, 1], [], []>} : vector<2x32xf32>, vector<32x128xf32>, vector<2x128xf32> -> vector<2x128xf32>
    %189 = arith.addf %187, %188 : vector<2x128xf32>
    %c8 = arith.constant 8 : index
    %c128_58 = arith.constant 128 : index
    %190 = vector.load %arg14[%c8, %c128_58] : memref<16x256xf32, #tpu.memory_space<vmem>>, vector<2x128xf32>
    %cst_59 = arith.constant dense<0.000000e+00> : vector<2x128xf32>
    %191 = tpu.matmul %184, %8, %cst_59 {dimension_numbers = #tpu.dot_dimension_numbers<[1], [0], [0], [1], [0, 0, 1, 1], [], []>} : vector<2x32xf32>, vector<32x128xf32>, vector<2x128xf32> -> vector<2x128xf32>
    %192 = arith.addf %190, %191 : vector<2x128xf32>
    %193 = vector.extract_strided_slice %189 {offsets = [0, 0], sizes = [2, 32], strides = [1, 1]} : vector<2x128xf32> to vector<2x32xf32>
    %194 = arith.negf %193 : vector<2x32xf32>
    %195 = math.exp %194 : vector<2x32xf32>
    %cst_60 = arith.constant 1.000000e+00 : f32
    %196 = vector.broadcast %cst_60 : f32 to vector<2x32xf32>
    %197 = arith.addf %196, %195 : vector<2x32xf32>
    %198 = arith.divf %196, %197 : vector<2x32xf32>
    %199 = vector.extract_strided_slice %189 {offsets = [0, 32], sizes = [2, 32], strides = [1, 1]} : vector<2x128xf32> to vector<2x32xf32>
    %200 = arith.negf %199 : vector<2x32xf32>
    %201 = math.exp %200 : vector<2x32xf32>
    %cst_61 = arith.constant 1.000000e+00 : f32
    %202 = vector.broadcast %cst_61 : f32 to vector<2x32xf32>
    %203 = arith.addf %202, %201 : vector<2x32xf32>
    %204 = arith.divf %202, %203 : vector<2x32xf32>
    %205 = vector.extract_strided_slice %189 {offsets = [0, 64], sizes = [2, 32], strides = [1, 1]} : vector<2x128xf32> to vector<2x32xf32>
    %206 = math.tanh %205 : vector<2x32xf32>
    %207 = vector.extract_strided_slice %189 {offsets = [0, 96], sizes = [2, 32], strides = [1, 1]} : vector<2x128xf32> to vector<2x32xf32>
    %208 = arith.negf %207 : vector<2x32xf32>
    %209 = math.exp %208 : vector<2x32xf32>
    %cst_62 = arith.constant 1.000000e+00 : f32
    %210 = vector.broadcast %cst_62 : f32 to vector<2x32xf32>
    %211 = arith.addf %210, %209 : vector<2x32xf32>
    %212 = arith.divf %210, %211 : vector<2x32xf32>
    %213 = arith.mulf %204, %157 : vector<2x32xf32>
    %214 = arith.mulf %198, %206 : vector<2x32xf32>
    %215 = arith.addf %213, %214 : vector<2x32xf32>
    %216 = math.tanh %215 : vector<2x32xf32>
    %217 = arith.mulf %212, %216 : vector<2x32xf32>
    %218 = vector.extract_strided_slice %192 {offsets = [0, 0], sizes = [2, 32], strides = [1, 1]} : vector<2x128xf32> to vector<2x32xf32>
    %219 = arith.negf %218 : vector<2x32xf32>
    %220 = math.exp %219 : vector<2x32xf32>
    %cst_63 = arith.constant 1.000000e+00 : f32
    %221 = vector.broadcast %cst_63 : f32 to vector<2x32xf32>
    %222 = arith.addf %221, %220 : vector<2x32xf32>
    %223 = arith.divf %221, %222 : vector<2x32xf32>
    %224 = vector.extract_strided_slice %192 {offsets = [0, 32], sizes = [2, 32], strides = [1, 1]} : vector<2x128xf32> to vector<2x32xf32>
    %225 = arith.negf %224 : vector<2x32xf32>
    %226 = math.exp %225 : vector<2x32xf32>
    %cst_64 = arith.constant 1.000000e+00 : f32
    %227 = vector.broadcast %cst_64 : f32 to vector<2x32xf32>
    %228 = arith.addf %227, %226 : vector<2x32xf32>
    %229 = arith.divf %227, %228 : vector<2x32xf32>
    %230 = vector.extract_strided_slice %192 {offsets = [0, 64], sizes = [2, 32], strides = [1, 1]} : vector<2x128xf32> to vector<2x32xf32>
    %231 = math.tanh %230 : vector<2x32xf32>
    %232 = vector.extract_strided_slice %192 {offsets = [0, 96], sizes = [2, 32], strides = [1, 1]} : vector<2x128xf32> to vector<2x32xf32>
    %233 = arith.negf %232 : vector<2x32xf32>
    %234 = math.exp %233 : vector<2x32xf32>
    %cst_65 = arith.constant 1.000000e+00 : f32
    %235 = vector.broadcast %cst_65 : f32 to vector<2x32xf32>
    %236 = arith.addf %235, %234 : vector<2x32xf32>
    %237 = arith.divf %235, %236 : vector<2x32xf32>
    %238 = arith.mulf %229, %182 : vector<2x32xf32>
    %239 = arith.mulf %223, %231 : vector<2x32xf32>
    %240 = arith.addf %238, %239 : vector<2x32xf32>
    %241 = math.tanh %240 : vector<2x32xf32>
    %242 = arith.mulf %237, %241 : vector<2x32xf32>
    %c6_66 = arith.constant 6 : index
    %c0_67 = arith.constant 0 : index
    %243 = vector.load %arg15[%c6_66, %c0_67] : memref<16x64xf32, #tpu.memory_space<vmem>>, vector<2x32xf32>
    tpu.vector_store %arg15[%c6_66, %c0_67], %217 {strides = array<i32>} : memref<16x64xf32, #tpu.memory_space<vmem>>, vector<2x32xf32>,
    %c8_68 = arith.constant 8 : index
    %c32_69 = arith.constant 32 : index
    %244 = vector.load %arg15[%c8_68, %c32_69] : memref<16x64xf32, #tpu.memory_space<vmem>>, vector<2x32xf32>
    tpu.vector_store %arg15[%c8_68, %c32_69], %242 {strides = array<i32>} : memref<16x64xf32, #tpu.memory_space<vmem>>, vector<2x32xf32>,
    %c8_70 = arith.constant 8 : index
    %c0_71 = arith.constant 0 : index
    %245 = vector.load %arg14[%c8_70, %c0_71] : memref<16x256xf32, #tpu.memory_space<vmem>>, vector<2x128xf32>
    %cst_72 = arith.constant dense<0.000000e+00> : vector<2x128xf32>
    %246 = tpu.matmul %217, %7, %cst_72 {dimension_numbers = #tpu.dot_dimension_numbers<[1], [0], [0], [1], [0, 0, 1, 1], [], []>} : vector<2x32xf32>, vector<32x128xf32>, vector<2x128xf32> -> vector<2x128xf32>
    %247 = arith.addf %245, %246 : vector<2x128xf32>
    %c6_73 = arith.constant 6 : index
    %c128_74 = arith.constant 128 : index
    %248 = vector.load %arg14[%c6_73, %c128_74] : memref<16x256xf32, #tpu.memory_space<vmem>>, vector<2x128xf32>
    %cst_75 = arith.constant dense<0.000000e+00> : vector<2x128xf32>
    %249 = tpu.matmul %242, %8, %cst_75 {dimension_numbers = #tpu.dot_dimension_numbers<[1], [0], [0], [1], [0, 0, 1, 1], [], []>} : vector<2x32xf32>, vector<32x128xf32>, vector<2x128xf32> -> vector<2x128xf32>
    %250 = arith.addf %248, %249 : vector<2x128xf32>
    %251 = vector.extract_strided_slice %247 {offsets = [0, 0], sizes = [2, 32], strides = [1, 1]} : vector<2x128xf32> to vector<2x32xf32>
    %252 = arith.negf %251 : vector<2x32xf32>
    %253 = math.exp %252 : vector<2x32xf32>
    %cst_76 = arith.constant 1.000000e+00 : f32
    %254 = vector.broadcast %cst_76 : f32 to vector<2x32xf32>
    %255 = arith.addf %254, %253 : vector<2x32xf32>
    %256 = arith.divf %254, %255 : vector<2x32xf32>
    %257 = vector.extract_strided_slice %247 {offsets = [0, 32], sizes = [2, 32], strides = [1, 1]} : vector<2x128xf32> to vector<2x32xf32>
    %258 = arith.negf %257 : vector<2x32xf32>
    %259 = math.exp %258 : vector<2x32xf32>
    %cst_77 = arith.constant 1.000000e+00 : f32
    %260 = vector.broadcast %cst_77 : f32 to vector<2x32xf32>
    %261 = arith.addf %260, %259 : vector<2x32xf32>
    %262 = arith.divf %260, %261 : vector<2x32xf32>
    %263 = vector.extract_strided_slice %247 {offsets = [0, 64], sizes = [2, 32], strides = [1, 1]} : vector<2x128xf32> to vector<2x32xf32>
    %264 = math.tanh %263 : vector<2x32xf32>
    %265 = vector.extract_strided_slice %247 {offsets = [0, 96], sizes = [2, 32], strides = [1, 1]} : vector<2x128xf32> to vector<2x32xf32>
    %266 = arith.negf %265 : vector<2x32xf32>
    %267 = math.exp %266 : vector<2x32xf32>
    %cst_78 = arith.constant 1.000000e+00 : f32
    %268 = vector.broadcast %cst_78 : f32 to vector<2x32xf32>
    %269 = arith.addf %268, %267 : vector<2x32xf32>
    %270 = arith.divf %268, %269 : vector<2x32xf32>
    %271 = arith.mulf %262, %215 : vector<2x32xf32>
    %272 = arith.mulf %256, %264 : vector<2x32xf32>
    %273 = arith.addf %271, %272 : vector<2x32xf32>
    %274 = math.tanh %273 : vector<2x32xf32>
    %275 = arith.mulf %270, %274 : vector<2x32xf32>
    %276 = vector.extract_strided_slice %250 {offsets = [0, 0], sizes = [2, 32], strides = [1, 1]} : vector<2x128xf32> to vector<2x32xf32>
    %277 = arith.negf %276 : vector<2x32xf32>
    %278 = math.exp %277 : vector<2x32xf32>
    %cst_79 = arith.constant 1.000000e+00 : f32
    %279 = vector.broadcast %cst_79 : f32 to vector<2x32xf32>
    %280 = arith.addf %279, %278 : vector<2x32xf32>
    %281 = arith.divf %279, %280 : vector<2x32xf32>
    %282 = vector.extract_strided_slice %250 {offsets = [0, 32], sizes = [2, 32], strides = [1, 1]} : vector<2x128xf32> to vector<2x32xf32>
    %283 = arith.negf %282 : vector<2x32xf32>
    %284 = math.exp %283 : vector<2x32xf32>
    %cst_80 = arith.constant 1.000000e+00 : f32
    %285 = vector.broadcast %cst_80 : f32 to vector<2x32xf32>
    %286 = arith.addf %285, %284 : vector<2x32xf32>
    %287 = arith.divf %285, %286 : vector<2x32xf32>
    %288 = vector.extract_strided_slice %250 {offsets = [0, 64], sizes = [2, 32], strides = [1, 1]} : vector<2x128xf32> to vector<2x32xf32>
    %289 = math.tanh %288 : vector<2x32xf32>
    %290 = vector.extract_strided_slice %250 {offsets = [0, 96], sizes = [2, 32], strides = [1, 1]} : vector<2x128xf32> to vector<2x32xf32>
    %291 = arith.negf %290 : vector<2x32xf32>
    %292 = math.exp %291 : vector<2x32xf32>
    %cst_81 = arith.constant 1.000000e+00 : f32
    %293 = vector.broadcast %cst_81 : f32 to vector<2x32xf32>
    %294 = arith.addf %293, %292 : vector<2x32xf32>
    %295 = arith.divf %293, %294 : vector<2x32xf32>
    %296 = arith.mulf %287, %240 : vector<2x32xf32>
    %297 = arith.mulf %281, %289 : vector<2x32xf32>
    %298 = arith.addf %296, %297 : vector<2x32xf32>
    %299 = math.tanh %298 : vector<2x32xf32>
    %300 = arith.mulf %295, %299 : vector<2x32xf32>
    %c8_82 = arith.constant 8 : index
    %c0_83 = arith.constant 0 : index
    %301 = vector.load %arg15[%c8_82, %c0_83] : memref<16x64xf32, #tpu.memory_space<vmem>>, vector<2x32xf32>
    tpu.vector_store %arg15[%c8_82, %c0_83], %275 {strides = array<i32>} : memref<16x64xf32, #tpu.memory_space<vmem>>, vector<2x32xf32>,
    %c6_84 = arith.constant 6 : index
    %c32_85 = arith.constant 32 : index
    %302 = vector.load %arg15[%c6_84, %c32_85] : memref<16x64xf32, #tpu.memory_space<vmem>>, vector<2x32xf32>
    tpu.vector_store %arg15[%c6_84, %c32_85], %300 {strides = array<i32>} : memref<16x64xf32, #tpu.memory_space<vmem>>, vector<2x32xf32>,
    %c10_86 = arith.constant 10 : index
    %c0_87 = arith.constant 0 : index
    %303 = vector.load %arg14[%c10_86, %c0_87] : memref<16x256xf32, #tpu.memory_space<vmem>>, vector<2x128xf32>
    %cst_88 = arith.constant dense<0.000000e+00> : vector<2x128xf32>
    %304 = tpu.matmul %275, %7, %cst_88 {dimension_numbers = #tpu.dot_dimension_numbers<[1], [0], [0], [1], [0, 0, 1, 1], [], []>} : vector<2x32xf32>, vector<32x128xf32>, vector<2x128xf32> -> vector<2x128xf32>
    %305 = arith.addf %303, %304 : vector<2x128xf32>
    %c4_89 = arith.constant 4 : index
    %c128_90 = arith.constant 128 : index
    %306 = vector.load %arg14[%c4_89, %c128_90] : memref<16x256xf32, #tpu.memory_space<vmem>>, vector<2x128xf32>
    %cst_91 = arith.constant dense<0.000000e+00> : vector<2x128xf32>
    %307 = tpu.matmul %300, %8, %cst_91 {dimension_numbers = #tpu.dot_dimension_numbers<[1], [0], [0], [1], [0, 0, 1, 1], [], []>} : vector<2x32xf32>, vector<32x128xf32>, vector<2x128xf32> -> vector<2x128xf32>
    %308 = arith.addf %306, %307 : vector<2x128xf32>
    %309 = vector.extract_strided_slice %305 {offsets = [0, 0], sizes = [2, 32], strides = [1, 1]} : vector<2x128xf32> to vector<2x32xf32>
    %310 = arith.negf %309 : vector<2x32xf32>
    %311 = math.exp %310 : vector<2x32xf32>
    %cst_92 = arith.constant 1.000000e+00 : f32
    %312 = vector.broadcast %cst_92 : f32 to vector<2x32xf32>
    %313 = arith.addf %312, %311 : vector<2x32xf32>
    %314 = arith.divf %312, %313 : vector<2x32xf32>
    %315 = vector.extract_strided_slice %305 {offsets = [0, 32], sizes = [2, 32], strides = [1, 1]} : vector<2x128xf32> to vector<2x32xf32>
    %316 = arith.negf %315 : vector<2x32xf32>
    %317 = math.exp %316 : vector<2x32xf32>
    %cst_93 = arith.constant 1.000000e+00 : f32
    %318 = vector.broadcast %cst_93 : f32 to vector<2x32xf32>
    %319 = arith.addf %318, %317 : vector<2x32xf32>
    %320 = arith.divf %318, %319 : vector<2x32xf32>
    %321 = vector.extract_strided_slice %305 {offsets = [0, 64], sizes = [2, 32], strides = [1, 1]} : vector<2x128xf32> to vector<2x32xf32>
    %322 = math.tanh %321 : vector<2x32xf32>
    %323 = vector.extract_strided_slice %305 {offsets = [0, 96], sizes = [2, 32], strides = [1, 1]} : vector<2x128xf32> to vector<2x32xf32>
    %324 = arith.negf %323 : vector<2x32xf32>
    %325 = math.exp %324 : vector<2x32xf32>
    %cst_94 = arith.constant 1.000000e+00 : f32
    %326 = vector.broadcast %cst_94 : f32 to vector<2x32xf32>
    %327 = arith.addf %326, %325 : vector<2x32xf32>
    %328 = arith.divf %326, %327 : vector<2x32xf32>
    %329 = arith.mulf %320, %273 : vector<2x32xf32>
    %330 = arith.mulf %314, %322 : vector<2x32xf32>
    %331 = arith.addf %329, %330 : vector<2x32xf32>
    %332 = math.tanh %331 : vector<2x32xf32>
    %333 = arith.mulf %328, %332 : vector<2x32xf32>
    %334 = vector.extract_strided_slice %308 {offsets = [0, 0], sizes = [2, 32], strides = [1, 1]} : vector<2x128xf32> to vector<2x32xf32>
    %335 = arith.negf %334 : vector<2x32xf32>
    %336 = math.exp %335 : vector<2x32xf32>
    %cst_95 = arith.constant 1.000000e+00 : f32
    %337 = vector.broadcast %cst_95 : f32 to vector<2x32xf32>
    %338 = arith.addf %337, %336 : vector<2x32xf32>
    %339 = arith.divf %337, %338 : vector<2x32xf32>
    %340 = vector.extract_strided_slice %308 {offsets = [0, 32], sizes = [2, 32], strides = [1, 1]} : vector<2x128xf32> to vector<2x32xf32>
    %341 = arith.negf %340 : vector<2x32xf32>
    %342 = math.exp %341 : vector<2x32xf32>
    %cst_96 = arith.constant 1.000000e+00 : f32
    %343 = vector.broadcast %cst_96 : f32 to vector<2x32xf32>
    %344 = arith.addf %343, %342 : vector<2x32xf32>
    %345 = arith.divf %343, %344 : vector<2x32xf32>
    %346 = vector.extract_strided_slice %308 {offsets = [0, 64], sizes = [2, 32], strides = [1, 1]} : vector<2x128xf32> to vector<2x32xf32>
    %347 = math.tanh %346 : vector<2x32xf32>
    %348 = vector.extract_strided_slice %308 {offsets = [0, 96], sizes = [2, 32], strides = [1, 1]} : vector<2x128xf32> to vector<2x32xf32>
    %349 = arith.negf %348 : vector<2x32xf32>
    %350 = math.exp %349 : vector<2x32xf32>
    %cst_97 = arith.constant 1.000000e+00 : f32
    %351 = vector.broadcast %cst_97 : f32 to vector<2x32xf32>
    %352 = arith.addf %351, %350 : vector<2x32xf32>
    %353 = arith.divf %351, %352 : vector<2x32xf32>
    %354 = arith.mulf %345, %298 : vector<2x32xf32>
    %355 = arith.mulf %339, %347 : vector<2x32xf32>
    %356 = arith.addf %354, %355 : vector<2x32xf32>
    %357 = math.tanh %356 : vector<2x32xf32>
    %358 = arith.mulf %353, %357 : vector<2x32xf32>
    %c10_98 = arith.constant 10 : index
    %c0_99 = arith.constant 0 : index
    %359 = vector.load %arg15[%c10_98, %c0_99] : memref<16x64xf32, #tpu.memory_space<vmem>>, vector<2x32xf32>
    tpu.vector_store %arg15[%c10_98, %c0_99], %333 {strides = array<i32>} : memref<16x64xf32, #tpu.memory_space<vmem>>, vector<2x32xf32>,
    %c4_100 = arith.constant 4 : index
    %c32_101 = arith.constant 32 : index
    %360 = vector.load %arg15[%c4_100, %c32_101] : memref<16x64xf32, #tpu.memory_space<vmem>>, vector<2x32xf32>
    tpu.vector_store %arg15[%c4_100, %c32_101], %358 {strides = array<i32>} : memref<16x64xf32, #tpu.memory_space<vmem>>, vector<2x32xf32>,
    %c12_102 = arith.constant 12 : index
    %c0_103 = arith.constant 0 : index
    %361 = vector.load %arg14[%c12_102, %c0_103] : memref<16x256xf32, #tpu.memory_space<vmem>>, vector<2x128xf32>
    %cst_104 = arith.constant dense<0.000000e+00> : vector<2x128xf32>
    %362 = tpu.matmul %333, %7, %cst_104 {dimension_numbers = #tpu.dot_dimension_numbers<[1], [0], [0], [1], [0, 0, 1, 1], [], []>} : vector<2x32xf32>, vector<32x128xf32>, vector<2x128xf32> -> vector<2x128xf32>
    %363 = arith.addf %361, %362 : vector<2x128xf32>
    %c2_105 = arith.constant 2 : index
    %c128_106 = arith.constant 128 : index
    %364 = vector.load %arg14[%c2_105, %c128_106] : memref<16x256xf32, #tpu.memory_space<vmem>>, vector<2x128xf32>
    %cst_107 = arith.constant dense<0.000000e+00> : vector<2x128xf32>
    %365 = tpu.matmul %358, %8, %cst_107 {dimension_numbers = #tpu.dot_dimension_numbers<[1], [0], [0], [1], [0, 0, 1, 1], [], []>} : vector<2x32xf32>, vector<32x128xf32>, vector<2x128xf32> -> vector<2x128xf32>
    %366 = arith.addf %364, %365 : vector<2x128xf32>
    %367 = vector.extract_strided_slice %363 {offsets = [0, 0], sizes = [2, 32], strides = [1, 1]} : vector<2x128xf32> to vector<2x32xf32>
    %368 = arith.negf %367 : vector<2x32xf32>
    %369 = math.exp %368 : vector<2x32xf32>
    %cst_108 = arith.constant 1.000000e+00 : f32
    %370 = vector.broadcast %cst_108 : f32 to vector<2x32xf32>
    %371 = arith.addf %370, %369 : vector<2x32xf32>
    %372 = arith.divf %370, %371 : vector<2x32xf32>
    %373 = vector.extract_strided_slice %363 {offsets = [0, 32], sizes = [2, 32], strides = [1, 1]} : vector<2x128xf32> to vector<2x32xf32>
    %374 = arith.negf %373 : vector<2x32xf32>
    %375 = math.exp %374 : vector<2x32xf32>
    %cst_109 = arith.constant 1.000000e+00 : f32
    %376 = vector.broadcast %cst_109 : f32 to vector<2x32xf32>
    %377 = arith.addf %376, %375 : vector<2x32xf32>
    %378 = arith.divf %376, %377 : vector<2x32xf32>
    %379 = vector.extract_strided_slice %363 {offsets = [0, 64], sizes = [2, 32], strides = [1, 1]} : vector<2x128xf32> to vector<2x32xf32>
    %380 = math.tanh %379 : vector<2x32xf32>
    %381 = vector.extract_strided_slice %363 {offsets = [0, 96], sizes = [2, 32], strides = [1, 1]} : vector<2x128xf32> to vector<2x32xf32>
    %382 = arith.negf %381 : vector<2x32xf32>
    %383 = math.exp %382 : vector<2x32xf32>
    %cst_110 = arith.constant 1.000000e+00 : f32
    %384 = vector.broadcast %cst_110 : f32 to vector<2x32xf32>
    %385 = arith.addf %384, %383 : vector<2x32xf32>
    %386 = arith.divf %384, %385 : vector<2x32xf32>
    %387 = arith.mulf %378, %331 : vector<2x32xf32>
    %388 = arith.mulf %372, %380 : vector<2x32xf32>
    %389 = arith.addf %387, %388 : vector<2x32xf32>
    %390 = math.tanh %389 : vector<2x32xf32>
    %391 = arith.mulf %386, %390 : vector<2x32xf32>
    %392 = vector.extract_strided_slice %366 {offsets = [0, 0], sizes = [2, 32], strides = [1, 1]} : vector<2x128xf32> to vector<2x32xf32>
    %393 = arith.negf %392 : vector<2x32xf32>
    %394 = math.exp %393 : vector<2x32xf32>
    %cst_111 = arith.constant 1.000000e+00 : f32
    %395 = vector.broadcast %cst_111 : f32 to vector<2x32xf32>
    %396 = arith.addf %395, %394 : vector<2x32xf32>
    %397 = arith.divf %395, %396 : vector<2x32xf32>
    %398 = vector.extract_strided_slice %366 {offsets = [0, 32], sizes = [2, 32], strides = [1, 1]} : vector<2x128xf32> to vector<2x32xf32>
    %399 = arith.negf %398 : vector<2x32xf32>
    %400 = math.exp %399 : vector<2x32xf32>
    %cst_112 = arith.constant 1.000000e+00 : f32
    %401 = vector.broadcast %cst_112 : f32 to vector<2x32xf32>
    %402 = arith.addf %401, %400 : vector<2x32xf32>
    %403 = arith.divf %401, %402 : vector<2x32xf32>
    %404 = vector.extract_strided_slice %366 {offsets = [0, 64], sizes = [2, 32], strides = [1, 1]} : vector<2x128xf32> to vector<2x32xf32>
    %405 = math.tanh %404 : vector<2x32xf32>
    %406 = vector.extract_strided_slice %366 {offsets = [0, 96], sizes = [2, 32], strides = [1, 1]} : vector<2x128xf32> to vector<2x32xf32>
    %407 = arith.negf %406 : vector<2x32xf32>
    %408 = math.exp %407 : vector<2x32xf32>
    %cst_113 = arith.constant 1.000000e+00 : f32
    %409 = vector.broadcast %cst_113 : f32 to vector<2x32xf32>
    %410 = arith.addf %409, %408 : vector<2x32xf32>
    %411 = arith.divf %409, %410 : vector<2x32xf32>
    %412 = arith.mulf %403, %356 : vector<2x32xf32>
    %413 = arith.mulf %397, %405 : vector<2x32xf32>
    %414 = arith.addf %412, %413 : vector<2x32xf32>
    %415 = math.tanh %414 : vector<2x32xf32>
    %416 = arith.mulf %411, %415 : vector<2x32xf32>
    %c12_114 = arith.constant 12 : index
    %c0_115 = arith.constant 0 : index
    %417 = vector.load %arg15[%c12_114, %c0_115] : memref<16x64xf32, #tpu.memory_space<vmem>>, vector<2x32xf32>
    tpu.vector_store %arg15[%c12_114, %c0_115], %391 {strides = array<i32>} : memref<16x64xf32, #tpu.memory_space<vmem>>, vector<2x32xf32>,
    %c2_116 = arith.constant 2 : index
    %c32_117 = arith.constant 32 : index
    %418 = vector.load %arg15[%c2_116, %c32_117] : memref<16x64xf32, #tpu.memory_space<vmem>>, vector<2x32xf32>
    tpu.vector_store %arg15[%c2_116, %c32_117], %416 {strides = array<i32>} : memref<16x64xf32, #tpu.memory_space<vmem>>, vector<2x32xf32>,
    %c14_118 = arith.constant 14 : index
    %c0_119 = arith.constant 0 : index
    %419 = vector.load %arg14[%c14_118, %c0_119] : memref<16x256xf32, #tpu.memory_space<vmem>>, vector<2x128xf32>
    %cst_120 = arith.constant dense<0.000000e+00> : vector<2x128xf32>
    %420 = tpu.matmul %391, %7, %cst_120 {dimension_numbers = #tpu.dot_dimension_numbers<[1], [0], [0], [1], [0, 0, 1, 1], [], []>} : vector<2x32xf32>, vector<32x128xf32>, vector<2x128xf32> -> vector<2x128xf32>
    %421 = arith.addf %419, %420 : vector<2x128xf32>
    %c0_121 = arith.constant 0 : index
    %c128_122 = arith.constant 128 : index
    %422 = vector.load %arg14[%c0_121, %c128_122] : memref<16x256xf32, #tpu.memory_space<vmem>>, vector<2x128xf32>
    %cst_123 = arith.constant dense<0.000000e+00> : vector<2x128xf32>
    %423 = tpu.matmul %416, %8, %cst_123 {dimension_numbers = #tpu.dot_dimension_numbers<[1], [0], [0], [1], [0, 0, 1, 1], [], []>} : vector<2x32xf32>, vector<32x128xf32>, vector<2x128xf32> -> vector<2x128xf32>
    %424 = arith.addf %422, %423 : vector<2x128xf32>
    %425 = vector.extract_strided_slice %421 {offsets = [0, 0], sizes = [2, 32], strides = [1, 1]} : vector<2x128xf32> to vector<2x32xf32>
    %426 = arith.negf %425 : vector<2x32xf32>
    %427 = math.exp %426 : vector<2x32xf32>
    %cst_124 = arith.constant 1.000000e+00 : f32
    %428 = vector.broadcast %cst_124 : f32 to vector<2x32xf32>
    %429 = arith.addf %428, %427 : vector<2x32xf32>
    %430 = arith.divf %428, %429 : vector<2x32xf32>
    %431 = vector.extract_strided_slice %421 {offsets = [0, 32], sizes = [2, 32], strides = [1, 1]} : vector<2x128xf32> to vector<2x32xf32>
    %432 = arith.negf %431 : vector<2x32xf32>
    %433 = math.exp %432 : vector<2x32xf32>
    %cst_125 = arith.constant 1.000000e+00 : f32
    %434 = vector.broadcast %cst_125 : f32 to vector<2x32xf32>
    %435 = arith.addf %434, %433 : vector<2x32xf32>
    %436 = arith.divf %434, %435 : vector<2x32xf32>
    %437 = vector.extract_strided_slice %421 {offsets = [0, 64], sizes = [2, 32], strides = [1, 1]} : vector<2x128xf32> to vector<2x32xf32>
    %438 = math.tanh %437 : vector<2x32xf32>
    %439 = vector.extract_strided_slice %421 {offsets = [0, 96], sizes = [2, 32], strides = [1, 1]} : vector<2x128xf32> to vector<2x32xf32>
    %440 = arith.negf %439 : vector<2x32xf32>
    %441 = math.exp %440 : vector<2x32xf32>
    %cst_126 = arith.constant 1.000000e+00 : f32
    %442 = vector.broadcast %cst_126 : f32 to vector<2x32xf32>
    %443 = arith.addf %442, %441 : vector<2x32xf32>
    %444 = arith.divf %442, %443 : vector<2x32xf32>
    %445 = arith.mulf %436, %389 : vector<2x32xf32>
    %446 = arith.mulf %430, %438 : vector<2x32xf32>
    %447 = arith.addf %445, %446 : vector<2x32xf32>
    %448 = math.tanh %447 : vector<2x32xf32>
    %449 = arith.mulf %444, %448 : vector<2x32xf32>
    %450 = vector.extract_strided_slice %424 {offsets = [0, 0], sizes = [2, 32], strides = [1, 1]} : vector<2x128xf32> to vector<2x32xf32>
    %451 = arith.negf %450 : vector<2x32xf32>
    %452 = math.exp %451 : vector<2x32xf32>
    %cst_127 = arith.constant 1.000000e+00 : f32
    %453 = vector.broadcast %cst_127 : f32 to vector<2x32xf32>
    %454 = arith.addf %453, %452 : vector<2x32xf32>
    %455 = arith.divf %453, %454 : vector<2x32xf32>
    %456 = vector.extract_strided_slice %424 {offsets = [0, 32], sizes = [2, 32], strides = [1, 1]} : vector<2x128xf32> to vector<2x32xf32>
    %457 = arith.negf %456 : vector<2x32xf32>
    %458 = math.exp %457 : vector<2x32xf32>
    %cst_128 = arith.constant 1.000000e+00 : f32
    %459 = vector.broadcast %cst_128 : f32 to vector<2x32xf32>
    %460 = arith.addf %459, %458 : vector<2x32xf32>
    %461 = arith.divf %459, %460 : vector<2x32xf32>
    %462 = vector.extract_strided_slice %424 {offsets = [0, 64], sizes = [2, 32], strides = [1, 1]} : vector<2x128xf32> to vector<2x32xf32>
    %463 = math.tanh %462 : vector<2x32xf32>
    %464 = vector.extract_strided_slice %424 {offsets = [0, 96], sizes = [2, 32], strides = [1, 1]} : vector<2x128xf32> to vector<2x32xf32>
    %465 = arith.negf %464 : vector<2x32xf32>
    %466 = math.exp %465 : vector<2x32xf32>
    %cst_129 = arith.constant 1.000000e+00 : f32
    %467 = vector.broadcast %cst_129 : f32 to vector<2x32xf32>
    %468 = arith.addf %467, %466 : vector<2x32xf32>
    %469 = arith.divf %467, %468 : vector<2x32xf32>
    %470 = arith.mulf %461, %414 : vector<2x32xf32>
    %471 = arith.mulf %455, %463 : vector<2x32xf32>
    %472 = arith.addf %470, %471 : vector<2x32xf32>
    %473 = math.tanh %472 : vector<2x32xf32>
    %474 = arith.mulf %469, %473 : vector<2x32xf32>
    %c14_130 = arith.constant 14 : index
    %c0_131 = arith.constant 0 : index
    %475 = vector.load %arg15[%c14_130, %c0_131] : memref<16x64xf32, #tpu.memory_space<vmem>>, vector<2x32xf32>
    tpu.vector_store %arg15[%c14_130, %c0_131], %449 {strides = array<i32>} : memref<16x64xf32, #tpu.memory_space<vmem>>, vector<2x32xf32>,
    %c0_132 = arith.constant 0 : index
    %c32_133 = arith.constant 32 : index
    %476 = vector.load %arg15[%c0_132, %c32_133] : memref<16x64xf32, #tpu.memory_space<vmem>>, vector<2x32xf32>
    tpu.vector_store %arg15[%c0_132, %c32_133], %474 {strides = array<i32>} : memref<16x64xf32, #tpu.memory_space<vmem>>, vector<2x32xf32>,
    %c0_134 = arith.constant 0 : index
    %c0_135 = arith.constant 0 : index
    %477 = vector.load %arg15[%c0_134, %c0_135] : memref<16x64xf32, #tpu.memory_space<vmem>>, vector<16x64xf32>
    %c0_136 = arith.constant 0 : index
    %c0_137 = arith.constant 0 : index
    %478 = vector.load %arg5[%c0_136, %c0_137] : memref<64x256xf32, #tpu.memory_space<vmem>>, vector<64x256xf32>
    %cst_138 = arith.constant dense<0.000000e+00> : vector<16x256xf32>
    %479 = tpu.matmul %477, %478, %cst_138 {dimension_numbers = #tpu.dot_dimension_numbers<[1], [0], [0], [1], [0, 0, 1, 1], [], []>} : vector<16x64xf32>, vector<64x256xf32>, vector<16x256xf32> -> vector<16x256xf32>
    %c0_139 = arith.constant 0 : index
    %c0_140 = arith.constant 0 : index
    %480 = vector.load %arg6[%c0_139, %c0_140] : memref<1x256xf32, #tpu.memory_space<vmem>>, vector<1x256xf32>
    %481 = vector.broadcast %480 : vector<1x256xf32> to vector<16x256xf32>
    %482 = arith.addf %479, %481 : vector<16x256xf32>
    %c0_141 = arith.constant 0 : index
    %c0_142 = arith.constant 0 : index
    %483 = vector.load %arg14[%c0_141, %c0_142] : memref<16x256xf32, #tpu.memory_space<vmem>>, vector<16x256xf32>
    tpu.vector_store %arg14[%c0_141, %c0_142], %482 {strides = array<i32>} : memref<16x256xf32, #tpu.memory_space<vmem>>, vector<16x256xf32>,
    %c0_143 = arith.constant 0 : index
    %c0_144 = arith.constant 0 : index
    %484 = vector.load %arg7[%c0_143, %c0_144] : memref<32x128xf32, #tpu.memory_space<vmem>>, vector<32x128xf32>
    %c0_145 = arith.constant 0 : index
    %c0_146 = arith.constant 0 : index
    %485 = vector.load %arg8[%c0_145, %c0_146] : memref<32x128xf32, #tpu.memory_space<vmem>>, vector<32x128xf32>
    %cst_147 = arith.constant 0.000000e+00 : f32
    %486 = vector.broadcast %cst_147 : f32 to vector<2x32xf32>
    %cst_148 = arith.constant 0.000000e+00 : f32
    %487 = vector.broadcast %cst_148 : f32 to vector<2x32xf32>
    %cst_149 = arith.constant 0.000000e+00 : f32
    %488 = vector.broadcast %cst_149 : f32 to vector<2x32xf32>
    %cst_150 = arith.constant 0.000000e+00 : f32
    %489 = vector.broadcast %cst_150 : f32 to vector<2x32xf32>
    %cst_151 = arith.constant 0.000000e+00 : f32
    %490 = vector.broadcast %cst_151 : f32 to vector<2x32xf32>
    %cst_152 = arith.constant 0.000000e+00 : f32
    %491 = vector.broadcast %cst_152 : f32 to vector<2x32xf32>
    %cst_153 = arith.constant 0xFF800000 : f32
    %492 = vector.broadcast %cst_153 : f32 to vector<2x32xf32>
    %cst_154 = arith.constant 0xFF800000 : f32
    %493 = vector.broadcast %cst_154 : f32 to vector<2x32xf32>
    %c0_155 = arith.constant 0 : index
    %c0_156 = arith.constant 0 : index
    %494 = vector.load %arg14[%c0_155, %c0_156] : memref<16x256xf32, #tpu.memory_space<vmem>>, vector<2x128xf32>
    %cst_157 = arith.constant dense<0.000000e+00> : vector<2x128xf32>
    %495 = tpu.matmul %486, %484, %cst_157 {dimension_numbers = #tpu.dot_dimension_numbers<[1], [0], [0], [1], [0, 0, 1, 1], [], []>} : vector<2x32xf32>, vector<32x128xf32>, vector<2x128xf32> -> vector<2x128xf32>
    %496 = arith.addf %494, %495 : vector<2x128xf32>
    %c14_158 = arith.constant 14 : index
    %c128_159 = arith.constant 128 : index
    %497 = vector.load %arg14[%c14_158, %c128_159] : memref<16x256xf32, #tpu.memory_space<vmem>>, vector<2x128xf32>
    %cst_160 = arith.constant dense<0.000000e+00> : vector<2x128xf32>
    %498 = tpu.matmul %488, %485, %cst_160 {dimension_numbers = #tpu.dot_dimension_numbers<[1], [0], [0], [1], [0, 0, 1, 1], [], []>} : vector<2x32xf32>, vector<32x128xf32>, vector<2x128xf32> -> vector<2x128xf32>
    %499 = arith.addf %497, %498 : vector<2x128xf32>
    %500 = vector.extract_strided_slice %496 {offsets = [0, 0], sizes = [2, 32], strides = [1, 1]} : vector<2x128xf32> to vector<2x32xf32>
    %501 = arith.negf %500 : vector<2x32xf32>
    %502 = math.exp %501 : vector<2x32xf32>
    %cst_161 = arith.constant 1.000000e+00 : f32
    %503 = vector.broadcast %cst_161 : f32 to vector<2x32xf32>
    %504 = arith.addf %503, %502 : vector<2x32xf32>
    %505 = arith.divf %503, %504 : vector<2x32xf32>
    %506 = vector.extract_strided_slice %496 {offsets = [0, 32], sizes = [2, 32], strides = [1, 1]} : vector<2x128xf32> to vector<2x32xf32>
    %507 = arith.negf %506 : vector<2x32xf32>
    %508 = math.exp %507 : vector<2x32xf32>
    %cst_162 = arith.constant 1.000000e+00 : f32
    %509 = vector.broadcast %cst_162 : f32 to vector<2x32xf32>
    %510 = arith.addf %509, %508 : vector<2x32xf32>
    %511 = arith.divf %509, %510 : vector<2x32xf32>
    %512 = vector.extract_strided_slice %496 {offsets = [0, 64], sizes = [2, 32], strides = [1, 1]} : vector<2x128xf32> to vector<2x32xf32>
    %513 = math.tanh %512 : vector<2x32xf32>
    %514 = vector.extract_strided_slice %496 {offsets = [0, 96], sizes = [2, 32], strides = [1, 1]} : vector<2x128xf32> to vector<2x32xf32>
    %515 = arith.negf %514 : vector<2x32xf32>
    %516 = math.exp %515 : vector<2x32xf32>
    %cst_163 = arith.constant 1.000000e+00 : f32
    %517 = vector.broadcast %cst_163 : f32 to vector<2x32xf32>
    %518 = arith.addf %517, %516 : vector<2x32xf32>
    %519 = arith.divf %517, %518 : vector<2x32xf32>
    %520 = arith.mulf %511, %487 : vector<2x32xf32>
    %521 = arith.mulf %505, %513 : vector<2x32xf32>
    %522 = arith.addf %520, %521 : vector<2x32xf32>
    %523 = math.tanh %522 : vector<2x32xf32>
    %524 = arith.mulf %519, %523 : vector<2x32xf32>
    %525 = vector.extract_strided_slice %499 {offsets = [0, 0], sizes = [2, 32], strides = [1, 1]} : vector<2x128xf32> to vector<2x32xf32>
    %526 = arith.negf %525 : vector<2x32xf32>
    %527 = math.exp %526 : vector<2x32xf32>
    %cst_164 = arith.constant 1.000000e+00 : f32
    %528 = vector.broadcast %cst_164 : f32 to vector<2x32xf32>
    %529 = arith.addf %528, %527 : vector<2x32xf32>
    %530 = arith.divf %528, %529 : vector<2x32xf32>
    %531 = vector.extract_strided_slice %499 {offsets = [0, 32], sizes = [2, 32], strides = [1, 1]} : vector<2x128xf32> to vector<2x32xf32>
    %532 = arith.negf %531 : vector<2x32xf32>
    %533 = math.exp %532 : vector<2x32xf32>
    %cst_165 = arith.constant 1.000000e+00 : f32
    %534 = vector.broadcast %cst_165 : f32 to vector<2x32xf32>
    %535 = arith.addf %534, %533 : vector<2x32xf32>
    %536 = arith.divf %534, %535 : vector<2x32xf32>
    %537 = vector.extract_strided_slice %499 {offsets = [0, 64], sizes = [2, 32], strides = [1, 1]} : vector<2x128xf32> to vector<2x32xf32>
    %538 = math.tanh %537 : vector<2x32xf32>
    %539 = vector.extract_strided_slice %499 {offsets = [0, 96], sizes = [2, 32], strides = [1, 1]} : vector<2x128xf32> to vector<2x32xf32>
    %540 = arith.negf %539 : vector<2x32xf32>
    %541 = math.exp %540 : vector<2x32xf32>
    %cst_166 = arith.constant 1.000000e+00 : f32
    %542 = vector.broadcast %cst_166 : f32 to vector<2x32xf32>
    %543 = arith.addf %542, %541 : vector<2x32xf32>
    %544 = arith.divf %542, %543 : vector<2x32xf32>
    %545 = arith.mulf %536, %489 : vector<2x32xf32>
    %546 = arith.mulf %530, %538 : vector<2x32xf32>
    %547 = arith.addf %545, %546 : vector<2x32xf32>
    %548 = math.tanh %547 : vector<2x32xf32>
    %549 = arith.mulf %544, %548 : vector<2x32xf32>
    %550 = arith.addf %490, %524 : vector<2x32xf32>
    %551 = arith.addf %491, %549 : vector<2x32xf32>
    %552 = arith.maximumf %492, %524 : vector<2x32xf32>
    %553 = arith.maximumf %493, %549 : vector<2x32xf32>
    %c2_167 = arith.constant 2 : index
    %c0_168 = arith.constant 0 : index
    %554 = vector.load %arg14[%c2_167, %c0_168] : memref<16x256xf32, #tpu.memory_space<vmem>>, vector<2x128xf32>
    %cst_169 = arith.constant dense<0.000000e+00> : vector<2x128xf32>
    %555 = tpu.matmul %524, %484, %cst_169 {dimension_numbers = #tpu.dot_dimension_numbers<[1], [0], [0], [1], [0, 0, 1, 1], [], []>} : vector<2x32xf32>, vector<32x128xf32>, vector<2x128xf32> -> vector<2x128xf32>
    %556 = arith.addf %554, %555 : vector<2x128xf32>
    %c12_170 = arith.constant 12 : index
    %c128_171 = arith.constant 128 : index
    %557 = vector.load %arg14[%c12_170, %c128_171] : memref<16x256xf32, #tpu.memory_space<vmem>>, vector<2x128xf32>
    %cst_172 = arith.constant dense<0.000000e+00> : vector<2x128xf32>
    %558 = tpu.matmul %549, %485, %cst_172 {dimension_numbers = #tpu.dot_dimension_numbers<[1], [0], [0], [1], [0, 0, 1, 1], [], []>} : vector<2x32xf32>, vector<32x128xf32>, vector<2x128xf32> -> vector<2x128xf32>
    %559 = arith.addf %557, %558 : vector<2x128xf32>
    %560 = vector.extract_strided_slice %556 {offsets = [0, 0], sizes = [2, 32], strides = [1, 1]} : vector<2x128xf32> to vector<2x32xf32>
    %561 = arith.negf %560 : vector<2x32xf32>
    %562 = math.exp %561 : vector<2x32xf32>
    %cst_173 = arith.constant 1.000000e+00 : f32
    %563 = vector.broadcast %cst_173 : f32 to vector<2x32xf32>
    %564 = arith.addf %563, %562 : vector<2x32xf32>
    %565 = arith.divf %563, %564 : vector<2x32xf32>
    %566 = vector.extract_strided_slice %556 {offsets = [0, 32], sizes = [2, 32], strides = [1, 1]} : vector<2x128xf32> to vector<2x32xf32>
    %567 = arith.negf %566 : vector<2x32xf32>
    %568 = math.exp %567 : vector<2x32xf32>
    %cst_174 = arith.constant 1.000000e+00 : f32
    %569 = vector.broadcast %cst_174 : f32 to vector<2x32xf32>
    %570 = arith.addf %569, %568 : vector<2x32xf32>
    %571 = arith.divf %569, %570 : vector<2x32xf32>
    %572 = vector.extract_strided_slice %556 {offsets = [0, 64], sizes = [2, 32], strides = [1, 1]} : vector<2x128xf32> to vector<2x32xf32>
    %573 = math.tanh %572 : vector<2x32xf32>
    %574 = vector.extract_strided_slice %556 {offsets = [0, 96], sizes = [2, 32], strides = [1, 1]} : vector<2x128xf32> to vector<2x32xf32>
    %575 = arith.negf %574 : vector<2x32xf32>
    %576 = math.exp %575 : vector<2x32xf32>
    %cst_175 = arith.constant 1.000000e+00 : f32
    %577 = vector.broadcast %cst_175 : f32 to vector<2x32xf32>
    %578 = arith.addf %577, %576 : vector<2x32xf32>
    %579 = arith.divf %577, %578 : vector<2x32xf32>
    %580 = arith.mulf %571, %522 : vector<2x32xf32>
    %581 = arith.mulf %565, %573 : vector<2x32xf32>
    %582 = arith.addf %580, %581 : vector<2x32xf32>
    %583 = math.tanh %582 : vector<2x32xf32>
    %584 = arith.mulf %579, %583 : vector<2x32xf32>
    %585 = vector.extract_strided_slice %559 {offsets = [0, 0], sizes = [2, 32], strides = [1, 1]} : vector<2x128xf32> to vector<2x32xf32>
    %586 = arith.negf %585 : vector<2x32xf32>
    %587 = math.exp %586 : vector<2x32xf32>
    %cst_176 = arith.constant 1.000000e+00 : f32
    %588 = vector.broadcast %cst_176 : f32 to vector<2x32xf32>
    %589 = arith.addf %588, %587 : vector<2x32xf32>
    %590 = arith.divf %588, %589 : vector<2x32xf32>
    %591 = vector.extract_strided_slice %559 {offsets = [0, 32], sizes = [2, 32], strides = [1, 1]} : vector<2x128xf32> to vector<2x32xf32>
    %592 = arith.negf %591 : vector<2x32xf32>
    %593 = math.exp %592 : vector<2x32xf32>
    %cst_177 = arith.constant 1.000000e+00 : f32
    %594 = vector.broadcast %cst_177 : f32 to vector<2x32xf32>
    %595 = arith.addf %594, %593 : vector<2x32xf32>
    %596 = arith.divf %594, %595 : vector<2x32xf32>
    %597 = vector.extract_strided_slice %559 {offsets = [0, 64], sizes = [2, 32], strides = [1, 1]} : vector<2x128xf32> to vector<2x32xf32>
    %598 = math.tanh %597 : vector<2x32xf32>
    %599 = vector.extract_strided_slice %559 {offsets = [0, 96], sizes = [2, 32], strides = [1, 1]} : vector<2x128xf32> to vector<2x32xf32>
    %600 = arith.negf %599 : vector<2x32xf32>
    %601 = math.exp %600 : vector<2x32xf32>
    %cst_178 = arith.constant 1.000000e+00 : f32
    %602 = vector.broadcast %cst_178 : f32 to vector<2x32xf32>
    %603 = arith.addf %602, %601 : vector<2x32xf32>
    %604 = arith.divf %602, %603 : vector<2x32xf32>
    %605 = arith.mulf %596, %547 : vector<2x32xf32>
    %606 = arith.mulf %590, %598 : vector<2x32xf32>
    %607 = arith.addf %605, %606 : vector<2x32xf32>
    %608 = math.tanh %607 : vector<2x32xf32>
    %609 = arith.mulf %604, %608 : vector<2x32xf32>
    %610 = arith.addf %550, %584 : vector<2x32xf32>
    %611 = arith.addf %551, %609 : vector<2x32xf32>
    %612 = arith.maximumf %552, %584 : vector<2x32xf32>
    %613 = arith.maximumf %553, %609 : vector<2x32xf32>
    %c4_179 = arith.constant 4 : index
    %c0_180 = arith.constant 0 : index
    %614 = vector.load %arg14[%c4_179, %c0_180] : memref<16x256xf32, #tpu.memory_space<vmem>>, vector<2x128xf32>
    %cst_181 = arith.constant dense<0.000000e+00> : vector<2x128xf32>
    %615 = tpu.matmul %584, %484, %cst_181 {dimension_numbers = #tpu.dot_dimension_numbers<[1], [0], [0], [1], [0, 0, 1, 1], [], []>} : vector<2x32xf32>, vector<32x128xf32>, vector<2x128xf32> -> vector<2x128xf32>
    %616 = arith.addf %614, %615 : vector<2x128xf32>
    %c10_182 = arith.constant 10 : index
    %c128_183 = arith.constant 128 : index
    %617 = vector.load %arg14[%c10_182, %c128_183] : memref<16x256xf32, #tpu.memory_space<vmem>>, vector<2x128xf32>
    %cst_184 = arith.constant dense<0.000000e+00> : vector<2x128xf32>
    %618 = tpu.matmul %609, %485, %cst_184 {dimension_numbers = #tpu.dot_dimension_numbers<[1], [0], [0], [1], [0, 0, 1, 1], [], []>} : vector<2x32xf32>, vector<32x128xf32>, vector<2x128xf32> -> vector<2x128xf32>
    %619 = arith.addf %617, %618 : vector<2x128xf32>
    %620 = vector.extract_strided_slice %616 {offsets = [0, 0], sizes = [2, 32], strides = [1, 1]} : vector<2x128xf32> to vector<2x32xf32>
    %621 = arith.negf %620 : vector<2x32xf32>
    %622 = math.exp %621 : vector<2x32xf32>
    %cst_185 = arith.constant 1.000000e+00 : f32
    %623 = vector.broadcast %cst_185 : f32 to vector<2x32xf32>
    %624 = arith.addf %623, %622 : vector<2x32xf32>
    %625 = arith.divf %623, %624 : vector<2x32xf32>
    %626 = vector.extract_strided_slice %616 {offsets = [0, 32], sizes = [2, 32], strides = [1, 1]} : vector<2x128xf32> to vector<2x32xf32>
    %627 = arith.negf %626 : vector<2x32xf32>
    %628 = math.exp %627 : vector<2x32xf32>
    %cst_186 = arith.constant 1.000000e+00 : f32
    %629 = vector.broadcast %cst_186 : f32 to vector<2x32xf32>
    %630 = arith.addf %629, %628 : vector<2x32xf32>
    %631 = arith.divf %629, %630 : vector<2x32xf32>
    %632 = vector.extract_strided_slice %616 {offsets = [0, 64], sizes = [2, 32], strides = [1, 1]} : vector<2x128xf32> to vector<2x32xf32>
    %633 = math.tanh %632 : vector<2x32xf32>
    %634 = vector.extract_strided_slice %616 {offsets = [0, 96], sizes = [2, 32], strides = [1, 1]} : vector<2x128xf32> to vector<2x32xf32>
    %635 = arith.negf %634 : vector<2x32xf32>
    %636 = math.exp %635 : vector<2x32xf32>
    %cst_187 = arith.constant 1.000000e+00 : f32
    %637 = vector.broadcast %cst_187 : f32 to vector<2x32xf32>
    %638 = arith.addf %637, %636 : vector<2x32xf32>
    %639 = arith.divf %637, %638 : vector<2x32xf32>
    %640 = arith.mulf %631, %582 : vector<2x32xf32>
    %641 = arith.mulf %625, %633 : vector<2x32xf32>
    %642 = arith.addf %640, %641 : vector<2x32xf32>
    %643 = math.tanh %642 : vector<2x32xf32>
    %644 = arith.mulf %639, %643 : vector<2x32xf32>
    %645 = vector.extract_strided_slice %619 {offsets = [0, 0], sizes = [2, 32], strides = [1, 1]} : vector<2x128xf32> to vector<2x32xf32>
    %646 = arith.negf %645 : vector<2x32xf32>
    %647 = math.exp %646 : vector<2x32xf32>
    %cst_188 = arith.constant 1.000000e+00 : f32
    %648 = vector.broadcast %cst_188 : f32 to vector<2x32xf32>
    %649 = arith.addf %648, %647 : vector<2x32xf32>
    %650 = arith.divf %648, %649 : vector<2x32xf32>
    %651 = vector.extract_strided_slice %619 {offsets = [0, 32], sizes = [2, 32], strides = [1, 1]} : vector<2x128xf32> to vector<2x32xf32>
    %652 = arith.negf %651 : vector<2x32xf32>
    %653 = math.exp %652 : vector<2x32xf32>
    %cst_189 = arith.constant 1.000000e+00 : f32
    %654 = vector.broadcast %cst_189 : f32 to vector<2x32xf32>
    %655 = arith.addf %654, %653 : vector<2x32xf32>
    %656 = arith.divf %654, %655 : vector<2x32xf32>
    %657 = vector.extract_strided_slice %619 {offsets = [0, 64], sizes = [2, 32], strides = [1, 1]} : vector<2x128xf32> to vector<2x32xf32>
    %658 = math.tanh %657 : vector<2x32xf32>
    %659 = vector.extract_strided_slice %619 {offsets = [0, 96], sizes = [2, 32], strides = [1, 1]} : vector<2x128xf32> to vector<2x32xf32>
    %660 = arith.negf %659 : vector<2x32xf32>
    %661 = math.exp %660 : vector<2x32xf32>
    %cst_190 = arith.constant 1.000000e+00 : f32
    %662 = vector.broadcast %cst_190 : f32 to vector<2x32xf32>
    %663 = arith.addf %662, %661 : vector<2x32xf32>
    %664 = arith.divf %662, %663 : vector<2x32xf32>
    %665 = arith.mulf %656, %607 : vector<2x32xf32>
    %666 = arith.mulf %650, %658 : vector<2x32xf32>
    %667 = arith.addf %665, %666 : vector<2x32xf32>
    %668 = math.tanh %667 : vector<2x32xf32>
    %669 = arith.mulf %664, %668 : vector<2x32xf32>
    %670 = arith.addf %610, %644 : vector<2x32xf32>
    %671 = arith.addf %611, %669 : vector<2x32xf32>
    %672 = arith.maximumf %612, %644 : vector<2x32xf32>
    %673 = arith.maximumf %613, %669 : vector<2x32xf32>
    %c6_191 = arith.constant 6 : index
    %c0_192 = arith.constant 0 : index
    %674 = vector.load %arg14[%c6_191, %c0_192] : memref<16x256xf32, #tpu.memory_space<vmem>>, vector<2x128xf32>
    %cst_193 = arith.constant dense<0.000000e+00> : vector<2x128xf32>
    %675 = tpu.matmul %644, %484, %cst_193 {dimension_numbers = #tpu.dot_dimension_numbers<[1], [0], [0], [1], [0, 0, 1, 1], [], []>} : vector<2x32xf32>, vector<32x128xf32>, vector<2x128xf32> -> vector<2x128xf32>
    %676 = arith.addf %674, %675 : vector<2x128xf32>
    %c8_194 = arith.constant 8 : index
    %c128_195 = arith.constant 128 : index
    %677 = vector.load %arg14[%c8_194, %c128_195] : memref<16x256xf32, #tpu.memory_space<vmem>>, vector<2x128xf32>
    %cst_196 = arith.constant dense<0.000000e+00> : vector<2x128xf32>
    %678 = tpu.matmul %669, %485, %cst_196 {dimension_numbers = #tpu.dot_dimension_numbers<[1], [0], [0], [1], [0, 0, 1, 1], [], []>} : vector<2x32xf32>, vector<32x128xf32>, vector<2x128xf32> -> vector<2x128xf32>
    %679 = arith.addf %677, %678 : vector<2x128xf32>
    %680 = vector.extract_strided_slice %676 {offsets = [0, 0], sizes = [2, 32], strides = [1, 1]} : vector<2x128xf32> to vector<2x32xf32>
    %681 = arith.negf %680 : vector<2x32xf32>
    %682 = math.exp %681 : vector<2x32xf32>
    %cst_197 = arith.constant 1.000000e+00 : f32
    %683 = vector.broadcast %cst_197 : f32 to vector<2x32xf32>
    %684 = arith.addf %683, %682 : vector<2x32xf32>
    %685 = arith.divf %683, %684 : vector<2x32xf32>
    %686 = vector.extract_strided_slice %676 {offsets = [0, 32], sizes = [2, 32], strides = [1, 1]} : vector<2x128xf32> to vector<2x32xf32>
    %687 = arith.negf %686 : vector<2x32xf32>
    %688 = math.exp %687 : vector<2x32xf32>
    %cst_198 = arith.constant 1.000000e+00 : f32
    %689 = vector.broadcast %cst_198 : f32 to vector<2x32xf32>
    %690 = arith.addf %689, %688 : vector<2x32xf32>
    %691 = arith.divf %689, %690 : vector<2x32xf32>
    %692 = vector.extract_strided_slice %676 {offsets = [0, 64], sizes = [2, 32], strides = [1, 1]} : vector<2x128xf32> to vector<2x32xf32>
    %693 = math.tanh %692 : vector<2x32xf32>
    %694 = vector.extract_strided_slice %676 {offsets = [0, 96], sizes = [2, 32], strides = [1, 1]} : vector<2x128xf32> to vector<2x32xf32>
    %695 = arith.negf %694 : vector<2x32xf32>
    %696 = math.exp %695 : vector<2x32xf32>
    %cst_199 = arith.constant 1.000000e+00 : f32
    %697 = vector.broadcast %cst_199 : f32 to vector<2x32xf32>
    %698 = arith.addf %697, %696 : vector<2x32xf32>
    %699 = arith.divf %697, %698 : vector<2x32xf32>
    %700 = arith.mulf %691, %642 : vector<2x32xf32>
    %701 = arith.mulf %685, %693 : vector<2x32xf32>
    %702 = arith.addf %700, %701 : vector<2x32xf32>
    %703 = math.tanh %702 : vector<2x32xf32>
    %704 = arith.mulf %699, %703 : vector<2x32xf32>
    %705 = vector.extract_strided_slice %679 {offsets = [0, 0], sizes = [2, 32], strides = [1, 1]} : vector<2x128xf32> to vector<2x32xf32>
    %706 = arith.negf %705 : vector<2x32xf32>
    %707 = math.exp %706 : vector<2x32xf32>
    %cst_200 = arith.constant 1.000000e+00 : f32
    %708 = vector.broadcast %cst_200 : f32 to vector<2x32xf32>
    %709 = arith.addf %708, %707 : vector<2x32xf32>
    %710 = arith.divf %708, %709 : vector<2x32xf32>
    %711 = vector.extract_strided_slice %679 {offsets = [0, 32], sizes = [2, 32], strides = [1, 1]} : vector<2x128xf32> to vector<2x32xf32>
    %712 = arith.negf %711 : vector<2x32xf32>
    %713 = math.exp %712 : vector<2x32xf32>
    %cst_201 = arith.constant 1.000000e+00 : f32
    %714 = vector.broadcast %cst_201 : f32 to vector<2x32xf32>
    %715 = arith.addf %714, %713 : vector<2x32xf32>
    %716 = arith.divf %714, %715 : vector<2x32xf32>
    %717 = vector.extract_strided_slice %679 {offsets = [0, 64], sizes = [2, 32], strides = [1, 1]} : vector<2x128xf32> to vector<2x32xf32>
    %718 = math.tanh %717 : vector<2x32xf32>
    %719 = vector.extract_strided_slice %679 {offsets = [0, 96], sizes = [2, 32], strides = [1, 1]} : vector<2x128xf32> to vector<2x32xf32>
    %720 = arith.negf %719 : vector<2x32xf32>
    %721 = math.exp %720 : vector<2x32xf32>
    %cst_202 = arith.constant 1.000000e+00 : f32
    %722 = vector.broadcast %cst_202 : f32 to vector<2x32xf32>
    %723 = arith.addf %722, %721 : vector<2x32xf32>
    %724 = arith.divf %722, %723 : vector<2x32xf32>
    %725 = arith.mulf %716, %667 : vector<2x32xf32>
    %726 = arith.mulf %710, %718 : vector<2x32xf32>
    %727 = arith.addf %725, %726 : vector<2x32xf32>
    %728 = math.tanh %727 : vector<2x32xf32>
    %729 = arith.mulf %724, %728 : vector<2x32xf32>
    %730 = arith.addf %670, %704 : vector<2x32xf32>
    %731 = arith.addf %671, %729 : vector<2x32xf32>
    %732 = arith.maximumf %672, %704 : vector<2x32xf32>
    %733 = arith.maximumf %673, %729 : vector<2x32xf32>
    %c8_203 = arith.constant 8 : index
    %c0_204 = arith.constant 0 : index
    %734 = vector.load %arg14[%c8_203, %c0_204] : memref<16x256xf32, #tpu.memory_space<vmem>>, vector<2x128xf32>
    %cst_205 = arith.constant dense<0.000000e+00> : vector<2x128xf32>
    %735 = tpu.matmul %704, %484, %cst_205 {dimension_numbers = #tpu.dot_dimension_numbers<[1], [0], [0], [1], [0, 0, 1, 1], [], []>} : vector<2x32xf32>, vector<32x128xf32>, vector<2x128xf32> -> vector<2x128xf32>
    %736 = arith.addf %734, %735 : vector<2x128xf32>
    %c6_206 = arith.constant 6 : index
    %c128_207 = arith.constant 128 : index
    %737 = vector.load %arg14[%c6_206, %c128_207] : memref<16x256xf32, #tpu.memory_space<vmem>>, vector<2x128xf32>
    %cst_208 = arith.constant dense<0.000000e+00> : vector<2x128xf32>
    %738 = tpu.matmul %729, %485, %cst_208 {dimension_numbers = #tpu.dot_dimension_numbers<[1], [0], [0], [1], [0, 0, 1, 1], [], []>} : vector<2x32xf32>, vector<32x128xf32>, vector<2x128xf32> -> vector<2x128xf32>
    %739 = arith.addf %737, %738 : vector<2x128xf32>
    %740 = vector.extract_strided_slice %736 {offsets = [0, 0], sizes = [2, 32], strides = [1, 1]} : vector<2x128xf32> to vector<2x32xf32>
    %741 = arith.negf %740 : vector<2x32xf32>
    %742 = math.exp %741 : vector<2x32xf32>
    %cst_209 = arith.constant 1.000000e+00 : f32
    %743 = vector.broadcast %cst_209 : f32 to vector<2x32xf32>
    %744 = arith.addf %743, %742 : vector<2x32xf32>
    %745 = arith.divf %743, %744 : vector<2x32xf32>
    %746 = vector.extract_strided_slice %736 {offsets = [0, 32], sizes = [2, 32], strides = [1, 1]} : vector<2x128xf32> to vector<2x32xf32>
    %747 = arith.negf %746 : vector<2x32xf32>
    %748 = math.exp %747 : vector<2x32xf32>
    %cst_210 = arith.constant 1.000000e+00 : f32
    %749 = vector.broadcast %cst_210 : f32 to vector<2x32xf32>
    %750 = arith.addf %749, %748 : vector<2x32xf32>
    %751 = arith.divf %749, %750 : vector<2x32xf32>
    %752 = vector.extract_strided_slice %736 {offsets = [0, 64], sizes = [2, 32], strides = [1, 1]} : vector<2x128xf32> to vector<2x32xf32>
    %753 = math.tanh %752 : vector<2x32xf32>
    %754 = vector.extract_strided_slice %736 {offsets = [0, 96], sizes = [2, 32], strides = [1, 1]} : vector<2x128xf32> to vector<2x32xf32>
    %755 = arith.negf %754 : vector<2x32xf32>
    %756 = math.exp %755 : vector<2x32xf32>
    %cst_211 = arith.constant 1.000000e+00 : f32
    %757 = vector.broadcast %cst_211 : f32 to vector<2x32xf32>
    %758 = arith.addf %757, %756 : vector<2x32xf32>
    %759 = arith.divf %757, %758 : vector<2x32xf32>
    %760 = arith.mulf %751, %702 : vector<2x32xf32>
    %761 = arith.mulf %745, %753 : vector<2x32xf32>
    %762 = arith.addf %760, %761 : vector<2x32xf32>
    %763 = math.tanh %762 : vector<2x32xf32>
    %764 = arith.mulf %759, %763 : vector<2x32xf32>
    %765 = vector.extract_strided_slice %739 {offsets = [0, 0], sizes = [2, 32], strides = [1, 1]} : vector<2x128xf32> to vector<2x32xf32>
    %766 = arith.negf %765 : vector<2x32xf32>
    %767 = math.exp %766 : vector<2x32xf32>
    %cst_212 = arith.constant 1.000000e+00 : f32
    %768 = vector.broadcast %cst_212 : f32 to vector<2x32xf32>
    %769 = arith.addf %768, %767 : vector<2x32xf32>
    %770 = arith.divf %768, %769 : vector<2x32xf32>
    %771 = vector.extract_strided_slice %739 {offsets = [0, 32], sizes = [2, 32], strides = [1, 1]} : vector<2x128xf32> to vector<2x32xf32>
    %772 = arith.negf %771 : vector<2x32xf32>
    %773 = math.exp %772 : vector<2x32xf32>
    %cst_213 = arith.constant 1.000000e+00 : f32
    %774 = vector.broadcast %cst_213 : f32 to vector<2x32xf32>
    %775 = arith.addf %774, %773 : vector<2x32xf32>
    %776 = arith.divf %774, %775 : vector<2x32xf32>
    %777 = vector.extract_strided_slice %739 {offsets = [0, 64], sizes = [2, 32], strides = [1, 1]} : vector<2x128xf32> to vector<2x32xf32>
    %778 = math.tanh %777 : vector<2x32xf32>
    %779 = vector.extract_strided_slice %739 {offsets = [0, 96], sizes = [2, 32], strides = [1, 1]} : vector<2x128xf32> to vector<2x32xf32>
    %780 = arith.negf %779 : vector<2x32xf32>
    %781 = math.exp %780 : vector<2x32xf32>
    %cst_214 = arith.constant 1.000000e+00 : f32
    %782 = vector.broadcast %cst_214 : f32 to vector<2x32xf32>
    %783 = arith.addf %782, %781 : vector<2x32xf32>
    %784 = arith.divf %782, %783 : vector<2x32xf32>
    %785 = arith.mulf %776, %727 : vector<2x32xf32>
    %786 = arith.mulf %770, %778 : vector<2x32xf32>
    %787 = arith.addf %785, %786 : vector<2x32xf32>
    %788 = math.tanh %787 : vector<2x32xf32>
    %789 = arith.mulf %784, %788 : vector<2x32xf32>
    %790 = arith.addf %730, %764 : vector<2x32xf32>
    %791 = arith.addf %731, %789 : vector<2x32xf32>
    %792 = arith.maximumf %732, %764 : vector<2x32xf32>
    %793 = arith.maximumf %733, %789 : vector<2x32xf32>
    %c10_215 = arith.constant 10 : index
    %c0_216 = arith.constant 0 : index
    %794 = vector.load %arg14[%c10_215, %c0_216] : memref<16x256xf32, #tpu.memory_space<vmem>>, vector<2x128xf32>
    %cst_217 = arith.constant dense<0.000000e+00> : vector<2x128xf32>
    %795 = tpu.matmul %764, %484, %cst_217 {dimension_numbers = #tpu.dot_dimension_numbers<[1], [0], [0], [1], [0, 0, 1, 1], [], []>} : vector<2x32xf32>, vector<32x128xf32>, vector<2x128xf32> -> vector<2x128xf32>
    %796 = arith.addf %794, %795 : vector<2x128xf32>
    %c4_218 = arith.constant 4 : index
    %c128_219 = arith.constant 128 : index
    %797 = vector.load %arg14[%c4_218, %c128_219] : memref<16x256xf32, #tpu.memory_space<vmem>>, vector<2x128xf32>
    %cst_220 = arith.constant dense<0.000000e+00> : vector<2x128xf32>
    %798 = tpu.matmul %789, %485, %cst_220 {dimension_numbers = #tpu.dot_dimension_numbers<[1], [0], [0], [1], [0, 0, 1, 1], [], []>} : vector<2x32xf32>, vector<32x128xf32>, vector<2x128xf32> -> vector<2x128xf32>
    %799 = arith.addf %797, %798 : vector<2x128xf32>
    %800 = vector.extract_strided_slice %796 {offsets = [0, 0], sizes = [2, 32], strides = [1, 1]} : vector<2x128xf32> to vector<2x32xf32>
    %801 = arith.negf %800 : vector<2x32xf32>
    %802 = math.exp %801 : vector<2x32xf32>
    %cst_221 = arith.constant 1.000000e+00 : f32
    %803 = vector.broadcast %cst_221 : f32 to vector<2x32xf32>
    %804 = arith.addf %803, %802 : vector<2x32xf32>
    %805 = arith.divf %803, %804 : vector<2x32xf32>
    %806 = vector.extract_strided_slice %796 {offsets = [0, 32], sizes = [2, 32], strides = [1, 1]} : vector<2x128xf32> to vector<2x32xf32>
    %807 = arith.negf %806 : vector<2x32xf32>
    %808 = math.exp %807 : vector<2x32xf32>
    %cst_222 = arith.constant 1.000000e+00 : f32
    %809 = vector.broadcast %cst_222 : f32 to vector<2x32xf32>
    %810 = arith.addf %809, %808 : vector<2x32xf32>
    %811 = arith.divf %809, %810 : vector<2x32xf32>
    %812 = vector.extract_strided_slice %796 {offsets = [0, 64], sizes = [2, 32], strides = [1, 1]} : vector<2x128xf32> to vector<2x32xf32>
    %813 = math.tanh %812 : vector<2x32xf32>
    %814 = vector.extract_strided_slice %796 {offsets = [0, 96], sizes = [2, 32], strides = [1, 1]} : vector<2x128xf32> to vector<2x32xf32>
    %815 = arith.negf %814 : vector<2x32xf32>
    %816 = math.exp %815 : vector<2x32xf32>
    %cst_223 = arith.constant 1.000000e+00 : f32
    %817 = vector.broadcast %cst_223 : f32 to vector<2x32xf32>
    %818 = arith.addf %817, %816 : vector<2x32xf32>
    %819 = arith.divf %817, %818 : vector<2x32xf32>
    %820 = arith.mulf %811, %762 : vector<2x32xf32>
    %821 = arith.mulf %805, %813 : vector<2x32xf32>
    %822 = arith.addf %820, %821 : vector<2x32xf32>
    %823 = math.tanh %822 : vector<2x32xf32>
    %824 = arith.mulf %819, %823 : vector<2x32xf32>
    %825 = vector.extract_strided_slice %799 {offsets = [0, 0], sizes = [2, 32], strides = [1, 1]} : vector<2x128xf32> to vector<2x32xf32>
    %826 = arith.negf %825 : vector<2x32xf32>
    %827 = math.exp %826 : vector<2x32xf32>
    %cst_224 = arith.constant 1.000000e+00 : f32
    %828 = vector.broadcast %cst_224 : f32 to vector<2x32xf32>
    %829 = arith.addf %828, %827 : vector<2x32xf32>
    %830 = arith.divf %828, %829 : vector<2x32xf32>
    %831 = vector.extract_strided_slice %799 {offsets = [0, 32], sizes = [2, 32], strides = [1, 1]} : vector<2x128xf32> to vector<2x32xf32>
    %832 = arith.negf %831 : vector<2x32xf32>
    %833 = math.exp %832 : vector<2x32xf32>
    %cst_225 = arith.constant 1.000000e+00 : f32
    %834 = vector.broadcast %cst_225 : f32 to vector<2x32xf32>
    %835 = arith.addf %834, %833 : vector<2x32xf32>
    %836 = arith.divf %834, %835 : vector<2x32xf32>
    %837 = vector.extract_strided_slice %799 {offsets = [0, 64], sizes = [2, 32], strides = [1, 1]} : vector<2x128xf32> to vector<2x32xf32>
    %838 = math.tanh %837 : vector<2x32xf32>
    %839 = vector.extract_strided_slice %799 {offsets = [0, 96], sizes = [2, 32], strides = [1, 1]} : vector<2x128xf32> to vector<2x32xf32>
    %840 = arith.negf %839 : vector<2x32xf32>
    %841 = math.exp %840 : vector<2x32xf32>
    %cst_226 = arith.constant 1.000000e+00 : f32
    %842 = vector.broadcast %cst_226 : f32 to vector<2x32xf32>
    %843 = arith.addf %842, %841 : vector<2x32xf32>
    %844 = arith.divf %842, %843 : vector<2x32xf32>
    %845 = arith.mulf %836, %787 : vector<2x32xf32>
    %846 = arith.mulf %830, %838 : vector<2x32xf32>
    %847 = arith.addf %845, %846 : vector<2x32xf32>
    %848 = math.tanh %847 : vector<2x32xf32>
    %849 = arith.mulf %844, %848 : vector<2x32xf32>
    %850 = arith.addf %790, %824 : vector<2x32xf32>
    %851 = arith.addf %791, %849 : vector<2x32xf32>
    %852 = arith.maximumf %792, %824 : vector<2x32xf32>
    %853 = arith.maximumf %793, %849 : vector<2x32xf32>
    %c12_227 = arith.constant 12 : index
    %c0_228 = arith.constant 0 : index
    %854 = vector.load %arg14[%c12_227, %c0_228] : memref<16x256xf32, #tpu.memory_space<vmem>>, vector<2x128xf32>
    %cst_229 = arith.constant dense<0.000000e+00> : vector<2x128xf32>
    %855 = tpu.matmul %824, %484, %cst_229 {dimension_numbers = #tpu.dot_dimension_numbers<[1], [0], [0], [1], [0, 0, 1, 1], [], []>} : vector<2x32xf32>, vector<32x128xf32>, vector<2x128xf32> -> vector<2x128xf32>
    %856 = arith.addf %854, %855 : vector<2x128xf32>
    %c2_230 = arith.constant 2 : index
    %c128_231 = arith.constant 128 : index
    %857 = vector.load %arg14[%c2_230, %c128_231] : memref<16x256xf32, #tpu.memory_space<vmem>>, vector<2x128xf32>
    %cst_232 = arith.constant dense<0.000000e+00> : vector<2x128xf32>
    %858 = tpu.matmul %849, %485, %cst_232 {dimension_numbers = #tpu.dot_dimension_numbers<[1], [0], [0], [1], [0, 0, 1, 1], [], []>} : vector<2x32xf32>, vector<32x128xf32>, vector<2x128xf32> -> vector<2x128xf32>
    %859 = arith.addf %857, %858 : vector<2x128xf32>
    %860 = vector.extract_strided_slice %856 {offsets = [0, 0], sizes = [2, 32], strides = [1, 1]} : vector<2x128xf32> to vector<2x32xf32>
    %861 = arith.negf %860 : vector<2x32xf32>
    %862 = math.exp %861 : vector<2x32xf32>
    %cst_233 = arith.constant 1.000000e+00 : f32
    %863 = vector.broadcast %cst_233 : f32 to vector<2x32xf32>
    %864 = arith.addf %863, %862 : vector<2x32xf32>
    %865 = arith.divf %863, %864 : vector<2x32xf32>
    %866 = vector.extract_strided_slice %856 {offsets = [0, 32], sizes = [2, 32], strides = [1, 1]} : vector<2x128xf32> to vector<2x32xf32>
    %867 = arith.negf %866 : vector<2x32xf32>
    %868 = math.exp %867 : vector<2x32xf32>
    %cst_234 = arith.constant 1.000000e+00 : f32
    %869 = vector.broadcast %cst_234 : f32 to vector<2x32xf32>
    %870 = arith.addf %869, %868 : vector<2x32xf32>
    %871 = arith.divf %869, %870 : vector<2x32xf32>
    %872 = vector.extract_strided_slice %856 {offsets = [0, 64], sizes = [2, 32], strides = [1, 1]} : vector<2x128xf32> to vector<2x32xf32>
    %873 = math.tanh %872 : vector<2x32xf32>
    %874 = vector.extract_strided_slice %856 {offsets = [0, 96], sizes = [2, 32], strides = [1, 1]} : vector<2x128xf32> to vector<2x32xf32>
    %875 = arith.negf %874 : vector<2x32xf32>
    %876 = math.exp %875 : vector<2x32xf32>
    %cst_235 = arith.constant 1.000000e+00 : f32
    %877 = vector.broadcast %cst_235 : f32 to vector<2x32xf32>
    %878 = arith.addf %877, %876 : vector<2x32xf32>
    %879 = arith.divf %877, %878 : vector<2x32xf32>
    %880 = arith.mulf %871, %822 : vector<2x32xf32>
    %881 = arith.mulf %865, %873 : vector<2x32xf32>
    %882 = arith.addf %880, %881 : vector<2x32xf32>
    %883 = math.tanh %882 : vector<2x32xf32>
    %884 = arith.mulf %879, %883 : vector<2x32xf32>
    %885 = vector.extract_strided_slice %859 {offsets = [0, 0], sizes = [2, 32], strides = [1, 1]} : vector<2x128xf32> to vector<2x32xf32>
    %886 = arith.negf %885 : vector<2x32xf32>
    %887 = math.exp %886 : vector<2x32xf32>
    %cst_236 = arith.constant 1.000000e+00 : f32
    %888 = vector.broadcast %cst_236 : f32 to vector<2x32xf32>
    %889 = arith.addf %888, %887 : vector<2x32xf32>
    %890 = arith.divf %888, %889 : vector<2x32xf32>
    %891 = vector.extract_strided_slice %859 {offsets = [0, 32], sizes = [2, 32], strides = [1, 1]} : vector<2x128xf32> to vector<2x32xf32>
    %892 = arith.negf %891 : vector<2x32xf32>
    %893 = math.exp %892 : vector<2x32xf32>
    %cst_237 = arith.constant 1.000000e+00 : f32
    %894 = vector.broadcast %cst_237 : f32 to vector<2x32xf32>
    %895 = arith.addf %894, %893 : vector<2x32xf32>
    %896 = arith.divf %894, %895 : vector<2x32xf32>
    %897 = vector.extract_strided_slice %859 {offsets = [0, 64], sizes = [2, 32], strides = [1, 1]} : vector<2x128xf32> to vector<2x32xf32>
    %898 = math.tanh %897 : vector<2x32xf32>
    %899 = vector.extract_strided_slice %859 {offsets = [0, 96], sizes = [2, 32], strides = [1, 1]} : vector<2x128xf32> to vector<2x32xf32>
    %900 = arith.negf %899 : vector<2x32xf32>
    %901 = math.exp %900 : vector<2x32xf32>
    %cst_238 = arith.constant 1.000000e+00 : f32
    %902 = vector.broadcast %cst_238 : f32 to vector<2x32xf32>
    %903 = arith.addf %902, %901 : vector<2x32xf32>
    %904 = arith.divf %902, %903 : vector<2x32xf32>
    %905 = arith.mulf %896, %847 : vector<2x32xf32>
    %906 = arith.mulf %890, %898 : vector<2x32xf32>
    %907 = arith.addf %905, %906 : vector<2x32xf32>
    %908 = math.tanh %907 : vector<2x32xf32>
    %909 = arith.mulf %904, %908 : vector<2x32xf32>
    %910 = arith.addf %850, %884 : vector<2x32xf32>
    %911 = arith.addf %851, %909 : vector<2x32xf32>
    %912 = arith.maximumf %852, %884 : vector<2x32xf32>
    %913 = arith.maximumf %853, %909 : vector<2x32xf32>
    %c14_239 = arith.constant 14 : index
    %c0_240 = arith.constant 0 : index
    %914 = vector.load %arg14[%c14_239, %c0_240] : memref<16x256xf32, #tpu.memory_space<vmem>>, vector<2x128xf32>
    %cst_241 = arith.constant dense<0.000000e+00> : vector<2x128xf32>
    %915 = tpu.matmul %884, %484, %cst_241 {dimension_numbers = #tpu.dot_dimension_numbers<[1], [0], [0], [1], [0, 0, 1, 1], [], []>} : vector<2x32xf32>, vector<32x128xf32>, vector<2x128xf32> -> vector<2x128xf32>
    %916 = arith.addf %914, %915 : vector<2x128xf32>
    %c0_242 = arith.constant 0 : index
    %c128_243 = arith.constant 128 : index
    %917 = vector.load %arg14[%c0_242, %c128_243] : memref<16x256xf32, #tpu.memory_space<vmem>>, vector<2x128xf32>
    %cst_244 = arith.constant dense<0.000000e+00> : vector<2x128xf32>
    %918 = tpu.matmul %909, %485, %cst_244 {dimension_numbers = #tpu.dot_dimension_numbers<[1], [0], [0], [1], [0, 0, 1, 1], [], []>} : vector<2x32xf32>, vector<32x128xf32>, vector<2x128xf32> -> vector<2x128xf32>
    %919 = arith.addf %917, %918 : vector<2x128xf32>
    %920 = vector.extract_strided_slice %916 {offsets = [0, 0], sizes = [2, 32], strides = [1, 1]} : vector<2x128xf32> to vector<2x32xf32>
    %921 = arith.negf %920 : vector<2x32xf32>
    %922 = math.exp %921 : vector<2x32xf32>
    %cst_245 = arith.constant 1.000000e+00 : f32
    %923 = vector.broadcast %cst_245 : f32 to vector<2x32xf32>
    %924 = arith.addf %923, %922 : vector<2x32xf32>
    %925 = arith.divf %923, %924 : vector<2x32xf32>
    %926 = vector.extract_strided_slice %916 {offsets = [0, 32], sizes = [2, 32], strides = [1, 1]} : vector<2x128xf32> to vector<2x32xf32>
    %927 = arith.negf %926 : vector<2x32xf32>
    %928 = math.exp %927 : vector<2x32xf32>
    %cst_246 = arith.constant 1.000000e+00 : f32
    %929 = vector.broadcast %cst_246 : f32 to vector<2x32xf32>
    %930 = arith.addf %929, %928 : vector<2x32xf32>
    %931 = arith.divf %929, %930 : vector<2x32xf32>
    %932 = vector.extract_strided_slice %916 {offsets = [0, 64], sizes = [2, 32], strides = [1, 1]} : vector<2x128xf32> to vector<2x32xf32>
    %933 = math.tanh %932 : vector<2x32xf32>
    %934 = vector.extract_strided_slice %916 {offsets = [0, 96], sizes = [2, 32], strides = [1, 1]} : vector<2x128xf32> to vector<2x32xf32>
    %935 = arith.negf %934 : vector<2x32xf32>
    %936 = math.exp %935 : vector<2x32xf32>
    %cst_247 = arith.constant 1.000000e+00 : f32
    %937 = vector.broadcast %cst_247 : f32 to vector<2x32xf32>
    %938 = arith.addf %937, %936 : vector<2x32xf32>
    %939 = arith.divf %937, %938 : vector<2x32xf32>
    %940 = arith.mulf %931, %882 : vector<2x32xf32>
    %941 = arith.mulf %925, %933 : vector<2x32xf32>
    %942 = arith.addf %940, %941 : vector<2x32xf32>
    %943 = math.tanh %942 : vector<2x32xf32>
    %944 = arith.mulf %939, %943 : vector<2x32xf32>
    %945 = vector.extract_strided_slice %919 {offsets = [0, 0], sizes = [2, 32], strides = [1, 1]} : vector<2x128xf32> to vector<2x32xf32>
    %946 = arith.negf %945 : vector<2x32xf32>
    %947 = math.exp %946 : vector<2x32xf32>
    %cst_248 = arith.constant 1.000000e+00 : f32
    %948 = vector.broadcast %cst_248 : f32 to vector<2x32xf32>
    %949 = arith.addf %948, %947 : vector<2x32xf32>
    %950 = arith.divf %948, %949 : vector<2x32xf32>
    %951 = vector.extract_strided_slice %919 {offsets = [0, 32], sizes = [2, 32], strides = [1, 1]} : vector<2x128xf32> to vector<2x32xf32>
    %952 = arith.negf %951 : vector<2x32xf32>
    %953 = math.exp %952 : vector<2x32xf32>
    %cst_249 = arith.constant 1.000000e+00 : f32
    %954 = vector.broadcast %cst_249 : f32 to vector<2x32xf32>
    %955 = arith.addf %954, %953 : vector<2x32xf32>
    %956 = arith.divf %954, %955 : vector<2x32xf32>
    %957 = vector.extract_strided_slice %919 {offsets = [0, 64], sizes = [2, 32], strides = [1, 1]} : vector<2x128xf32> to vector<2x32xf32>
    %958 = math.tanh %957 : vector<2x32xf32>
    %959 = vector.extract_strided_slice %919 {offsets = [0, 96], sizes = [2, 32], strides = [1, 1]} : vector<2x128xf32> to vector<2x32xf32>
    %960 = arith.negf %959 : vector<2x32xf32>
    %961 = math.exp %960 : vector<2x32xf32>
    %cst_250 = arith.constant 1.000000e+00 : f32
    %962 = vector.broadcast %cst_250 : f32 to vector<2x32xf32>
    %963 = arith.addf %962, %961 : vector<2x32xf32>
    %964 = arith.divf %962, %963 : vector<2x32xf32>
    %965 = arith.mulf %956, %907 : vector<2x32xf32>
    %966 = arith.mulf %950, %958 : vector<2x32xf32>
    %967 = arith.addf %965, %966 : vector<2x32xf32>
    %968 = math.tanh %967 : vector<2x32xf32>
    %969 = arith.mulf %964, %968 : vector<2x32xf32>
    %970 = arith.addf %910, %944 : vector<2x32xf32>
    %971 = arith.addf %911, %969 : vector<2x32xf32>
    %972 = arith.maximumf %912, %944 : vector<2x32xf32>
    %973 = arith.maximumf %913, %969 : vector<2x32xf32>
    %c0_251 = arith.constant 0 : index
    %c0_252 = arith.constant 0 : index
    %974 = vector.load %arg9[%c0_251, %c0_252] : memref<128x64xf32, #tpu.memory_space<vmem>>, vector<128x64xf32>
    %cst_253 = arith.constant 1.250000e-01 : f32
    %975 = vector.broadcast %cst_253 : f32 to vector<2x32xf32>
    %976 = arith.mulf %970, %975 : vector<2x32xf32>
    %977 = vector.extract_strided_slice %974 {offsets = [0, 0], sizes = [32, 64], strides = [1, 1]} : vector<128x64xf32> to vector<32x64xf32>
    %cst_254 = arith.constant dense<0.000000e+00> : vector<2x64xf32>
    %978 = tpu.matmul %976, %977, %cst_254 {dimension_numbers = #tpu.dot_dimension_numbers<[1], [0], [0], [1], [0, 0, 1, 1], [], []>} : vector<2x32xf32>, vector<32x64xf32>, vector<2x64xf32> -> vector<2x64xf32>
    %cst_255 = arith.constant 1.250000e-01 : f32
    %979 = vector.broadcast %cst_255 : f32 to vector<2x32xf32>
    %980 = arith.mulf %971, %979 : vector<2x32xf32>
    %981 = vector.extract_strided_slice %974 {offsets = [32, 0], sizes = [32, 64], strides = [1, 1]} : vector<128x64xf32> to vector<32x64xf32>
    %cst_256 = arith.constant dense<0.000000e+00> : vector<2x64xf32>
    %982 = tpu.matmul %980, %981, %cst_256 {dimension_numbers = #tpu.dot_dimension_numbers<[1], [0], [0], [1], [0, 0, 1, 1], [], []>} : vector<2x32xf32>, vector<32x64xf32>, vector<2x64xf32> -> vector<2x64xf32>
    %983 = arith.addf %978, %982 : vector<2x64xf32>
    %984 = vector.extract_strided_slice %974 {offsets = [64, 0], sizes = [32, 64], strides = [1, 1]} : vector<128x64xf32> to vector<32x64xf32>
    %cst_257 = arith.constant dense<0.000000e+00> : vector<2x64xf32>
    %985 = tpu.matmul %972, %984, %cst_257 {dimension_numbers = #tpu.dot_dimension_numbers<[1], [0], [0], [1], [0, 0, 1, 1], [], []>} : vector<2x32xf32>, vector<32x64xf32>, vector<2x64xf32> -> vector<2x64xf32>
    %986 = arith.addf %983, %985 : vector<2x64xf32>
    %987 = vector.extract_strided_slice %974 {offsets = [96, 0], sizes = [32, 64], strides = [1, 1]} : vector<128x64xf32> to vector<32x64xf32>
    %cst_258 = arith.constant dense<0.000000e+00> : vector<2x64xf32>
    %988 = tpu.matmul %973, %987, %cst_258 {dimension_numbers = #tpu.dot_dimension_numbers<[1], [0], [0], [1], [0, 0, 1, 1], [], []>} : vector<2x32xf32>, vector<32x64xf32>, vector<2x64xf32> -> vector<2x64xf32>
    %989 = arith.addf %986, %988 : vector<2x64xf32>
    %c0_259 = arith.constant 0 : index
    %c0_260 = arith.constant 0 : index
    %990 = vector.load %arg10[%c0_259, %c0_260] : memref<1x64xf32, #tpu.memory_space<vmem>>, vector<1x64xf32>
    %991 = vector.broadcast %990 : vector<1x64xf32> to vector<2x64xf32>
    %992 = arith.addf %989, %991 : vector<2x64xf32>
    %cst_261 = arith.constant 0.000000e+00 : f32
    %993 = vector.broadcast %cst_261 : f32 to vector<2x64xf32>
    %994 = arith.maximumf %992, %993 : vector<2x64xf32>
    %c0_262 = arith.constant 0 : index
    %c0_263 = arith.constant 0 : index
    %995 = vector.load %arg11[%c0_262, %c0_263] : memref<64x4xf32, #tpu.memory_space<vmem>>, vector<64x4xf32>
    %cst_264 = arith.constant dense<0.000000e+00> : vector<2x4xf32>
    %996 = tpu.matmul %994, %995, %cst_264 {dimension_numbers = #tpu.dot_dimension_numbers<[1], [0], [0], [1], [0, 0, 1, 1], [], []>} : vector<2x64xf32>, vector<64x4xf32>, vector<2x4xf32> -> vector<2x4xf32>
    %c0_265 = arith.constant 0 : index
    %c0_266 = arith.constant 0 : index
    %997 = vector.load %arg12[%c0_265, %c0_266] : memref<1x4xf32, #tpu.memory_space<vmem>>, vector<1x4xf32>
    %998 = vector.broadcast %997 : vector<1x4xf32> to vector<2x4xf32>
    %999 = arith.addf %996, %998 : vector<2x4xf32>
    %c0_267 = arith.constant 0 : index
    %c0_268 = arith.constant 0 : index
    %1000 = vector.load %arg13[%c0_267, %c0_268] : memref<2x4xf32, #tpu.memory_space<vmem>>, vector<2x4xf32>
    tpu.vector_store %arg13[%c0_267, %c0_268], %999 {strides = array<i32>} : memref<2x4xf32, #tpu.memory_space<vmem>>, vector<2x4xf32>,
    return
  }
}

</mosaic_0001>

<bundles_post_ra>
// kernel: tpu_custom_call.1
= control target key start
LH: loop header
LB: loop body
LE: loop exit
PB: predicated region body
PF: predicated region fallthrough
CT: control target
= control target key end

     0   :  { %18 = vsyncpa [#allocation5], 0  ;;  %s6644_s0 = inlined_call_operand.hbm [shape: f32[16,32], index: 0, kind: input, shape index: {}]   ;;  %s6645_s1 = inlined_call_operand.vmem [shape: f32[32,256], index: 1, kind: input, shape index: {}]   ;;  %s6646_s2 = inlined_call_operand.vmem [shape: f32[1,256], index: 2, kind: input, shape index: {}]   ;;  %s6647_s3 = inlined_call_operand.vmem [shape: f32[32,128], index: 3, kind: input, shape index: {}]   ;;  %s6648_s4 = inlined_call_operand.hbm [shape: f32[32,128], index: 4, kind: input, shape index: {}]   ;;  %s6649_s5 = inlined_call_operand.vmem [shape: f32[64,256], index: 5, kind: input, shape index: {}]   ;;  %s6650_s6 = inlined_call_operand.vmem [shape: f32[1,256], index: 6, kind: input, shape index: {}]   ;;  %s6651_s7 = inlined_call_operand.hbm [shape: f32[32,128], index: 7, kind: input, shape index: {}]   ;;  %s6652_s8 = inlined_call_operand.hbm [shape: f32[32,128], index: 8, kind: input, shape index: {}]   ;;  %s6653_s9 = inlined_call_operand.vmem [shape: f32[128,64], index: 9, kind: input, shape index: {}]   ;;  %s6654_s10 = inlined_call_operand.vmem [shape: f32[1,64], index: 10, kind: input, shape index: {}]   ;;  %s6655_s11 = inlined_call_operand.vmem [shape: f32[64,4], index: 11, kind: input, shape index: {}]   ;;  %s6656_s12 = inlined_call_operand.vmem [shape: f32[1,4], index: 12, kind: input, shape index: {}]   ;;  %s6657_s13 = inlined_call_operand.hbm [shape: f32[2,4], index: 13, kind: output, shape index: {}]  }
   0x1   :  { %19 = vsyncpa [#allocation8], 0 }
   0x2   :  { %20 = vsyncpa [#allocation11], 0 }
   0x3   :  { %21 = vsyncpa [#allocation6], 0  ;;  %s5609_s25 = smov [#allocation7]   ;;  %s5610_s27 = smov [#allocation4]  }
   0x4   :  { %s45_s26 = sshll.u32 %s5609_s25, 4  ;;  %s27_s28 = sshll.u32 %s5610_s27, 4  ;;  %s46_s26 = int_to_ptr.vmem [resolvable:$true] %s45_s26  ;;  %s5691_s28 = int_to_ptr.vmem [resolvable:$true] %s27_s28 }
   0x5   :  { %s5491_s14 = scalar_lea.hbm %s6648_s4, 512 }
   0x6   :  { %p5492_p0 = scmp.ne.s32.totalorder %s6648_s4, %s5491_s14  ;;  %p5495_p1 = scmp.lt.u32.totalorder %s5491_s14, %s6648_s4 }
   0x8   :  { %p5497_p2 = pnand %p5495_p1, %p5492_p0 }
   0xa   :  { %5500 = shalt.err (!%p5497_p2)
}
   0xb   :  { %s5501_s19 = scalar_lea.vmem %s46_s26, 512  ;;  %p5506_p4 = scmp.lt.s32.totalorder %s46_s26, %s46_s26 }
   0xc   :  { %p5502_p3 = scmp.ne.s32.totalorder %s46_s26, %s5501_s19  ;;  %p5507_p5 = scmp.lt.s32.totalorder %s5501_s19, %s5501_s19 }
   0xe   :  { %p5508_p6 = por %p5507_p5, %p5506_p4 }
  0x10   :  { %p5509_p7 = pnand %p5508_p6, %p5502_p3 }
  0x12   :  { %5512 = shalt.err (!%p5509_p7)
}
  0x13   :  { %s5611_s20 = smov 128   ;;  %s5612_s21 = smov 8  }
  0x14   :  { %51 = dma.hbm_to_vmem [thread:$0]  %s6648_s4, 512, %s46_s26, [#allocation8], %s5611_s20, %s5611_s20, %s5612_s21  }
  0x15   :  { %s5513_s27 = scalar_lea.hbm %s6644_s0, 256 }
  0x16   :  { %p5514_p8 = scmp.ne.s32.totalorder %s6644_s0, %s5513_s27  ;;  %p5517_p9 = scmp.lt.u32.totalorder %s5513_s27, %s6644_s0 }
  0x18   :  { %p5519_p10 = pnand %p5517_p9, %p5514_p8 }
  0x1a   :  { %5522 = shalt.err (!%p5519_p10)
}
  0x1b   :  { %s5523_s16 = scalar_lea.vmem %s5691_s28, 256  ;;  %p5528_p12 = scmp.lt.s32.totalorder %s5691_s28, %s5691_s28 }
  0x1c   :  { %p5524_p11 = scmp.ne.s32.totalorder %s5691_s28, %s5523_s16  ;;  %p5529_p13 = scmp.lt.s32.totalorder %s5523_s16, %s5523_s16 }
  0x1e   :  { %p5530_p0 = por %p5529_p13, %p5528_p12 }
  0x20   :  { %p5531_p1 = pnand %p5530_p0, %p5524_p11 }
  0x22   :  { %5534 = shalt.err (!%p5531_p1)
}
  0x23   :  { %33 = dma.hbm_to_vmem [thread:$0]  %s6644_s0, 256, %s5691_s28, [#allocation5], %s5611_s20, %s5611_s20, %s5612_s21  }
  0x24   :  { %s5613_s17 = smov [#allocation9]   ;;  %s5614_s19 = smov [#allocation10]  }
  0x25   :  { %s61_s18 = sshll.u32 %s5613_s17, 4  ;;  %s73_s22 = sshll.u32 %s5614_s19, 4  ;;  %s62_s18 = int_to_ptr.vmem [resolvable:$true] %s61_s18  ;;  %s5728_s22 = int_to_ptr.vmem [resolvable:$true] %s73_s22 }
  0x26   :  { %s5535_s25 = scalar_lea.hbm %s6651_s7, 512 }
  0x27   :  { %p5536_p2 = scmp.ne.s32.totalorder %s6651_s7, %s5535_s25  ;;  %p5539_p3 = scmp.lt.u32.totalorder %s5535_s25, %s6651_s7 }
  0x29   :  { %p5541_p4 = pnand %p5539_p3, %p5536_p2 }
  0x2b   :  { %5544 = shalt.err (!%p5541_p4)
}
  0x2c   :  { %s5545_s0 = scalar_lea.vmem %s62_s18, 512  ;;  %p5550_p6 = scmp.lt.s32.totalorder %s62_s18, %s62_s18 }
  0x2d   :  { %p5546_p5 = scmp.ne.s32.totalorder %s62_s18, %s5545_s0  ;;  %p5551_p7 = scmp.lt.s32.totalorder %s5545_s0, %s5545_s0 }
  0x2f   :  { %p5552_p8 = por %p5551_p7, %p5550_p6 }
  0x31   :  { %p5553_p9 = pnand %p5552_p8, %p5546_p5 }
  0x33   :  { %5556 = shalt.err (!%p5553_p9)
}
  0x34   :  { %67 = dma.hbm_to_vmem [thread:$0]  %s6651_s7, 512, %s62_s18, [#allocation8], %s5611_s20, %s5611_s20, %s5612_s21  }
  0x35   :  { %s5557_s26 = scalar_lea.hbm %s6652_s8, 512 }
  0x36   :  { %p5558_p10 = scmp.ne.s32.totalorder %s6652_s8, %s5557_s26  ;;  %p5561_p11 = scmp.lt.u32.totalorder %s5557_s26, %s6652_s8 }
  0x38   :  { %p5563_p12 = pnand %p5561_p11, %p5558_p10 }
  0x3a   :  { %5566 = shalt.err (!%p5563_p12)
}
  0x3b   :  { %s5567_s25 = scalar_lea.vmem %s5728_s22, 512  ;;  %p5572_p0 = scmp.lt.s32.totalorder %s5728_s22, %s5728_s22 }
  0x3c   :  { %p5568_p13 = scmp.ne.s32.totalorder %s5728_s22, %s5567_s25  ;;  %p5573_p1 = scmp.lt.s32.totalorder %s5567_s25, %s5567_s25 }
  0x3e   :  { %p5574_p2 = por %p5573_p1, %p5572_p0 }
  0x40   :  { %p5575_p3 = pnand %p5574_p2, %p5568_p13 }
  0x42   :  { %5578 = shalt.err (!%p5575_p3)
}
  0x43   :  { %79 = dma.hbm_to_vmem [thread:$0]  %s6652_s8, 512, %s5728_s22, [#allocation11], %s5611_s20, %s5611_s20, %s5612_s21  }
  0x44   :  { %5601 = dma.done.wait [#allocation5], 256  }
  0x45   :  { %5602 = vsyncadd [#allocation5], 4294967040 }
  0x46   :  { %5603 = dma.done.wait [#allocation8], 1024  }
  0x47   :  { %5604 = vsyncadd [#allocation8], 4294966272 }
  0x48   :  { %5605 = dma.done.wait [#allocation11], 512  }
  0x49   :  { %5606 = vsyncadd [#allocation11], 4294966784  ;;  %v5615_v0 = vmov 0.0   ;;  %v5616_v1 = vmov 0.0|0.0   ;;  %vm5617_vm0 = vmmov 0   ;;  %v103_v2 = vld [vmem:[%s6645_s1 + $0x8] sm:$0xff]  ;;  %v112_v28 = vlaneseq }
  0x4a   :  { %193 = vmatprep.mubr.f32.mxu0 %v5615_v0  ;;  %4979 = vmatprep.subr.bf16.mxu1 %v5616_v1  ;;  %v105_v3 = vld [vmem:[%s6645_s1 + $0x18] sm:$0xff]  ;;  %v102_v4 = vld [vmem:[%s6645_s1] sm:$0xff]  ;;  %v104_v6 = vld [vmem:[%s6645_s1 + $0x10] sm:$0xff]  ;;  %vm122_vm1 = vcmask 261120   ;;  %s5619_s20 = smov 32   ;;  %vm420_vm2 = vcmask 254976  }
  0x4b   :  { %4564 = vmatprep.mubr.msk.f32.mxu1 %vm5617_vm0, %v5615_v0  ;;  %v4971_v5 = vpack.c.bf16 %v105_v3, %v103_v2  ;;  %v107_v7 = vld [vmem:[%s6645_s1 + $0x28] sm:$0xff]  ;;  %v109_v8 = vld [vmem:[%s6645_s1 + $0x38] sm:$0xff]  ;;  %v4973_v9 = vpack.c.bf16 %v104_v6, %v102_v4  ;;  %v106_v11 = vld [vmem:[%s6645_s1 + $0x20] sm:$0xff]  ;;  %v5841_v29 = vshrl.u32 %v112_v28, 7  ;;  %vm643_vm3 = vcmask 257026  }
  0x4c   :  { %v4975_v10 = vpack.c.bf16 %v109_v8, %v107_v7  ;;  %v108_v12 = vld [vmem:[%s6645_s1 + $0x30] sm:$0xff]  ;;  %v210_v13 = vld [vmem:[%s6647_s3] sm:$0xff]  ;;  %v211_v14 = vld [vmem:[%s6647_s3 + $0x8] sm:$0xff]  ;;  %vm1092_vm4 = vcmask 261126   ;;  %vm869_vm5 = vcmask 259076   ;;  %vm649_vm6 = vcmask 521476  }
  0x4d   :  { %4972 = vmatprep.subr.bf16.mxu0 %v4971_v5  ;;  %v4977_v15 = vpack.c.bf16 %v108_v12, %v106_v11  ;;  %v5799_v16 = vpack.c.bf16 %v211_v14, %v210_v13  ;;  %v212_v17 = vld [vmem:[%s6647_s3 + $0x10] sm:$0xff]  ;;  %v214_v18 = vld [vmem:[#allocation7] sm:$0xff]  ;;  %v215_v19 = vld [vmem:[#allocation7 + $0x8] sm:$0xff]  ;;  %v114_v30 = vsub.s32 0, %v5841_v29  ;;  %v118_v32 = vsub.s32 1, %v5841_v29 }
  0x4e   :  { %4974 = vmatpush1.bf16.msra.mxu0 %v4973_v9  ;;  %v213_v20 = vld [vmem:[%s6647_s3 + $0x18] sm:$0xff]  ;;  %v100_v22 = vld [vmem:[#allocation4] sm:$0xff]  ;;  %v5811_v23 = vpack.c.bf16 %v215_v19, %v214_v18  ;;  %v110_v31 = vld [vmem:[%s6646_s2] sm:$0x3]  ;;  %s5618_s2 = smov 64   ;;  %vm426_vm7 = vcmask 523526  }
  0x4f   :  { %4976 = vmatprep.subr.bf16.mxu0 %v4975_v10  ;;  %4981 = vmatpush3.bf16.msra.mxu1 %v5799_v16  ;;  %v5808_v21 = vpack.c.bf16 %v213_v20, %v212_v17  ;;  %v216_v24 = vld [vmem:[#allocation7 + $0x10] sm:$0xff]  ;;  %v217_v25 = vld [vmem:[#allocation7 + $0x18] sm:$0xff]  ;;  %v115_v33 = vrot.slane %v110_v31, %v114_v30  ;;  %v119_v34 = vrot.slane %v110_v31, %v118_v32  ;;  %vm875_vm8 = vcmask 519426  }
  0x50   :  { %4982 = vmatprep.subr.bf16.mxu1 %v5616_v1  ;;  %v101_v26 = vld [vmem:[#allocation4 + $0x8] sm:$0xff]  ;;  %v5819_v27 = vpack.c.bf16 %v217_v25, %v216_v24  ;;  %vm1098_vm9 = vcmask 517376   ;;  %vm2016_vm10 = vcmask 523264   ;;  %vm4277_vm11 = vcmask 25600  }
  0x52   :  { %4978 = vmatpush1.bf16.msra.mxu0 %v4977_v15 }
  0x53   :  { %4985 = vmatprep.subr.bf16.mxu0 %v5616_v1  ;;  %4984 = vmatpush3.bf16.msra.mxu1 %v5808_v21 }
  0x54   :  { %4991 = vmatprep.subr.bf16.mxu1 %v5616_v1 }
  0x55   :  { %4296 = vmatmul.mubr.msk.f32.vlgmr.msra.gmra.mrb[0].mxu0 %vm122_vm1, %v100_v22 }
  0x56   :  { %199 = vmatprep.mubr.f32.mxu0 %v5615_v0  ;;  %4987 = vmatpush3.bf16.msra.mxu0 %v5811_v23 }
  0x57   :  { %4988 = vmatprep.subr.bf16.mxu0 %v5616_v1  ;;  %4565 = vmatmul.mubr.f32.vlgmr.msra.gmra.mrb[0].mxu1 %v5615_v0 }
  0x58   :  { %4993 = vmatpush3.bf16.msra.mxu1 %v5799_v16  ;;  %4586 = vmatprep.mubr.msk.f32.mxu1 %vm5617_vm0, %v5615_v0 }
  0x59   :  { %4297 = vmatmul.mubr.msk.f32.gmra.mrb[2].mxu0 %vm122_vm1, %v101_v26  ;;  %4994 = vmatprep.subr.bf16.mxu1 %v5616_v1 }
  0x5a   :  { %4990 = vmatpush3.bf16.msra.mxu0 %v5819_v27  ;;  %4575 = vmatprep.mubr.msk.f32.mxu0 %vm5617_vm0, %v5615_v0 }
  0x5b   :  { %4997 = vmatprep.subr.bf16.mxu0 %v5616_v1 }
  0x5c   :  { %4996 = vmatpush3.bf16.msra.mxu1 %v5808_v21 }
  0x5d   :  { %4576 = vmatmul.mubr.f32.vlgmr.msra.gmra.mrb[4].mxu0 %v5615_v0  ;;  %5003 = vmatprep.subr.bf16.mxu1 %v5616_v1 }
  0x5e   :  { %4999 = vmatpush3.bf16.msra.mxu0 %v5811_v23  ;;  %4597 = vmatprep.mubr.msk.f32.mxu0 %vm5617_vm0, %v5615_v0 }
  0x5f   :  { %5000 = vmatprep.subr.bf16.mxu0 %v5616_v1 }
  0x62   :  { %5002 = vmatpush3.bf16.msra.mxu0 %v5819_v27 }
  0x63   :  { %5009 = vmatprep.subr.bf16.mxu0 %v5616_v1 }
 0x128   :  { %v195_v35 = vpop.f32.mrb[0].mxu0 }
 0x129   :  { %v196_v36 = vadd.f32 %v195_v35, %v115_v33  ;;  %v197_v37 = vpop.f32.mrb[1].mxu0 }
 0x12a   :  { %v198_v38 = vadd.f32 %v197_v37, %v119_v34  ;;  %v288_v39 = vpop.f32.mrb[0].mxu1 }
 0x12b   :  { %206 = vst [vmem:[#allocation2] sm:$0xff] %v196_v36  ;;  %v4566_v40 = vpop.f32.mrb[1].mxu1 }
 0x12c   :  { %207 = vst [vmem:[#allocation2 + $0x8] sm:$0xff] %v198_v38  ;;  %v201_v41 = vpop.f32.mrb[2].mxu0 }
 0x12d   :  { %v202_v42 = vadd.f32 %v201_v41, %v115_v33  ;;  %v203_v43 = vpop.f32.mrb[3].mxu0 }
 0x12e   :  { %v204_v44 = vadd.f32 %v203_v43, %v119_v34 }
 0x12f   :  { %208 = vst [vmem:[#allocation2 + $0x10] sm:$0xff] %v202_v42 }
 0x130   :  { %209 = vst [vmem:[#allocation2 + $0x18] sm:$0xff] %v204_v44  ;;  %v360_v45 = vpop.f32.mrb[4].mxu0 }
 0x131   :  { %v4577_v46 = vpop.f32.mrb[5].mxu0  ;;  %v365_v47 = vrot.slane %v360_v45, 2 }
 0x132   :  { %v218_v48 = vld [vmem:[#allocation2] sm:$0x3]  ;;  %v428_v34 = vld [vmem:[#allocation2] sm:$0xc] }
 0x133   :  { %v292_v51 = vadd.f32 %v288_v39, %v218_v48 }
 0x135   :  { %v4298_v55 = vmul.f32 -1.442695, %v292_v51 }
 0x137   :  { %v293_v49 = vld [vmem:[#allocation2 + $0x18] sm:$0xc0]  ;;  %v505_v25 = vld [vmem:[#allocation2 + $0x18] sm:$0x30] }
 0x138   :  { %v367_v50 = vadd.f32 %v365_v47, %v293_v49 }
 0x13a   :  { %5235 = vtanh.f32 %v367_v50  ;;  %v4299_v54 = vmul.f32 -1.442695, %v367_v50 }
 0x13b   :  { %5237 = vtanh.f32 %v292_v51 }
 0x13c   :  { %5239 = vpow2.f32 %v4299_v54 }
 0x13d   :  { %5241 = vpow2.f32 %v4298_v55 }
 0x144   :  { %v5236_v52 = vpop.eup %5235 }
 0x145   :  { %401 = vrot.lane.b32.xlu0 %v5236_v52, %s5618_s2  ;;  %v5238_v53 = vpop.eup %5237 }
 0x146   :  { %v5240_v56 = vpop.eup %5239 }
 0x147   :  { %v395_v57 = vadd.f32 1.0, %v5240_v56  ;;  %v5242_v58 = vpop.eup %5241 }
 0x148   :  { %v371_v59 = vadd.f32 1.0, %v5242_v58 }
 0x149   :  { %377 = vrot.lane.b32.xlu0 %v5238_v53, %s5618_s2  ;;  %5243 = vrcp.f32 %v395_v57 }
 0x14a   :  { %5245 = vrcp.f32 %v371_v59 }
 0x153   :  { %v5244_v60 = vpop.eup %5243 }
 0x154   :  { %v5246_v63 = vpop.eup %5245  ;;  %v399_v4 = vmul.f32 0.0, %v5244_v60 }
 0x155   :  { %v375_v7 = vmul.f32 0.0, %v5246_v63 }
 0x1b7   :  { %v402_v61 = vpop.permute.xlu0 %401 }
 0x1b8   :  { %v404_v62 = vmul.f32 %v5244_v60, %v402_v61 }
 0x1ba   :  { %406 = vrot.lane.b32.xlu1 %v404_v62, %s5619_s20 }
 0x1bb   :  { %v378_v2 = vpop.permute.xlu0 %377 }
 0x1bc   :  { %v380_v3 = vmul.f32 %v5246_v63, %v378_v2 }
 0x1be   :  { %382 = vrot.lane.b32.xlu1 %v380_v3, %s5619_s20 }
 0x22c   :  { %v407_v5 = vpop.permute.xlu1 %406 }
 0x22d   :  { %v5856_v6 = vadd.f32 %v407_v5, %v399_v4 }
 0x22f   :  { %5247 = vtanh.f32 %v5856_v6  ;;  %v620_v50 = vrot.slane %v5856_v6, 2 }
 0x230   :  { %v383_v8 = vpop.permute.xlu1 %382 }
 0x231   :  { %v5859_v9 = vadd.f32 %v383_v8, %v375_v7 }
 0x233   :  { %5249 = vtanh.f32 %v5859_v9  ;;  %v593_v52 = vrot.slane %v5859_v9, 6  ;;  %v731_v9 = vld [vmem:[#allocation2 + $0x18] sm:$0xc] }
 0x239   :  { %v5248_v10 = vpop.eup %5247 }
 0x23a   :  { %412 = vrot.lane.b32.xlu0 %v5248_v10, %s5618_s2 }
 0x23d   :  { %v5250_v11 = vpop.eup %5249 }
 0x23e   :  { %388 = vrot.lane.b32.xlu1 %v5250_v11, %s5618_s2 }
 0x2ac   :  { %v413_v12 = vpop.permute.xlu0 %412 }
 0x2ad   :  { %v5864_v13 = vmul.f32 %v5244_v60, %v413_v12 }
 0x2af   :  { %v506_v14 = vrot.slane %v5864_v13, 6 }
 0x2b0   :  { %v389_v15 = vpop.permute.xlu1 %388 }
 0x2b1   :  { %v391_v17 = vmul.f32 %v5246_v63, %v389_v15  ;;  %507 = vrot.lane.b32.xlu0 %v506_v14, %s5619_s20  ;;  %v651_v15 = vld [vmem:[#allocation2] sm:$0x30] }
 0x2b3   :  { %417 = vrot.lane.b32.xlu1 %v391_v17, %s5619_s20 }
 0x323   :  { %v508_v18 = vpop.permute.xlu0 %507 }
 0x324   :  { %4598 = vmatmul.mubr.msk.f32.vlgmr.msra.gmra.mrb[6].mxu0 %vm122_vm1, %v508_v18 }
 0x325   :  { %v418_v19 = vpop.permute.xlu1 %417  ;;  %5011 = vmatpush3.bf16.msra.mxu0 %v5811_v23  ;;  %4619 = vmatprep.mubr.msk.f32.mxu0 %vm5617_vm0, %v5615_v0 }
 0x326   :  { %421 = vst.msk [vmem:[#allocation3] sm:$0x3] %vm420_vm2, %v418_v19  ;;  %4587 = vmatmul.mubr.msk.f32.vlgmr.msra.gmra.mrb[2].mxu1 %vm122_vm1, %v418_v19  ;;  %5012 = vmatprep.subr.bf16.mxu0 %v5616_v1 }
 0x327   :  { %5005 = vmatpush3.bf16.msra.mxu1 %v5799_v16  ;;  %4608 = vmatprep.mubr.msk.f32.mxu1 %vm5617_vm0, %v5615_v0 }
 0x328   :  { %5006 = vmatprep.subr.bf16.mxu1 %v5616_v1 }
 0x329   :  { %5014 = vmatpush3.bf16.msra.mxu0 %v5819_v27 }
 0x32a   :  { %5021 = vmatprep.subr.bf16.mxu0 %v5616_v1 }
 0x32b   :  { %5008 = vmatpush3.bf16.msra.mxu1 %v5808_v21 }
 0x32c   :  { %5015 = vmatprep.subr.bf16.mxu1 %v5616_v1 }
 0x3f7   :  { %v577_v20 = vpop.f32.mrb[6].mxu0 }
 0x3f8   :  { %v582_v22 = vrot.slane %v577_v20, 4  ;;  %v4599_v24 = vpop.f32.mrb[7].mxu0 }
 0x3f9   :  { %v497_v26 = vpop.f32.mrb[2].mxu1 }
 0x3fa   :  { %v584_v28 = vadd.f32 %v582_v22, %v505_v25  ;;  %v502_v31 = vrot.slane %v497_v26, 6  ;;  %v4588_v33 = vpop.f32.mrb[3].mxu1 }
 0x3fc   :  { %5251 = vtanh.f32 %v584_v28  ;;  %v504_v35 = vadd.f32 %v502_v31, %v428_v34  ;;  %v4303_v38 = vmul.f32 -1.442695, %v584_v28 }
 0x3fe   :  { %5253 = vtanh.f32 %v504_v35  ;;  %v4302_v39 = vmul.f32 -1.442695, %v504_v35 }
 0x3ff   :  { %5255 = vpow2.f32 %v4303_v38 }
 0x400   :  { %5257 = vpow2.f32 %v4302_v39 }
 0x406   :  { %v5252_v36 = vpop.eup %5251 }
 0x407   :  { %624 = vrot.lane.b32.xlu0 %v5252_v36, %s5618_s2 }
 0x408   :  { %v5254_v37 = vpop.eup %5253 }
 0x409   :  { %597 = vrot.lane.b32.xlu1 %v5254_v37, %s5618_s2  ;;  %v5256_v40 = vpop.eup %5255 }
 0x40a   :  { %v5258_v41 = vpop.eup %5257  ;;  %v615_v42 = vadd.f32 1.0, %v5256_v40 }
 0x40b   :  { %v588_v43 = vadd.f32 1.0, %v5258_v41 }
 0x40c   :  { %5259 = vrcp.f32 %v615_v42 }
 0x40d   :  { %5261 = vrcp.f32 %v588_v43 }
 0x416   :  { %v5260_v44 = vpop.eup %5259 }
 0x417   :  { %v5262_v47 = vpop.eup %5261  ;;  %v622_v51 = vmul.f32 %v5260_v44, %v620_v50 }
 0x418   :  { %v595_v55 = vmul.f32 %v5262_v47, %v593_v52 }
 0x479   :  { %v625_v45 = vpop.permute.xlu0 %624 }
 0x47a   :  { %v627_v46 = vmul.f32 %v5260_v44, %v625_v45 }
 0x47b   :  { %v598_v48 = vpop.permute.xlu1 %597 }
 0x47c   :  { %629 = vrot.lane.b32.xlu0 %v627_v46, %s5619_s20  ;;  %v600_v49 = vmul.f32 %v5262_v47, %v598_v48 }
 0x47e   :  { %602 = vrot.lane.b32.xlu1 %v600_v49, %s5619_s20 }
 0x4ee   :  { %v630_v53 = vpop.permute.xlu0 %629 }
 0x4ef   :  { %v5890_v54 = vadd.f32 %v630_v53, %v622_v51 }
 0x4f0   :  { %v603_v56 = vpop.permute.xlu1 %602 }
 0x4f1   :  { %5263 = vtanh.f32 %v5890_v54  ;;  %v5893_v57 = vadd.f32 %v603_v56, %v595_v55  ;;  %v846_v38 = vrot.slane %v5890_v54, 2  ;;  %v957_v56 = vld [vmem:[#allocation2 + $0x18] sm:$0x3] }
 0x4f3   :  { %5265 = vtanh.f32 %v5893_v57  ;;  %v819_v40 = vrot.slane %v5893_v57, 6 }
 0x4fb   :  { %v5264_v58 = vpop.eup %5263 }
 0x4fc   :  { %635 = vrot.lane.b32.xlu0 %v5264_v58, %s5618_s2 }
 0x4fd   :  { %v5266_v59 = vpop.eup %5265 }
 0x4fe   :  { %608 = vrot.lane.b32.xlu1 %v5266_v59, %s5618_s2 }
 0x56e   :  { %v636_v60 = vpop.permute.xlu0 %635 }
 0x56f   :  { %v5898_v61 = vmul.f32 %v5260_v44, %v636_v60 }
 0x570   :  { %v609_v63 = vpop.permute.xlu1 %608 }
 0x571   :  { %v732_v62 = vrot.slane %v5898_v61, 4  ;;  %v5901_v2 = vmul.f32 %v5262_v47, %v609_v63 }
 0x573   :  { %733 = vrot.lane.b32.xlu0 %v732_v62, %s5619_s20  ;;  %v652_v3 = vrot.slane %v5901_v2, 2 }
 0x575   :  { %653 = vrot.lane.b32.xlu1 %v652_v3, %s5619_s20  ;;  %v877_v3 = vld [vmem:[#allocation2] sm:$0xc0] }
 0x5e5   :  { %v734_v4 = vpop.permute.xlu0 %733 }
 0x5e6   :  { %4620 = vmatmul.mubr.msk.f32.vlgmr.msra.gmra.mrb[8].mxu0 %vm122_vm1, %v734_v4 }
 0x5e7   :  { %5023 = vmatpush3.bf16.msra.mxu0 %v5811_v23  ;;  %4641 = vmatprep.mubr.msk.f32.mxu0 %vm5617_vm0, %v5615_v0  ;;  %v654_v5 = vpop.permute.xlu1 %653 }
 0x5e8   :  { %5024 = vmatprep.subr.bf16.mxu0 %v5616_v1  ;;  %4609 = vmatmul.mubr.msk.f32.vlgmr.msra.gmra.mrb[4].mxu1 %vm122_vm1, %v654_v5 }
 0x5e9   :  { %5017 = vmatpush3.bf16.msra.mxu1 %v5799_v16  ;;  %4630 = vmatprep.mubr.msk.f32.mxu1 %vm5617_vm0, %v5615_v0 }
 0x5ea   :  { %5018 = vmatprep.subr.bf16.mxu1 %v5616_v1 }
 0x5eb   :  { %5026 = vmatpush3.bf16.msra.mxu0 %v5819_v27 }
 0x5ec   :  { %5033 = vmatprep.subr.bf16.mxu0 %v5616_v1 }
 0x5ed   :  { %5020 = vmatpush3.bf16.msra.mxu1 %v5808_v21 }
 0x5ee   :  { %5027 = vmatprep.subr.bf16.mxu1 %v5616_v1 }
 0x6b9   :  { %v803_v6 = vpop.f32.mrb[8].mxu0 }
 0x6ba   :  { %v808_v7 = vrot.slane %v803_v6, 6  ;;  %v4621_v8 = vpop.f32.mrb[9].mxu0 }
 0x6bb   :  { %v723_v11 = vpop.f32.mrb[4].mxu1 }
 0x6bc   :  { %v810_v10 = vadd.f32 %v808_v7, %v731_v9  ;;  %v728_v12 = vrot.slane %v723_v11, 4  ;;  %v4610_v14 = vpop.f32.mrb[5].mxu1 }
 0x6be   :  { %5267 = vtanh.f32 %v810_v10  ;;  %v730_v17 = vadd.f32 %v728_v12, %v651_v15  ;;  %v4307_v20 = vmul.f32 -1.442695, %v810_v10 }
 0x6c0   :  { %5269 = vtanh.f32 %v730_v17  ;;  %v4306_v22 = vmul.f32 -1.442695, %v730_v17 }
 0x6c1   :  { %5271 = vpow2.f32 %v4307_v20 }
 0x6c2   :  { %5273 = vpow2.f32 %v4306_v22 }
 0x6c8   :  { %v5268_v18 = vpop.eup %5267 }
 0x6c9   :  { %850 = vrot.lane.b32.xlu0 %v5268_v18, %s5618_s2 }
 0x6ca   :  { %v5270_v19 = vpop.eup %5269 }
 0x6cb   :  { %823 = vrot.lane.b32.xlu1 %v5270_v19, %s5618_s2  ;;  %v5272_v24 = vpop.eup %5271 }
 0x6cc   :  { %v5274_v25 = vpop.eup %5273  ;;  %v841_v26 = vadd.f32 1.0, %v5272_v24 }
 0x6cd   :  { %v814_v28 = vadd.f32 1.0, %v5274_v25 }
 0x6ce   :  { %5275 = vrcp.f32 %v841_v26 }
 0x6cf   :  { %5277 = vrcp.f32 %v814_v28 }
 0x6d8   :  { %v5276_v31 = vpop.eup %5275 }
 0x6d9   :  { %v5278_v35 = vpop.eup %5277  ;;  %v848_v39 = vmul.f32 %v5276_v31, %v846_v38 }
 0x6da   :  { %v821_v43 = vmul.f32 %v5278_v35, %v819_v40 }
 0x73b   :  { %v851_v33 = vpop.permute.xlu0 %850 }
 0x73c   :  { %v853_v34 = vmul.f32 %v5276_v31, %v851_v33 }
 0x73d   :  { %v824_v36 = vpop.permute.xlu1 %823 }
 0x73e   :  { %855 = vrot.lane.b32.xlu0 %v853_v34, %s5619_s20  ;;  %v826_v37 = vmul.f32 %v5278_v35, %v824_v36 }
 0x740   :  { %828 = vrot.lane.b32.xlu1 %v826_v37, %s5619_s20 }
 0x7b0   :  { %v856_v41 = vpop.permute.xlu0 %855 }
 0x7b1   :  { %v5926_v42 = vadd.f32 %v856_v41, %v848_v39 }
 0x7b2   :  { %v829_v44 = vpop.permute.xlu1 %828 }
 0x7b3   :  { %5279 = vtanh.f32 %v5926_v42  ;;  %v5929_v45 = vadd.f32 %v829_v44, %v821_v43  ;;  %v1069_v22 = vrot.slane %v5926_v42, 2 }
 0x7b5   :  { %5281 = vtanh.f32 %v5929_v45  ;;  %v1042_v28 = vrot.slane %v5929_v45, 6 }
 0x7bd   :  { %v5280_v46 = vpop.eup %5279 }
 0x7be   :  { %861 = vrot.lane.b32.xlu0 %v5280_v46, %s5618_s2 }
 0x7bf   :  { %v5282_v47 = vpop.eup %5281 }
 0x7c0   :  { %834 = vrot.lane.b32.xlu1 %v5282_v47, %s5618_s2  ;;  %v1177_v47 = vld [vmem:[#allocation2 + $0x8] sm:$0xc0] }
 0x830   :  { %v862_v48 = vpop.permute.xlu0 %861 }
 0x831   :  { %v5934_v49 = vmul.f32 %v5276_v31, %v862_v48 }
 0x832   :  { %v835_v51 = vpop.permute.xlu1 %834 }
 0x833   :  { %v958_v50 = vrot.slane %v5934_v49, 2  ;;  %v5937_v52 = vmul.f32 %v5278_v35, %v835_v51 }
 0x835   :  { %959 = vrot.lane.b32.xlu0 %v958_v50, %s5619_s20  ;;  %v878_v53 = vrot.slane %v5937_v52, 4  ;;  %v1100_v50 = vld [vmem:[#allocation2 + $0x10] sm:$0x3] }
 0x837   :  { %879 = vrot.lane.b32.xlu1 %v878_v53, %s5619_s20 }
 0x8a7   :  { %v960_v54 = vpop.permute.xlu0 %959 }
 0x8a8   :  { %4642 = vmatmul.mubr.msk.f32.vlgmr.msra.gmra.mrb[10].mxu0 %vm122_vm1, %v960_v54 }
 0x8a9   :  { %5035 = vmatpush3.bf16.msra.mxu0 %v5811_v23  ;;  %4663 = vmatprep.mubr.msk.f32.mxu0 %vm5617_vm0, %v5615_v0  ;;  %v880_v55 = vpop.permute.xlu1 %879 }
 0x8aa   :  { %5036 = vmatprep.subr.bf16.mxu0 %v5616_v1  ;;  %4631 = vmatmul.mubr.msk.f32.vlgmr.msra.gmra.mrb[6].mxu1 %vm122_vm1, %v880_v55 }
 0x8ab   :  { %5029 = vmatpush3.bf16.msra.mxu1 %v5799_v16  ;;  %4652 = vmatprep.mubr.msk.f32.mxu1 %vm5617_vm0, %v5615_v0 }
 0x8ac   :  { %5030 = vmatprep.subr.bf16.mxu1 %v5616_v1 }
 0x8ad   :  { %5038 = vmatpush3.bf16.msra.mxu0 %v5819_v27 }
 0x8ae   :  { %5045 = vmatprep.subr.bf16.mxu0 %v5616_v1 }
 0x8af   :  { %5032 = vmatpush3.bf16.msra.mxu1 %v5808_v21 }
 0x8b0   :  { %5039 = vmatprep.subr.bf16.mxu1 %v5616_v1 }
 0x97b   :  { %v1029_v57 = vpop.f32.mrb[10].mxu0 }
 0x97c   :  { %v1033_v58 = vadd.f32 %v1029_v57, %v957_v56  ;;  %v4643_v59 = vpop.f32.mrb[11].mxu0 }
 0x97d   :  { %v949_v60 = vpop.f32.mrb[6].mxu1 }
 0x97e   :  { %5283 = vtanh.f32 %v1033_v58  ;;  %v954_v62 = vrot.slane %v949_v60, 2  ;;  %v4632_v63 = vpop.f32.mrb[7].mxu1  ;;  %v4311_v7 = vmul.f32 -1.442695, %v1033_v58 }
 0x980   :  { %v956_v4 = vadd.f32 %v954_v62, %v877_v3 }
 0x982   :  { %5285 = vtanh.f32 %v956_v4  ;;  %v4310_v8 = vmul.f32 -1.442695, %v956_v4 }
 0x983   :  { %5287 = vpow2.f32 %v4311_v7 }
 0x984   :  { %5289 = vpow2.f32 %v4310_v8 }
 0x988   :  { %v5284_v5 = vpop.eup %5283 }
 0x989   :  { %1073 = vrot.lane.b32.xlu0 %v5284_v5, %s5618_s2 }
 0x98c   :  { %v5286_v6 = vpop.eup %5285 }
 0x98d   :  { %1046 = vrot.lane.b32.xlu1 %v5286_v6, %s5618_s2  ;;  %v5288_v9 = vpop.eup %5287 }
 0x98e   :  { %v1064_v10 = vadd.f32 1.0, %v5288_v9  ;;  %v5290_v11 = vpop.eup %5289 }
 0x98f   :  { %v1037_v12 = vadd.f32 1.0, %v5290_v11 }
 0x990   :  { %5291 = vrcp.f32 %v1064_v10 }
 0x991   :  { %5293 = vrcp.f32 %v1037_v12 }
 0x99a   :  { %v5292_v14 = vpop.eup %5291 }
 0x99b   :  { %v5294_v18 = vpop.eup %5293  ;;  %v1071_v24 = vmul.f32 %v5292_v14, %v1069_v22 }
 0x99c   :  { %v1044_v31 = vmul.f32 %v5294_v18, %v1042_v28 }
 0x9fb   :  { %v1074_v15 = vpop.permute.xlu0 %1073 }
 0x9fc   :  { %v1076_v17 = vmul.f32 %v5292_v14, %v1074_v15 }
 0x9fe   :  { %1078 = vrot.lane.b32.xlu0 %v1076_v17, %s5619_s20 }
 0x9ff   :  { %v1047_v19 = vpop.permute.xlu1 %1046 }
 0xa00   :  { %v1049_v20 = vmul.f32 %v5294_v18, %v1047_v19 }
 0xa02   :  { %1051 = vrot.lane.b32.xlu1 %v1049_v20, %s5619_s20 }
 0xa70   :  { %v1079_v25 = vpop.permute.xlu0 %1078 }
 0xa71   :  { %v5961_v26 = vadd.f32 %v1079_v25, %v1071_v24 }
 0xa73   :  { %5295 = vtanh.f32 %v5961_v26  ;;  %v1291_v9 = vrot.slane %v5961_v26, 2 }
 0xa74   :  { %v1052_v33 = vpop.permute.xlu1 %1051 }
 0xa75   :  { %v5965_v34 = vadd.f32 %v1052_v33, %v1044_v31 }
 0xa77   :  { %5297 = vtanh.f32 %v5965_v34 }
 0xa7d   :  { %v5296_v35 = vpop.eup %5295 }
 0xa7e   :  { %1084 = vrot.lane.b32.xlu0 %v5296_v35, %s5618_s2 }
 0xa81   :  { %v5298_v36 = vpop.eup %5297 }
 0xa82   :  { %1057 = vrot.lane.b32.xlu1 %v5298_v36, %s5618_s2 }
 0xaf0   :  { %v1085_v37 = vpop.permute.xlu0 %1084 }
 0xaf1   :  { %v5970_v38 = vmul.f32 %v5292_v14, %v1085_v37  ;;  %v1264_v14 = vrot.slane %v5965_v34, 6  ;;  %v1397_v37 = vld [vmem:[#allocation2 + $0x8] sm:$0x30] }
 0xaf3   :  { %1178 = vrot.lane.b32.xlu0 %v5970_v38, %s5619_s20 }
 0xaf4   :  { %v1058_v39 = vpop.permute.xlu1 %1057 }
 0xaf5   :  { %v5974_v40 = vmul.f32 %v5294_v18, %v1058_v39 }
 0xaf7   :  { %v1101_v41 = vrot.slane %v5974_v40, 6 }
 0xaf9   :  { %1102 = vrot.lane.b32.xlu1 %v1101_v41, %s5619_s20 }
 0xb65   :  { %v1179_v42 = vpop.permute.xlu0 %1178 }
 0xb66   :  { %4664 = vmatmul.mubr.msk.f32.vlgmr.msra.gmra.mrb[12].mxu0 %vm122_vm1, %v1179_v42 }
 0xb67   :  { %5047 = vmatpush3.bf16.msra.mxu0 %v5811_v23  ;;  %4685 = vmatprep.mubr.msk.f32.mxu0 %vm5617_vm0, %v5615_v0 }
 0xb68   :  { %5048 = vmatprep.subr.bf16.mxu0 %v5616_v1 }
 0xb6b   :  { %5050 = vmatpush3.bf16.msra.mxu0 %v5819_v27  ;;  %v1103_v43 = vpop.permute.xlu1 %1102 }
 0xb6c   :  { %5057 = vmatprep.subr.bf16.mxu0 %v5616_v1  ;;  %4653 = vmatmul.mubr.msk.f32.vlgmr.msra.gmra.mrb[8].mxu1 %vm122_vm1, %v1103_v43 }
 0xb6d   :  { %5041 = vmatpush3.bf16.msra.mxu1 %v5799_v16  ;;  %4674 = vmatprep.mubr.msk.f32.mxu1 %vm5617_vm0, %v5615_v0 }
 0xb6e   :  { %5042 = vmatprep.subr.bf16.mxu1 %v5616_v1 }
 0xb71   :  { %5044 = vmatpush3.bf16.msra.mxu1 %v5808_v21 }
 0xb72   :  { %5051 = vmatprep.subr.bf16.mxu1 %v5616_v1 }
 0xc39   :  { %v1248_v44 = vpop.f32.mrb[12].mxu0 }
 0xc3a   :  { %v1253_v45 = vrot.slane %v1248_v44, 2  ;;  %v4665_v46 = vpop.f32.mrb[13].mxu0  ;;  %v1320_v44 = vld [vmem:[#allocation2 + $0x10] sm:$0xc] }
 0xc3c   :  { %v1255_v48 = vadd.f32 %v1253_v45, %v1177_v47 }
 0xc3e   :  { %5299 = vtanh.f32 %v1255_v48  ;;  %v4315_v57 = vmul.f32 -1.442695, %v1255_v48 }
 0xc3f   :  { %v1172_v51 = vpop.f32.mrb[8].mxu1 }
 0xc40   :  { %v1176_v53 = vadd.f32 %v1172_v51, %v1100_v50  ;;  %v4654_v54 = vpop.f32.mrb[9].mxu1 }
 0xc42   :  { %5301 = vtanh.f32 %v1176_v53  ;;  %v4314_v58 = vmul.f32 -1.442695, %v1176_v53 }
 0xc43   :  { %5303 = vpow2.f32 %v4315_v57 }
 0xc44   :  { %5305 = vpow2.f32 %v4314_v58 }
 0xc48   :  { %v5300_v55 = vpop.eup %5299 }
 0xc49   :  { %1295 = vrot.lane.b32.xlu0 %v5300_v55, %s5618_s2 }
 0xc4c   :  { %v5302_v56 = vpop.eup %5301 }
 0xc4d   :  { %1268 = vrot.lane.b32.xlu1 %v5302_v56, %s5618_s2  ;;  %v5304_v59 = vpop.eup %5303 }
 0xc4e   :  { %v1286_v60 = vadd.f32 1.0, %v5304_v59  ;;  %v5306_v62 = vpop.eup %5305 }
 0xc4f   :  { %v1259_v63 = vadd.f32 1.0, %v5306_v62 }
 0xc50   :  { %5307 = vrcp.f32 %v1286_v60 }
 0xc51   :  { %5309 = vrcp.f32 %v1259_v63 }
 0xc5a   :  { %v5308_v3 = vpop.eup %5307 }
 0xc5b   :  { %v5310_v6 = vpop.eup %5309  ;;  %v1293_v10 = vmul.f32 %v5308_v3, %v1291_v9 }
 0xc5c   :  { %v1266_v15 = vmul.f32 %v5310_v6, %v1264_v14 }
 0xcbb   :  { %v1296_v4 = vpop.permute.xlu0 %1295 }
 0xcbc   :  { %v1298_v5 = vmul.f32 %v5308_v3, %v1296_v4 }
 0xcbe   :  { %1300 = vrot.lane.b32.xlu0 %v1298_v5, %s5619_s20 }
 0xcbf   :  { %v1269_v7 = vpop.permute.xlu1 %1268 }
 0xcc0   :  { %v1271_v8 = vmul.f32 %v5310_v6, %v1269_v7 }
 0xcc2   :  { %1273 = vrot.lane.b32.xlu1 %v1271_v8, %s5619_s20 }
 0xd30   :  { %v1301_v11 = vpop.permute.xlu0 %1300 }
 0xd31   :  { %v5997_v12 = vadd.f32 %v1301_v11, %v1293_v10 }
 0xd33   :  { %5311 = vtanh.f32 %v5997_v12  ;;  %v1512_v63 = vrot.slane %v5997_v12, 2 }
 0xd34   :  { %v1274_v17 = vpop.permute.xlu1 %1273 }
 0xd35   :  { %v6001_v18 = vadd.f32 %v1274_v17, %v1266_v15 }
 0xd37   :  { %5313 = vtanh.f32 %v6001_v18  ;;  %v1485_v4 = vrot.slane %v6001_v18, 6 }
 0xd3d   :  { %v5312_v19 = vpop.eup %5311 }
 0xd3e   :  { %1306 = vrot.lane.b32.xlu0 %v5312_v19, %s5618_s2 }
 0xd41   :  { %v5314_v20 = vpop.eup %5313 }
 0xd42   :  { %1279 = vrot.lane.b32.xlu1 %v5314_v20, %s5618_s2 }
 0xdb0   :  { %v1307_v22 = vpop.permute.xlu0 %1306 }
 0xdb1   :  { %v6006_v24 = vmul.f32 %v5308_v3, %v1307_v22 }
 0xdb3   :  { %v1398_v25 = vrot.slane %v6006_v24, 6 }
 0xdb4   :  { %v1280_v26 = vpop.permute.xlu1 %1279 }
 0xdb5   :  { %1399 = vrot.lane.b32.xlu0 %v1398_v25, %s5619_s20  ;;  %v1282_v28 = vmul.f32 %v5310_v6, %v1280_v26 }
 0xdb7   :  { %1311 = vrot.lane.b32.xlu1 %v1282_v28, %s5619_s20  ;;  %v1621_v28 = vld [vmem:[#allocation2 + $0x8] sm:$0xc] }
 0xe27   :  { %v1400_v31 = vpop.permute.xlu0 %1399 }
 0xe28   :  { %4686 = vmatmul.mubr.msk.f32.vlgmr.msra.gmra.mrb[14].mxu0 %vm122_vm1, %v1400_v31 }
 0xe29   :  { %5059 = vmatpush3.bf16.msra.mxu0 %v5811_v23  ;;  %4707 = vmatprep.mubr.msk.f32.mxu0 %vm5617_vm0, %v5615_v0  ;;  %v6015_v33 = vpop.permute.xlu1 %1311 }
 0xe2a   :  { %5060 = vmatprep.subr.bf16.mxu0 %v5616_v1  ;;  %4675 = vmatmul.mubr.msk.f32.vlgmr.msra.gmra.mrb[10].mxu1 %vm122_vm1, %v6015_v33 }
 0xe2b   :  { %5053 = vmatpush3.bf16.msra.mxu1 %v5799_v16  ;;  %4696 = vmatprep.mubr.msk.f32.mxu1 %vm5617_vm0, %v5615_v0 }
 0xe2c   :  { %5054 = vmatprep.subr.bf16.mxu1 %v5616_v1 }
 0xe2d   :  { %5062 = vmatpush3.bf16.msra.mxu0 %v5819_v27 }
 0xe2e   :  { %5069 = vmatprep.subr.bf16.mxu0 %v5616_v1 }
 0xe2f   :  { %5056 = vmatpush3.bf16.msra.mxu1 %v5808_v21 }
 0xe30   :  { %5063 = vmatprep.subr.bf16.mxu1 %v5616_v1 }
 0xefb   :  { %v1469_v34 = vpop.f32.mrb[14].mxu0 }
 0xefc   :  { %v1474_v35 = vrot.slane %v1469_v34, 4  ;;  %v4687_v36 = vpop.f32.mrb[15].mxu0 }
 0xefd   :  { %v1389_v41 = vpop.f32.mrb[10].mxu1 }
 0xefe   :  { %v1476_v39 = vadd.f32 %v1474_v35, %v1397_v37  ;;  %v1394_v42 = vrot.slane %v1389_v41, 6  ;;  %v4676_v43 = vpop.f32.mrb[11].mxu1 }
 0xf00   :  { %5315 = vtanh.f32 %v1476_v39  ;;  %v1396_v45 = vadd.f32 %v1394_v42, %v1320_v44  ;;  %v4319_v48 = vmul.f32 -1.442695, %v1476_v39 }
 0xf02   :  { %5317 = vtanh.f32 %v1396_v45  ;;  %v4318_v50 = vmul.f32 -1.442695, %v1396_v45 }
 0xf03   :  { %5319 = vpow2.f32 %v4319_v48 }
 0xf04   :  { %5321 = vpow2.f32 %v4318_v50 }
 0xf0a   :  { %v5316_v46 = vpop.eup %5315 }
 0xf0b   :  { %1516 = vrot.lane.b32.xlu0 %v5316_v46, %s5618_s2 }
 0xf0c   :  { %v5318_v47 = vpop.eup %5317 }
 0xf0d   :  { %1489 = vrot.lane.b32.xlu1 %v5318_v47, %s5618_s2  ;;  %v5320_v51 = vpop.eup %5319 }
 0xf0e   :  { %v5322_v53 = vpop.eup %5321  ;;  %v1507_v54 = vadd.f32 1.0, %v5320_v51 }
 0xf0f   :  { %v1480_v55 = vadd.f32 1.0, %v5322_v53 }
 0xf10   :  { %5323 = vrcp.f32 %v1507_v54 }
 0xf11   :  { %5325 = vrcp.f32 %v1480_v55 }
 0xf1a   :  { %v5324_v56 = vpop.eup %5323 }
 0xf1b   :  { %v5326_v59 = vpop.eup %5325  ;;  %v1514_v3 = vmul.f32 %v5324_v56, %v1512_v63 }
 0xf1c   :  { %v1487_v7 = vmul.f32 %v5326_v59, %v1485_v4 }
 0xf7d   :  { %v1517_v57 = vpop.permute.xlu0 %1516 }
 0xf7e   :  { %v1519_v58 = vmul.f32 %v5324_v56, %v1517_v57 }
 0xf7f   :  { %v1490_v60 = vpop.permute.xlu1 %1489 }
 0xf80   :  { %1521 = vrot.lane.b32.xlu0 %v1519_v58, %s5619_s20  ;;  %v1492_v62 = vmul.f32 %v5326_v59, %v1490_v60 }
 0xf82   :  { %1494 = vrot.lane.b32.xlu1 %v1492_v62, %s5619_s20 }
 0xff2   :  { %v1522_v5 = vpop.permute.xlu0 %1521 }
 0xff3   :  { %v6034_v6 = vadd.f32 %v1522_v5, %v1514_v3 }
 0xff4   :  { %v1495_v8 = vpop.permute.xlu1 %1494 }
 0xff5   :  { %5327 = vtanh.f32 %v6034_v6  ;;  %v6037_v9 = vadd.f32 %v1495_v8, %v1487_v7  ;;  %v1736_v54 = vrot.slane %v6034_v6, 2 }
 0xff7   :  { %5329 = vtanh.f32 %v6037_v9 }
 0xfff   :  { %v5328_v10 = vpop.eup %5327 }
0x1000   :  { %1527 = vrot.lane.b32.xlu0 %v5328_v10, %s5618_s2 }
0x1001   :  { %v5330_v11 = vpop.eup %5329 }
0x1002   :  { %1500 = vrot.lane.b32.xlu1 %v5330_v11, %s5618_s2 }
0x1072   :  { %v1528_v12 = vpop.permute.xlu0 %1527 }
0x1073   :  { %v6042_v14 = vmul.f32 %v5324_v56, %v1528_v12  ;;  %v1709_v56 = vrot.slane %v6037_v9, 6  ;;  %v1845_v12 = vld [vmem:[#allocation2 + $0x8] sm:$0x3] }
0x1074   :  { %v1501_v17 = vpop.permute.xlu1 %1500 }
0x1075   :  { %v1622_v15 = vrot.slane %v6042_v14, 4  ;;  %v6045_v18 = vmul.f32 %v5326_v59, %v1501_v17 }
0x1077   :  { %1623 = vrot.lane.b32.xlu0 %v1622_v15, %s5619_s20  ;;  %v1542_v19 = vrot.slane %v6045_v18, 2 }
0x1079   :  { %1543 = vrot.lane.b32.xlu1 %v1542_v19, %s5619_s20 }
0x10e9   :  { %v1624_v20 = vpop.permute.xlu0 %1623 }
0x10ea   :  { %4708 = vmatmul.mubr.msk.f32.vlgmr.msra.gmra.mrb[16].mxu0 %vm122_vm1, %v1624_v20 }
0x10eb   :  { %5071 = vmatpush3.bf16.msra.mxu0 %v5811_v23  ;;  %4729 = vmatprep.mubr.msk.f32.mxu0 %vm5617_vm0, %v5615_v0  ;;  %v1544_v22 = vpop.permute.xlu1 %1543 }
0x10ec   :  { %5072 = vmatprep.subr.bf16.mxu0 %v5616_v1  ;;  %4697 = vmatmul.mubr.msk.f32.vlgmr.msra.gmra.mrb[12].mxu1 %vm122_vm1, %v1544_v22 }
0x10ed   :  { %5065 = vmatpush3.bf16.msra.mxu1 %v5799_v16  ;;  %4718 = vmatprep.mubr.msk.f32.mxu1 %vm5617_vm0, %v5615_v0  ;;  %v1541_v16 = vld [vmem:[#allocation2 + $0x10] sm:$0x30] }
0x10ee   :  { %5066 = vmatprep.subr.bf16.mxu1 %v5616_v1 }
0x10ef   :  { %5074 = vmatpush3.bf16.msra.mxu0 %v5819_v27 }
0x10f0   :  { %5091 = vmatprep.subr.bf16.mxu0 %v5616_v1 }
0x10f1   :  { %5068 = vmatpush3.bf16.msra.mxu1 %v5808_v21 }
0x11bd   :  { %v1693_v23 = vpop.f32.mrb[16].mxu0 }
0x11be   :  { %v1698_v25 = vrot.slane %v1693_v23, 6  ;;  %v4709_v26 = vpop.f32.mrb[17].mxu0 }
0x11bf   :  { %v1613_v34 = vpop.f32.mrb[12].mxu1 }
0x11c0   :  { %v1700_v31 = vadd.f32 %v1698_v25, %v1621_v28  ;;  %v1618_v35 = vrot.slane %v1613_v34, 4  ;;  %v4698_v36 = vpop.f32.mrb[13].mxu1  ;;  %v1765_v25 = vld [vmem:[#allocation2 + $0x10] sm:$0xc0] }
0x11c2   :  { %5331 = vtanh.f32 %v1700_v31  ;;  %v1620_v37 = vadd.f32 %v1618_v35, %v1541_v16  ;;  %v4323_v41 = vmul.f32 -1.442695, %v1700_v31 }
0x11c4   :  { %5333 = vtanh.f32 %v1620_v37  ;;  %v4322_v21 = vmul.f32 -1.442695, %v1620_v37 }
0x11c5   :  { %5335 = vpow2.f32 %v4323_v41 }
0x11c6   :  { %5337 = vpow2.f32 %v4322_v21 }
0x11cc   :  { %v5332_v39 = vpop.eup %5331 }
0x11cd   :  { %1740 = vrot.lane.b32.xlu0 %v5332_v39, %s5618_s2 }
0x11ce   :  { %v5334_v27 = vpop.eup %5333 }
0x11cf   :  { %1713 = vrot.lane.b32.xlu1 %v5334_v27, %s5618_s2  ;;  %v5336_v42 = vpop.eup %5335 }
0x11d0   :  { %v5338_v43 = vpop.eup %5337  ;;  %v1731_v44 = vadd.f32 1.0, %v5336_v42 }
0x11d1   :  { %v1704_v45 = vadd.f32 1.0, %v5338_v43 }
0x11d2   :  { %5339 = vrcp.f32 %v1731_v44 }
0x11d3   :  { %5341 = vrcp.f32 %v1704_v45 }
0x11dc   :  { %v5340_v46 = vpop.eup %5339 }
0x11dd   :  { %v5342_v50 = vpop.eup %5341  ;;  %v1738_v55 = vmul.f32 %v5340_v46, %v1736_v54 }
0x11de   :  { %v1711_v59 = vmul.f32 %v5342_v50, %v1709_v56 }
0x123f   :  { %v1741_v47 = vpop.permute.xlu0 %1740 }
0x1240   :  { %v1743_v48 = vmul.f32 %v5340_v46, %v1741_v47 }
0x1241   :  { %v1714_v51 = vpop.permute.xlu1 %1713 }
0x1242   :  { %1745 = vrot.lane.b32.xlu0 %v1743_v48, %s5619_s20  ;;  %v1716_v53 = vmul.f32 %v5342_v50, %v1714_v51 }
0x1244   :  { %1718 = vrot.lane.b32.xlu1 %v1716_v53, %s5619_s20 }
0x12b4   :  { %v1746_v57 = vpop.permute.xlu0 %1745 }
0x12b5   :  { %v1748_v58 = vadd.f32 %v1746_v57, %v1738_v55  ;;  %v1995_v57 = vld [vmem:[%s6649_s5 + $0x38] sm:$0xff] }
0x12b6   :  { %v1719_v60 = vpop.permute.xlu1 %1718 }
0x12b7   :  { %5343 = vtanh.f32 %v1748_v58  ;;  %v1721_v62 = vadd.f32 %v1719_v60, %v1711_v59  ;;  %v1957_v45 = vrot.slane %v1748_v58, 2  ;;  %v1992_v60 = vld [vmem:[%s6649_s5 + $0x20] sm:$0xff] }
0x12b9   :  { %5345 = vtanh.f32 %v1721_v62 }
0x12c1   :  { %v5344_v63 = vpop.eup %5343 }
0x12c2   :  { %1751 = vrot.lane.b32.xlu0 %v5344_v63, %s5618_s2 }
0x12c3   :  { %v5346_v3 = vpop.eup %5345 }
0x12c4   :  { %1724 = vrot.lane.b32.xlu1 %v5346_v3, %s5618_s2  ;;  %v1997_v3 = vld [vmem:[%s6649_s5 + $0x48] sm:$0xff] }
0x1334   :  { %v1752_v4 = vpop.permute.xlu0 %1751 }
0x1335   :  { %v6071_v5 = vmul.f32 %v5340_v46, %v1752_v4 }
0x1336   :  { %v1725_v7 = vpop.permute.xlu1 %1724 }
0x1337   :  { %v1846_v6 = vrot.slane %v6071_v5, 2  ;;  %v6074_v8 = vmul.f32 %v5342_v50, %v1725_v7  ;;  %v1930_v50 = vrot.slane %v1721_v62, 6  ;;  %v1994_v62 = vld [vmem:[%s6649_s5 + $0x30] sm:$0xff] }
0x1338   :  { %v5081_v63 = vpack.c.bf16 %v1994_v62, %v1992_v60 }
0x1339   :  { %1847 = vrot.lane.b32.xlu0 %v1846_v6, %s5619_s20  ;;  %v1766_v9 = vrot.slane %v6074_v8, 4  ;;  %v2003_v6 = vld [vmem:[%s6649_s5 + $0x78] sm:$0xff] }
0x133b   :  { %1767 = vrot.lane.b32.xlu1 %v1766_v9, %s5619_s20  ;;  %v2000_v9 = vld [vmem:[%s6649_s5 + $0x60] sm:$0xff] }
0x13ab   :  { %v1848_v10 = vpop.permute.xlu0 %1847 }
0x13ac   :  { %4730 = vmatmul.mubr.msk.f32.vlgmr.msra.gmra.mrb[18].mxu0 %vm122_vm1, %v1848_v10  ;;  %v2002_v10 = vld [vmem:[%s6649_s5 + $0x70] sm:$0xff] }
0x13ad   :  { %4740 = vmatprep.mubr.msk.f32.mxu0 %vm5617_vm0, %v5615_v0  ;;  %v1768_v11 = vpop.permute.xlu1 %1767 }
0x13ae   :  { %4719 = vmatmul.mubr.msk.f32.vlgmr.msra.gmra.mrb[14].mxu1 %vm122_vm1, %v1768_v11  ;;  %v2104_v11 = vld [vmem:[#allocation9] sm:$0xff] }
0x13af   :  { %2087 = vmatprep.mubr.f32.mxu1 %v5615_v0 }
0x147f   :  { %v1917_v15 = vpop.f32.mrb[18].mxu0 }
0x1480   :  { %v1921_v17 = vadd.f32 %v1917_v15, %v1845_v12  ;;  %v4731_v19 = vpop.f32.mrb[19].mxu0  ;;  %v5089_v12 = vpack.c.bf16 %v2002_v10, %v2000_v9  ;;  %v2105_v15 = vld [vmem:[#allocation9 + $0x8] sm:$0xff] }
0x1481   :  { %v1837_v20 = vpop.f32.mrb[14].mxu1  ;;  %v2106_v19 = vld [vmem:[#allocation9 + $0x10] sm:$0xff] }
0x1482   :  { %5347 = vtanh.f32 %v1921_v17  ;;  %v1842_v22 = vrot.slane %v1837_v20, 2  ;;  %v4720_v23 = vpop.f32.mrb[15].mxu1  ;;  %v4327_v34 = vmul.f32 -1.442695, %v1921_v17  ;;  %v6168_v17 = vpack.c.bf16 %v2105_v15, %v2104_v11  ;;  %v2107_v20 = vld [vmem:[#allocation9 + $0x18] sm:$0xff] }
0x1484   :  { %v1844_v26 = vadd.f32 %v1842_v22, %v1765_v25  ;;  %5093 = vmatpush3.bf16.msra.mxu0 %v6168_v17  ;;  %v6173_v22 = vpack.c.bf16 %v2107_v20, %v2106_v19 }
0x1485   :  { %5094 = vmatprep.subr.bf16.mxu0 %v5616_v1 }
0x1486   :  { %5349 = vtanh.f32 %v1844_v26  ;;  %v4326_v35 = vmul.f32 -1.442695, %v1844_v26  ;;  %v2108_v26 = vld [vmem:[#allocation10] sm:$0xff] }
0x1487   :  { %5351 = vpow2.f32 %v4327_v34  ;;  %v2110_v34 = vld [vmem:[#allocation10 + $0x10] sm:$0xff] }
0x1488   :  { %5353 = vpow2.f32 %v4326_v35  ;;  %5096 = vmatpush3.bf16.msra.mxu0 %v6173_v22  ;;  %v2111_v35 = vld [vmem:[#allocation10 + $0x18] sm:$0xff] }
0x1489   :  { %5097 = vmatprep.subr.bf16.mxu0 %v5616_v1 }
0x148b   :  { %4741 = vmatmul.mubr.f32.vlgmr.msra.gmra.mrb[20].mxu0 %v5615_v0 }
0x148c   :  { %v5348_v28 = vpop.eup %5347  ;;  %4751 = vmatprep.mubr.msk.f32.mxu0 %vm5617_vm0, %v5615_v0 }
0x148d   :  { %1961 = vrot.lane.b32.xlu0 %v5348_v28, %s5618_s2  ;;  %v2109_v28 = vld [vmem:[#allocation10 + $0x8] sm:$0xff] }
0x1490   :  { %v5350_v31 = vpop.eup %5349 }
0x1491   :  { %1934 = vrot.lane.b32.xlu1 %v5350_v31, %s5618_s2  ;;  %v5352_v36 = vpop.eup %5351  ;;  %v6179_v31 = vpack.c.bf16 %v2109_v28, %v2108_v26 }
0x1492   :  { %v1952_v16 = vadd.f32 1.0, %v5352_v36  ;;  %v5354_v37 = vpop.eup %5353 }
0x1493   :  { %v1925_v39 = vadd.f32 1.0, %v5354_v37  ;;  %5099 = vmatpush3.bf16.msra.mxu0 %v6179_v31 }
0x1494   :  { %5355 = vrcp.f32 %v1952_v16  ;;  %5100 = vmatprep.subr.bf16.mxu0 %v5616_v1 }
0x1495   :  { %5357 = vrcp.f32 %v1925_v39  ;;  %v6185_v39 = vpack.c.bf16 %v2111_v35, %v2110_v34 }
0x1497   :  { %5102 = vmatpush3.bf16.msra.mxu0 %v6185_v39 }
0x1498   :  { %5109 = vmatprep.subr.bf16.mxu0 %v5616_v1 }
0x149a   :  { %4752 = vmatmul.mubr.f32.vlgmr.msra.gmra.mrb[22].mxu0 %v5615_v0 }
0x149b   :  { %5111 = vmatpush3.bf16.msra.mxu0 %v6179_v31  ;;  %4773 = vmatprep.mubr.msk.f32.mxu0 %vm5617_vm0, %v5615_v0 }
0x149c   :  { %5112 = vmatprep.subr.bf16.mxu0 %v5616_v1 }
0x149e   :  { %v6086_v27 = vpop.eup %5355 }
0x149f   :  { %v6090_v42 = vpop.eup %5357  ;;  %v1959_v46 = vmul.f32 %v6086_v27, %v1957_v45  ;;  %5114 = vmatpush3.bf16.msra.mxu0 %v6185_v39 }
0x14a0   :  { %v1932_v51 = vmul.f32 %v6090_v42, %v1930_v50  ;;  %5121 = vmatprep.subr.bf16.mxu0 %v5616_v1 }
0x14ff   :  { %v1962_v41 = vpop.permute.xlu0 %1961 }
0x1500   :  { %v1964_v21 = vmul.f32 %v6086_v27, %v1962_v41 }
0x1502   :  { %1966 = vrot.lane.b32.xlu0 %v1964_v21, %s5619_s20 }
0x1503   :  { %v1935_v43 = vpop.permute.xlu1 %1934 }
0x1504   :  { %v1937_v44 = vmul.f32 %v6090_v42, %v1935_v43 }
0x1506   :  { %1939 = vrot.lane.b32.xlu1 %v1937_v44, %s5619_s20 }
0x1574   :  { %v1967_v47 = vpop.permute.xlu0 %1966 }
0x1575   :  { %v1969_v48 = vadd.f32 %v1967_v47, %v1959_v46 }
0x1577   :  { %5359 = vtanh.f32 %v1969_v48 }
0x1578   :  { %v1940_v53 = vpop.permute.xlu1 %1939 }
0x1579   :  { %v1942_v54 = vadd.f32 %v1940_v53, %v1932_v51 }
0x157b   :  { %5361 = vtanh.f32 %v1942_v54  ;;  %v2179_v54 = vpop.f32.mrb[20].mxu0 }
0x1581   :  { %v5360_v55 = vpop.eup %5359 }
0x1582   :  { %1972 = vrot.lane.b32.xlu0 %v5360_v55, %s5618_s2  ;;  %v4742_v55 = vpop.f32.mrb[21].mxu0 }
0x1585   :  { %v5362_v56 = vpop.eup %5361 }
0x1586   :  { %640 = vrot.lane.b32.xlu0 %v5901_v2, %s5619_s20  ;;  %1945 = vrot.lane.b32.xlu1 %v5362_v56, %s5618_s2  ;;  %v1989_v2 = vld [vmem:[%s6649_s5 + $0x8] sm:$0xff]  ;;  %v2251_v56 = vpop.f32.mrb[22].mxu0 }
0x158a   :  { %1089 = vrot.lane.b32.xlu0 %v5974_v40, %s5619_s20  ;;  %866 = vrot.lane.b32.xlu1 %v5937_v52, %s5619_s20  ;;  %v1991_v40 = vld [vmem:[%s6649_s5 + $0x18] sm:$0xff]  ;;  %v1988_v52 = vld [vmem:[%s6649_s5] sm:$0xff] }
0x158e   :  { %1537 = vrot.lane.b32.xlu0 %v6042_v14, %s5618_s2  ;;  %1316 = vrot.lane.b32.xlu1 %v6006_v24, %s5618_s2  ;;  %v5075_v14 = vpack.c.bf16 %v1991_v40, %v1989_v2  ;;  %v1993_v24 = vld [vmem:[%s6649_s5 + $0x28] sm:$0xff]  ;;  %v4753_v2 = vpop.f32.mrb[23].mxu0  ;;  %v2004_v40 = vld [vmem:[%s6650_s6] sm:$0x3] }
0x158f   :  { %v5079_v59 = vpack.c.bf16 %v1995_v57, %v1993_v24 }
0x1590   :  { %5076 = vmatprep.subr.bf16.mxu1 %v5075_v14  ;;  %v2013_v14 = vrot.slane %v2004_v40, %v118_v32 }
0x1592   :  { %646 = vrot.lane.b32.xlu0 %v5898_v61, %s5618_s2  ;;  %1761 = vrot.lane.b32.xlu1 %v6071_v5, %s5618_s2  ;;  %v1990_v61 = vld [vmem:[%s6649_s5 + $0x10] sm:$0xff] }
0x1593   :  { %v5077_v58 = vpack.c.bf16 %v1990_v61, %v1988_v52  ;;  %v2009_v52 = vrot.slane %v2004_v40, %v114_v30 }
0x1595   :  { %5078 = vmatpush1.bf16.msra.mxu1 %v5077_v58 }
0x1596   :  { %1095 = vrot.lane.b32.xlu0 %v5970_v38, %s5618_s2  ;;  %423 = vrot.lane.b32.xlu1 %v5864_v13, %s5618_s2  ;;  %v1999_v38 = vld [vmem:[%s6649_s5 + $0x58] sm:$0xff]  ;;  %v1996_v13 = vld [vmem:[%s6649_s5 + $0x40] sm:$0xff] }
0x1597   :  { %5080 = vmatprep.subr.bf16.mxu1 %v5079_v59  ;;  %v5083_v4 = vpack.c.bf16 %v1999_v38, %v1997_v3 }
0x1599   :  { %5082 = vmatpush1.bf16.msra.mxu1 %v5081_v63 }
0x159a   :  { %872 = vrot.lane.b32.xlu1 %v5934_v49, %s5618_s2  ;;  %v1998_v49 = vld [vmem:[%s6649_s5 + $0x50] sm:$0xff]  ;;  %5084 = vmatprep.subr.bf16.mxu1 %v5083_v4  ;;  %v2256_v4 = vrot.slane %v2251_v56, 2 }
0x159b   :  { %v5085_v5 = vpack.c.bf16 %v1998_v49, %v1996_v13 }
0x159d   :  { %5086 = vmatpush1.bf16.msra.mxu1 %v5085_v5 }
0x159e   :  { %1532 = vrot.lane.b32.xlu1 %v6045_v18, %s5619_s20  ;;  %v2001_v18 = vld [vmem:[%s6649_s5 + $0x68] sm:$0xff] }
0x159f   :  { %v5087_v7 = vpack.c.bf16 %v2003_v6, %v2001_v18 }
0x15a1   :  { %5088 = vmatprep.subr.bf16.mxu1 %v5087_v7 }
0x15a2   :  { %5090 = vmatpush1.bf16.msra.mxu1 %v5089_v12 }
0x15a3   :  { %5103 = vmatprep.subr.bf16.mxu1 %v5616_v1 }
0x15f4   :  { %v1973_v23 = vpop.permute.xlu0 %1972 }
0x15f5   :  { %v1975_v25 = vmul.f32 %v6086_v27, %v1973_v23 }
0x15f7   :  { %1982 = vrot.lane.b32.xlu0 %v1975_v25, %s5618_s2 }
0x15f8   :  { %v641_v36 = vpop.permute.xlu0 %640  ;;  %v1946_v16 = vpop.permute.xlu1 %1945 }
0x15f9   :  { %644 = vst.msk [vmem:[#allocation3] sm:$0xc] %vm643_vm3, %v641_v36  ;;  %v1948_v37 = vmul.f32 %v6090_v42, %v1946_v16 }
0x15fb   :  { %1756 = vrot.lane.b32.xlu0 %v6074_v8, %s5619_s20  ;;  %1977 = vrot.lane.b32.xlu1 %v1948_v37, %s5619_s20 }
0x15fc   :  { %v1090_v27 = vpop.permute.xlu0 %1089  ;;  %v867_v41 = vpop.permute.xlu1 %866 }
0x15fd   :  { %1093 = vst.msk [vmem:[#allocation3] sm:$0xc0] %vm1092_vm4, %v1090_v27 }
0x15fe   :  { %870 = vst.msk [vmem:[#allocation3] sm:$0x30] %vm869_vm5, %v867_v41 }
0x1600   :  { %v1538_v21 = vpop.permute.xlu0 %1537  ;;  %v1317_v8 = vpop.permute.xlu1 %1316 }
0x1601   :  { %1540 = vst.msk [vmem:[#allocation3] sm:$0x30] %vm649_vm6, %v1538_v21 }
0x1602   :  { %1319 = vst.msk [vmem:[#allocation3] sm:$0xc0] %vm426_vm7, %v1317_v8 }
0x1604   :  { %v647_v42 = vpop.permute.xlu0 %646  ;;  %v1762_v43 = vpop.permute.xlu1 %1761 }
0x1605   :  { %650 = vst.msk [vmem:[#allocation3 + $0x8] sm:$0x30] %vm649_vm6, %v647_v42 }
0x1606   :  { %1764 = vst.msk [vmem:[#allocation3] sm:$0xc] %vm875_vm8, %v1762_v43 }
0x1608   :  { %v1096_v44 = vpop.permute.xlu0 %1095  ;;  %v424_v45 = vpop.permute.xlu1 %423 }
0x1609   :  { %1099 = vst.msk [vmem:[#allocation3 + $0x8] sm:$0x3] %vm1098_vm9, %v1096_v44 }
0x160a   :  { %1314 = vst.msk [vmem:[#allocation3 + $0x8] sm:$0x3] %vm420_vm2, %v6015_v33 }
0x160b   :  { %427 = vst.msk [vmem:[#allocation3 + $0x8] sm:$0xc0] %vm426_vm7, %v424_v45 }
0x160c   :  { %v873_v46 = vpop.permute.xlu1 %872 }
0x160d   :  { %876 = vst.msk [vmem:[#allocation3 + $0x8] sm:$0xc] %vm875_vm8, %v873_v46 }
0x1610   :  { %v1533_v47 = vpop.permute.xlu1 %1532 }
0x1611   :  { %1535 = vst.msk [vmem:[#allocation3 + $0x8] sm:$0xc] %vm643_vm3, %v1533_v47 }
0x1669   :  { %v1983_v48 = vpop.permute.xlu0 %1982 }
0x166a   :  { %1985 = vst.msk [vmem:[#allocation3] sm:$0x3] %vm1098_vm9, %v1983_v48 }
0x166d   :  { %v1757_v50 = vpop.permute.xlu0 %1756  ;;  %v1978_v51 = vpop.permute.xlu1 %1977 }
0x166e   :  { %1759 = vst.msk [vmem:[#allocation3 + $0x8] sm:$0x30] %vm869_vm5, %v1757_v50 }
0x166f   :  { %1980 = vst.msk [vmem:[#allocation3 + $0x8] sm:$0xc0] %vm1092_vm4, %v1978_v51 }
0x1671   :  { %v1986_v53 = vld [vmem:[#allocation3] sm:$0xff] }
0x1672   :  { %4328 = vmatmul.mubr.msk.f32.vlgmr.msra.gmra.mrb[16].mxu1 %vm2016_vm10, %v1986_v53 }
0x1673   :  { %2093 = vmatprep.mubr.f32.mxu1 %v5615_v0  ;;  %5105 = vmatpush3.bf16.msra.mxu1 %v6168_v17 }
0x1674   :  { %5106 = vmatprep.subr.bf16.mxu1 %v5616_v1 }
0x1676   :  { %v1987_v33 = vld [vmem:[#allocation3 + $0x8] sm:$0xff] }
0x1677   :  { %4329 = vmatmul.mubr.msk.f32.gmra.mrb[18].mxu1 %vm2016_vm10, %v1987_v33 }
0x1678   :  { %5108 = vmatpush3.bf16.msra.mxu1 %v6173_v22  ;;  %4762 = vmatprep.mubr.msk.f32.mxu1 %vm5617_vm0, %v5615_v0 }
0x1679   :  { %5115 = vmatprep.subr.bf16.mxu1 %v5616_v1 }
0x1745   :  { %v2089_v61 = vpop.f32.mrb[16].mxu1 }
0x1746   :  { %v2090_v24 = vadd.f32 %v2089_v61, %v2009_v52  ;;  %v2091_v57 = vpop.f32.mrb[17].mxu1 }
0x1747   :  { %v2092_v58 = vadd.f32 %v2091_v57, %v2013_v14 }
0x1748   :  { %2100 = vst [vmem:[#allocation2] sm:$0xff] %v2090_v24 }
0x1749   :  { %2101 = vst [vmem:[#allocation2 + $0x8] sm:$0xff] %v2092_v58 }
0x174a   :  { %v2095_v59 = vpop.f32.mrb[18].mxu1 }
0x174b   :  { %v2096_v60 = vadd.f32 %v2095_v59, %v2009_v52  ;;  %v2097_v62 = vpop.f32.mrb[19].mxu1 }
0x174c   :  { %v2098_v63 = vadd.f32 %v2097_v62, %v2013_v14 }
0x174d   :  { %2102 = vst [vmem:[#allocation2 + $0x10] sm:$0xff] %v2096_v60 }
0x174e   :  { %2103 = vst [vmem:[#allocation2 + $0x18] sm:$0xff] %v2098_v63 }
0x174f   :  { %v2112_v3 = vld [vmem:[#allocation2] sm:$0x3]  ;;  %v2309_v47 = vld [vmem:[#allocation2] sm:$0xc] }
0x1750   :  { %v2183_v38 = vadd.f32 %v2179_v54, %v2112_v3 }
0x1752   :  { %5363 = vtanh.f32 %v2183_v38  ;;  %v4330_v49 = vmul.f32 -1.442695, %v2183_v38 }
0x1755   :  { %v2184_v30 = vld [vmem:[#allocation2 + $0x18] sm:$0xc0]  ;;  %v2389_v33 = vld [vmem:[#allocation2 + $0x18] sm:$0x30] }
0x1756   :  { %v2258_v13 = vadd.f32 %v2256_v4, %v2184_v30 }
0x1758   :  { %5365 = vtanh.f32 %v2258_v13  ;;  %v4331_v5 = vmul.f32 -1.442695, %v2258_v13 }
0x1759   :  { %5367 = vpow2.f32 %v4330_v49 }
0x175a   :  { %5369 = vpow2.f32 %v4331_v5 }
0x175c   :  { %v5364_v29 = vpop.eup %5363 }
0x175d   :  { %2268 = vrot.lane.b32.xlu1 %v5364_v29, %s5618_s2 }
0x1762   :  { %v5366_v32 = vpop.eup %5365 }
0x1763   :  { %2292 = vrot.lane.b32.xlu0 %v5366_v32, %s5618_s2  ;;  %v5368_v18 = vpop.eup %5367 }
0x1764   :  { %v2262_v6 = vadd.f32 1.0, %v5368_v18  ;;  %v5370_v7 = vpop.eup %5369 }
0x1765   :  { %v2286_v9 = vadd.f32 1.0, %v5370_v7 }
0x1766   :  { %5371 = vrcp.f32 %v2262_v6 }
0x1767   :  { %5373 = vrcp.f32 %v2286_v9 }
0x1770   :  { %v5372_v10 = vpop.eup %5371 }
0x1771   :  { %v5374_v15 = vpop.eup %5373  ;;  %v2266_v23 = vmul.f32 0.0, %v5372_v10 }
0x1772   :  { %v2290_v28 = vmul.f32 0.0, %v5374_v15 }
0x17cf   :  { %v2269_v11 = vpop.permute.xlu1 %2268 }
0x17d0   :  { %v2271_v12 = vmul.f32 %v5372_v10, %v2269_v11 }
0x17d2   :  { %2273 = vrot.lane.b32.xlu1 %v2271_v12, %s5619_s20 }
0x17d5   :  { %v2293_v19 = vpop.permute.xlu0 %2292 }
0x17d6   :  { %v2295_v20 = vmul.f32 %v5374_v15, %v2293_v19 }
0x17d8   :  { %2297 = vrot.lane.b32.xlu0 %v2295_v20, %s5619_s20 }
0x1844   :  { %v2274_v25 = vpop.permute.xlu1 %2273 }
0x1845   :  { %v6231_v26 = vadd.f32 %v2274_v25, %v2266_v23 }
0x1847   :  { %5375 = vtanh.f32 %v6231_v26  ;;  %v2478_v3 = vrot.slane %v6231_v26, 6  ;;  %v2534_v26 = vld [vmem:[#allocation2] sm:$0x30] }
0x184a   :  { %v2298_v34 = vpop.permute.xlu0 %2297 }
0x184b   :  { %v6234_v35 = vadd.f32 %v2298_v34, %v2290_v28 }
0x184d   :  { %5377 = vtanh.f32 %v6234_v35  ;;  %v2505_v13 = vrot.slane %v6234_v35, 2 }
0x1851   :  { %v5376_v36 = vpop.eup %5375 }
0x1852   :  { %2279 = vrot.lane.b32.xlu1 %v5376_v36, %s5618_s2 }
0x1857   :  { %v5378_v16 = vpop.eup %5377 }
0x1858   :  { %2303 = vrot.lane.b32.xlu0 %v5378_v16, %s5618_s2  ;;  %v2613_v16 = vld [vmem:[#allocation2 + $0x18] sm:$0xc] }
0x18c4   :  { %v2280_v37 = vpop.permute.xlu1 %2279 }
0x18c5   :  { %v6239_v27 = vmul.f32 %v5372_v10, %v2280_v37 }
0x18c7   :  { %2311 = vrot.lane.b32.xlu1 %v6239_v27, %s5619_s20 }
0x18ca   :  { %v2304_v41 = vpop.permute.xlu0 %2303 }
0x18cb   :  { %v6243_v21 = vmul.f32 %v5374_v15, %v2304_v41 }
0x18cd   :  { %v2391_v8 = vrot.slane %v6243_v21, 6 }
0x18cf   :  { %2392 = vrot.lane.b32.xlu0 %v2391_v8, %s5619_s20 }
0x1939   :  { %v2312_v42 = vpop.permute.xlu1 %2311 }
0x193a   :  { %4763 = vmatmul.mubr.msk.f32.vlgmr.msra.gmra.mrb[20].mxu1 %vm122_vm1, %v2312_v42 }
0x193b   :  { %5117 = vmatpush3.bf16.msra.mxu1 %v6168_v17  ;;  %4784 = vmatprep.mubr.msk.f32.mxu1 %vm5617_vm0, %v5615_v0 }
0x193c   :  { %5118 = vmatprep.subr.bf16.mxu1 %v5616_v1 }
0x193f   :  { %5120 = vmatpush3.bf16.msra.mxu1 %v6173_v22 }
0x1940   :  { %5127 = vmatprep.subr.bf16.mxu1 %v5616_v1 }
0x1941   :  { %v2393_v43 = vpop.permute.xlu0 %2392 }
0x1942   :  { %4774 = vmatmul.mubr.msk.f32.vlgmr.msra.gmra.mrb[24].mxu0 %vm122_vm1, %v2393_v43 }
0x1943   :  { %5123 = vmatpush3.bf16.msra.mxu0 %v6179_v31  ;;  %4795 = vmatprep.mubr.msk.f32.mxu0 %vm5617_vm0, %v5615_v0 }
0x1944   :  { %5124 = vmatprep.subr.bf16.mxu0 %v5616_v1 }
0x1947   :  { %5126 = vmatpush3.bf16.msra.mxu0 %v6185_v39 }
0x1948   :  { %5133 = vmatprep.subr.bf16.mxu0 %v5616_v1 }
0x1a0d   :  { %v2381_v44 = vpop.f32.mrb[20].mxu1 }
0x1a0e   :  { %v2386_v45 = vrot.slane %v2381_v44, 6  ;;  %v4764_v46 = vpop.f32.mrb[21].mxu1 }
0x1a10   :  { %v2388_v48 = vadd.f32 %v2386_v45, %v2309_v47 }
0x1a12   :  { %5379 = vtanh.f32 %v2388_v48  ;;  %v4334_v2 = vmul.f32 -1.442695, %v2388_v48 }
0x1a15   :  { %v2462_v50 = vpop.f32.mrb[24].mxu0 }
0x1a16   :  { %v2467_v51 = vrot.slane %v2462_v50, 4  ;;  %v4775_v53 = vpop.f32.mrb[25].mxu0 }
0x1a18   :  { %v2469_v54 = vadd.f32 %v2467_v51, %v2389_v33 }
0x1a1a   :  { %5381 = vtanh.f32 %v2469_v54  ;;  %v4335_v40 = vmul.f32 -1.442695, %v2469_v54 }
0x1a1b   :  { %5383 = vpow2.f32 %v4334_v2 }
0x1a1c   :  { %v5380_v55 = vpop.eup %5379  ;;  %5385 = vpow2.f32 %v4335_v40 }
0x1a1d   :  { %2482 = vrot.lane.b32.xlu1 %v5380_v55, %s5618_s2 }
0x1a24   :  { %v5382_v56 = vpop.eup %5381 }
0x1a25   :  { %2509 = vrot.lane.b32.xlu0 %v5382_v56, %s5618_s2  ;;  %v5384_v52 = vpop.eup %5383 }
0x1a26   :  { %v2473_v14 = vadd.f32 1.0, %v5384_v52  ;;  %v5386_v61 = vpop.eup %5385 }
0x1a27   :  { %v2500_v24 = vadd.f32 1.0, %v5386_v61 }
0x1a28   :  { %5387 = vrcp.f32 %v2473_v14 }
0x1a29   :  { %5389 = vrcp.f32 %v2500_v24 }
0x1a32   :  { %v5388_v57 = vpop.eup %5387 }
0x1a33   :  { %v5390_v60 = vpop.eup %5389  ;;  %v2480_v38 = vmul.f32 %v5388_v57, %v2478_v3 }
0x1a34   :  { %v2507_v29 = vmul.f32 %v5390_v60, %v2505_v13 }
0x1a8f   :  { %v2483_v58 = vpop.permute.xlu1 %2482 }
0x1a90   :  { %v2485_v59 = vmul.f32 %v5388_v57, %v2483_v58 }
0x1a92   :  { %2487 = vrot.lane.b32.xlu1 %v2485_v59, %s5619_s20 }
0x1a97   :  { %v2510_v62 = vpop.permute.xlu0 %2509 }
0x1a98   :  { %v2512_v63 = vmul.f32 %v5390_v60, %v2510_v62 }
0x1a9a   :  { %2514 = vrot.lane.b32.xlu0 %v2512_v63, %s5619_s20 }
0x1b04   :  { %v2488_v4 = vpop.permute.xlu1 %2487 }
0x1b05   :  { %v6266_v30 = vadd.f32 %v2488_v4, %v2480_v38 }
0x1b07   :  { %5391 = vtanh.f32 %v6266_v30  ;;  %v2701_v55 = vrot.slane %v6266_v30, 6 }
0x1b0c   :  { %v2515_v32 = vpop.permute.xlu0 %2514 }
0x1b0d   :  { %v6270_v49 = vadd.f32 %v2515_v32, %v2507_v29 }
0x1b0f   :  { %5393 = vtanh.f32 %v6270_v49  ;;  %v2728_v52 = vrot.slane %v6270_v49, 2 }
0x1b11   :  { %v5392_v5 = vpop.eup %5391 }
0x1b12   :  { %2493 = vrot.lane.b32.xlu1 %v5392_v5, %s5618_s2 }
0x1b19   :  { %v5394_v18 = vpop.eup %5393 }
0x1b1a   :  { %2520 = vrot.lane.b32.xlu0 %v5394_v18, %s5618_s2 }
0x1b84   :  { %v2494_v6 = vpop.permute.xlu1 %2493 }
0x1b85   :  { %v2496_v7 = vmul.f32 %v5388_v57, %v2494_v6 }
0x1b87   :  { %v6275_v9 = vrot.slane %v2496_v7, 2 }
0x1b89   :  { %2535 = vrot.lane.b32.xlu1 %v6275_v9, %s5619_s20  ;;  %v2527_v62 = vadd.f32 %v6275_v9, %v6239_v27  ;;  %v2532_v63 = vmax.f32 %v6239_v27, %v6275_v9 }
0x1b8c   :  { %v2521_v10 = vpop.permute.xlu0 %2520 }
0x1b8d   :  { %v6279_v11 = vmul.f32 %v5390_v60, %v2521_v10 }
0x1b8f   :  { %v2614_v12 = vrot.slane %v6279_v11, 4  ;;  %v2529_v30 = vrot.slane %v6279_v11, 6 }
0x1b91   :  { %2615 = vrot.lane.b32.xlu0 %v2614_v12, %s5619_s20  ;;  %v2531_v32 = vadd.f32 %v2529_v30, %v6243_v21  ;;  %v2533_v49 = vmax.f32 %v6243_v21, %v2529_v30  ;;  %v2757_v12 = vld [vmem:[#allocation2] sm:$0xc0] }
0x1bfb   :  { %v2536_v15 = vpop.permute.xlu1 %2535 }
0x1bfc   :  { %4785 = vmatmul.mubr.msk.f32.vlgmr.msra.gmra.mrb[22].mxu1 %vm122_vm1, %v2536_v15 }
0x1bfd   :  { %5129 = vmatpush3.bf16.msra.mxu1 %v6168_v17  ;;  %4806 = vmatprep.mubr.msk.f32.mxu1 %vm5617_vm0, %v5615_v0 }
0x1bfe   :  { %5130 = vmatprep.subr.bf16.mxu1 %v5616_v1 }
0x1c01   :  { %5132 = vmatpush3.bf16.msra.mxu1 %v6173_v22 }
0x1c02   :  { %5139 = vmatprep.subr.bf16.mxu1 %v5616_v1 }
0x1c03   :  { %v2616_v19 = vpop.permute.xlu0 %2615 }
0x1c04   :  { %4796 = vmatmul.mubr.msk.f32.vlgmr.msra.gmra.mrb[26].mxu0 %vm122_vm1, %v2616_v19  ;;  %v2836_v19 = vld [vmem:[#allocation2 + $0x18] sm:$0x3] }
0x1c05   :  { %5135 = vmatpush3.bf16.msra.mxu0 %v6179_v31  ;;  %4817 = vmatprep.mubr.msk.f32.mxu0 %vm5617_vm0, %v5615_v0 }
0x1c06   :  { %5136 = vmatprep.subr.bf16.mxu0 %v5616_v1 }
0x1c09   :  { %5138 = vmatpush3.bf16.msra.mxu0 %v6185_v39 }
0x1c0a   :  { %5145 = vmatprep.subr.bf16.mxu0 %v5616_v1 }
0x1ccf   :  { %v2605_v20 = vpop.f32.mrb[22].mxu1 }
0x1cd0   :  { %v2610_v23 = vrot.slane %v2605_v20, 4  ;;  %v4786_v25 = vpop.f32.mrb[23].mxu1 }
0x1cd2   :  { %v2612_v28 = vadd.f32 %v2610_v23, %v2534_v26 }
0x1cd4   :  { %5395 = vtanh.f32 %v2612_v28  ;;  %v4338_v42 = vmul.f32 -1.442695, %v2612_v28 }
0x1cd7   :  { %v2685_v34 = vpop.f32.mrb[26].mxu0 }
0x1cd8   :  { %v2690_v35 = vrot.slane %v2685_v34, 6  ;;  %v4797_v36 = vpop.f32.mrb[27].mxu0 }
0x1cda   :  { %v2692_v37 = vadd.f32 %v2690_v35, %v2613_v16 }
0x1cdc   :  { %5397 = vtanh.f32 %v2692_v37  ;;  %v4339_v43 = vmul.f32 -1.442695, %v2692_v37 }
0x1cdd   :  { %5399 = vpow2.f32 %v4338_v42 }
0x1cde   :  { %v5396_v41 = vpop.eup %5395  ;;  %5401 = vpow2.f32 %v4339_v43 }
0x1cdf   :  { %2705 = vrot.lane.b32.xlu1 %v5396_v41, %s5618_s2 }
0x1ce6   :  { %v5398_v8 = vpop.eup %5397 }
0x1ce7   :  { %2732 = vrot.lane.b32.xlu0 %v5398_v8, %s5618_s2  ;;  %v5400_v44 = vpop.eup %5399 }
0x1ce8   :  { %v2696_v45 = vadd.f32 1.0, %v5400_v44  ;;  %v5402_v46 = vpop.eup %5401 }
0x1ce9   :  { %v2723_v47 = vadd.f32 1.0, %v5402_v46 }
0x1cea   :  { %5403 = vrcp.f32 %v2696_v45 }
0x1ceb   :  { %5405 = vrcp.f32 %v2723_v47 }
0x1cf4   :  { %v5404_v48 = vpop.eup %5403 }
0x1cf5   :  { %v5406_v53 = vpop.eup %5405  ;;  %v2703_v56 = vmul.f32 %v5404_v48, %v2701_v55 }
0x1cf6   :  { %v2730_v14 = vmul.f32 %v5406_v53, %v2728_v52 }
0x1d51   :  { %v2706_v50 = vpop.permute.xlu1 %2705 }
0x1d52   :  { %v2708_v51 = vmul.f32 %v5404_v48, %v2706_v50 }
0x1d54   :  { %2710 = vrot.lane.b32.xlu1 %v2708_v51, %s5619_s20 }
0x1d59   :  { %v2733_v33 = vpop.permute.xlu0 %2732 }
0x1d5a   :  { %v2735_v54 = vmul.f32 %v5406_v53, %v2733_v33 }
0x1d5c   :  { %2737 = vrot.lane.b32.xlu0 %v2735_v54, %s5619_s20 }
0x1dc6   :  { %v2711_v2 = vpop.permute.xlu1 %2710 }
0x1dc7   :  { %v6302_v40 = vadd.f32 %v2711_v2, %v2703_v56 }
0x1dc9   :  { %5407 = vtanh.f32 %v6302_v40  ;;  %v2921_v47 = vrot.slane %v6302_v40, 6 }
0x1dce   :  { %v2738_v61 = vpop.permute.xlu0 %2737 }
0x1dcf   :  { %v6306_v24 = vadd.f32 %v2738_v61, %v2730_v14 }
0x1dd1   :  { %5409 = vtanh.f32 %v6306_v24 }
0x1dd3   :  { %v5408_v57 = vpop.eup %5407 }
0x1dd4   :  { %2716 = vrot.lane.b32.xlu1 %v5408_v57, %s5618_s2 }
0x1ddb   :  { %v5410_v58 = vpop.eup %5409 }
0x1ddc   :  { %2743 = vrot.lane.b32.xlu0 %v5410_v58, %s5618_s2 }
0x1e46   :  { %v2717_v59 = vpop.permute.xlu1 %2716 }
0x1e47   :  { %v2719_v60 = vmul.f32 %v5404_v48, %v2717_v59 }
0x1e49   :  { %v2748_v3 = vrot.slane %v2719_v60, 4 }
0x1e4b   :  { %v6315_v38 = vadd.f32 %v2748_v3, %v2527_v62  ;;  %v6317_v4 = vmax.f32 %v2532_v63, %v2748_v3  ;;  %2758 = vrot.lane.b32.xlu1 %v2748_v3, %s5619_s20 }
0x1e4e   :  { %v2744_v13 = vpop.permute.xlu0 %2743 }
0x1e4f   :  { %v2746_v29 = vmul.f32 %v5406_v53, %v2744_v13  ;;  %v2948_v53 = vrot.slane %v6306_v24, 2 }
0x1e51   :  { %v2752_v5 = vrot.slane %v2746_v29, 4  ;;  %v2837_v18 = vrot.slane %v2746_v29, 2 }
0x1e53   :  { %v6323_v6 = vadd.f32 %v2752_v5, %v2531_v32  ;;  %v6325_v27 = vmax.f32 %v2533_v49, %v2752_v5  ;;  %2838 = vrot.lane.b32.xlu0 %v2837_v18, %s5619_s20  ;;  %v3053_v18 = vld [vmem:[#allocation2 + $0x8] sm:$0xc0] }
0x1ebd   :  { %v2759_v7 = vpop.permute.xlu1 %2758 }
0x1ebe   :  { %4807 = vmatmul.mubr.msk.f32.vlgmr.msra.gmra.mrb[24].mxu1 %vm122_vm1, %v2759_v7 }
0x1ebf   :  { %5141 = vmatpush3.bf16.msra.mxu1 %v6168_v17  ;;  %4828 = vmatprep.mubr.msk.f32.mxu1 %vm5617_vm0, %v5615_v0 }
0x1ec0   :  { %5142 = vmatprep.subr.bf16.mxu1 %v5616_v1 }
0x1ec3   :  { %5144 = vmatpush3.bf16.msra.mxu1 %v6173_v22 }
0x1ec4   :  { %5151 = vmatprep.subr.bf16.mxu1 %v5616_v1 }
0x1ec5   :  { %v2839_v21 = vpop.permute.xlu0 %2838 }
0x1ec6   :  { %4818 = vmatmul.mubr.msk.f32.vlgmr.msra.gmra.mrb[28].mxu0 %vm122_vm1, %v2839_v21 }
0x1ec7   :  { %5147 = vmatpush3.bf16.msra.mxu0 %v6179_v31  ;;  %4839 = vmatprep.mubr.msk.f32.mxu0 %vm5617_vm0, %v5615_v0 }
0x1ec8   :  { %5148 = vmatprep.subr.bf16.mxu0 %v5616_v1 }
0x1ecb   :  { %5150 = vmatpush3.bf16.msra.mxu0 %v6185_v39 }
0x1ecc   :  { %5157 = vmatprep.subr.bf16.mxu0 %v5616_v1 }
0x1f91   :  { %v2828_v9 = vpop.f32.mrb[24].mxu1 }
0x1f92   :  { %v2833_v10 = vrot.slane %v2828_v9, 2  ;;  %v4808_v11 = vpop.f32.mrb[25].mxu1 }
0x1f94   :  { %v2835_v15 = vadd.f32 %v2833_v10, %v2757_v12 }
0x1f96   :  { %5411 = vtanh.f32 %v2835_v15  ;;  %v4342_v34 = vmul.f32 -1.442695, %v2835_v15 }
0x1f99   :  { %v2908_v20 = vpop.f32.mrb[28].mxu0 }
0x1f9a   :  { %v2912_v23 = vadd.f32 %v2908_v20, %v2836_v19  ;;  %v4819_v25 = vpop.f32.mrb[29].mxu0 }
0x1f9c   :  { %5413 = vtanh.f32 %v2912_v23  ;;  %v4343_v35 = vmul.f32 -1.442695, %v2912_v23 }
0x1f9d   :  { %5415 = vpow2.f32 %v4342_v34 }
0x1f9e   :  { %5417 = vpow2.f32 %v4343_v35 }
0x1fa0   :  { %v5412_v26 = vpop.eup %5411 }
0x1fa1   :  { %2925 = vrot.lane.b32.xlu1 %v5412_v26, %s5618_s2 }
0x1fa6   :  { %v5414_v28 = vpop.eup %5413 }
0x1fa7   :  { %2952 = vrot.lane.b32.xlu0 %v5414_v28, %s5618_s2  ;;  %v5416_v36 = vpop.eup %5415 }
0x1fa8   :  { %v2916_v16 = vadd.f32 1.0, %v5416_v36  ;;  %v5418_v37 = vpop.eup %5417 }
0x1fa9   :  { %v2943_v41 = vadd.f32 1.0, %v5418_v37 }
0x1faa   :  { %5419 = vrcp.f32 %v2916_v16 }
0x1fab   :  { %5421 = vrcp.f32 %v2943_v41 }
0x1fb4   :  { %v5420_v8 = vpop.eup %5419 }
0x1fb5   :  { %v5422_v44 = vpop.eup %5421  ;;  %v2923_v48 = vmul.f32 %v5420_v8, %v2921_v47 }
0x1fb6   :  { %v2950_v33 = vmul.f32 %v5422_v44, %v2948_v53 }
0x2013   :  { %v2926_v42 = vpop.permute.xlu1 %2925 }
0x2014   :  { %v2928_v43 = vmul.f32 %v5420_v8, %v2926_v42 }
0x2016   :  { %2930 = vrot.lane.b32.xlu1 %v2928_v43, %s5619_s20 }
0x2019   :  { %v2953_v45 = vpop.permute.xlu0 %2952 }
0x201a   :  { %v2955_v46 = vmul.f32 %v5422_v44, %v2953_v45 }
0x201c   :  { %2957 = vrot.lane.b32.xlu0 %v2955_v46, %s5619_s20 }
0x2088   :  { %v2931_v50 = vpop.permute.xlu1 %2930 }
0x2089   :  { %v6347_v51 = vadd.f32 %v2931_v50, %v2923_v48 }
0x208b   :  { %5423 = vtanh.f32 %v6347_v51  ;;  %v3140_v34 = vrot.slane %v6347_v51, 6 }
0x208e   :  { %v2958_v54 = vpop.permute.xlu0 %2957 }
0x208f   :  { %v6351_v55 = vadd.f32 %v2958_v54, %v2950_v33 }
0x2091   :  { %5425 = vtanh.f32 %v6351_v55  ;;  %v3167_v37 = vrot.slane %v6351_v55, 2 }
0x2095   :  { %v5424_v56 = vpop.eup %5423 }
0x2096   :  { %2936 = vrot.lane.b32.xlu1 %v5424_v56, %s5618_s2 }
0x209b   :  { %v5426_v2 = vpop.eup %5425 }
0x209c   :  { %2963 = vrot.lane.b32.xlu0 %v5426_v2, %s5618_s2 }
0x2108   :  { %v2937_v40 = vpop.permute.xlu1 %2936 }
0x2109   :  { %v2939_v52 = vmul.f32 %v5420_v8, %v2937_v40 }
0x210b   :  { %v6356_v14 = vrot.slane %v2939_v52, 6  ;;  %v3190_v52 = vld [vmem:[#allocation2 + $0x10] sm:$0xc] }
0x210d   :  { %v6360_v61 = vadd.f32 %v6356_v14, %v6315_v38  ;;  %v2975_v24 = vmax.f32 %v6317_v4, %v6356_v14  ;;  %2978 = vrot.lane.b32.xlu1 %v6356_v14, %s5619_s20  ;;  %v2977_v38 = vld [vmem:[#allocation2 + $0x10] sm:$0x3] }
0x210e   :  { %v2964_v57 = vpop.permute.xlu0 %2963 }
0x210f   :  { %v2966_v58 = vmul.f32 %v5422_v44, %v2964_v57 }
0x2111   :  { %v2972_v59 = vrot.slane %v2966_v58, 2  ;;  %3054 = vrot.lane.b32.xlu0 %v2966_v58, %s5619_s20  ;;  %v3270_v58 = vld [vmem:[#allocation2 + $0x8] sm:$0x30] }
0x2113   :  { %v6368_v60 = vadd.f32 %v2972_v59, %v6323_v6  ;;  %v6371_v62 = vmax.f32 %v6325_v27, %v2972_v59 }
0x217f   :  { %v2979_v63 = vpop.permute.xlu1 %2978 }
0x2180   :  { %4829 = vmatmul.mubr.msk.f32.vlgmr.msra.gmra.mrb[26].mxu1 %vm122_vm1, %v2979_v63 }
0x2181   :  { %5153 = vmatpush3.bf16.msra.mxu1 %v6168_v17  ;;  %4850 = vmatprep.mubr.msk.f32.mxu1 %vm5617_vm0, %v5615_v0 }
0x2182   :  { %5154 = vmatprep.subr.bf16.mxu1 %v5616_v1 }
0x2183   :  { %v3055_v3 = vpop.permute.xlu0 %3054 }
0x2184   :  { %4840 = vmatmul.mubr.msk.f32.vlgmr.msra.gmra.mrb[30].mxu0 %vm122_vm1, %v3055_v3 }
0x2185   :  { %5156 = vmatpush3.bf16.msra.mxu1 %v6173_v22  ;;  %5159 = vmatpush3.bf16.msra.mxu0 %v6179_v31 }
0x2186   :  { %5160 = vmatprep.subr.bf16.mxu0 %v5616_v1  ;;  %4861 = vmatprep.mubr.msk.f32.mxu0 %vm5617_vm0, %v5615_v0 }
0x2187   :  { %5163 = vmatprep.subr.bf16.mxu1 %v5616_v1 }
0x2189   :  { %5162 = vmatpush3.bf16.msra.mxu0 %v6185_v39 }
0x218a   :  { %5169 = vmatprep.subr.bf16.mxu0 %v5616_v1 }
0x2253   :  { %v3048_v30 = vpop.f32.mrb[26].mxu1 }
0x2254   :  { %v3052_v13 = vadd.f32 %v3048_v30, %v2977_v38  ;;  %v4830_v29 = vpop.f32.mrb[27].mxu1 }
0x2256   :  { %5427 = vtanh.f32 %v3052_v13  ;;  %v4346_v21 = vmul.f32 -1.442695, %v3052_v13 }
0x2257   :  { %v3124_v32 = vpop.f32.mrb[30].mxu0 }
0x2258   :  { %v3129_v49 = vrot.slane %v3124_v32, 2  ;;  %v4841_v5 = vpop.f32.mrb[31].mxu0 }
0x225a   :  { %v3131_v6 = vadd.f32 %v3129_v49, %v3053_v18 }
0x225c   :  { %5429 = vtanh.f32 %v3131_v6  ;;  %v4347_v9 = vmul.f32 -1.442695, %v3131_v6 }
0x225d   :  { %5431 = vpow2.f32 %v4346_v21 }
0x225e   :  { %5433 = vpow2.f32 %v4347_v9 }
0x2260   :  { %v5428_v27 = vpop.eup %5427 }
0x2261   :  { %3144 = vrot.lane.b32.xlu1 %v5428_v27, %s5618_s2 }
0x2266   :  { %v5430_v7 = vpop.eup %5429 }
0x2267   :  { %3171 = vrot.lane.b32.xlu0 %v5430_v7, %s5618_s2  ;;  %v5432_v10 = vpop.eup %5431 }
0x2268   :  { %v3135_v11 = vadd.f32 1.0, %v5432_v10  ;;  %v5434_v12 = vpop.eup %5433 }
0x2269   :  { %v3162_v15 = vadd.f32 1.0, %v5434_v12 }
0x226a   :  { %5435 = vrcp.f32 %v3135_v11 }
0x226b   :  { %5437 = vrcp.f32 %v3162_v15 }
0x2274   :  { %v5436_v19 = vpop.eup %5435 }
0x2275   :  { %v5438_v25 = vpop.eup %5437  ;;  %v3142_v35 = vmul.f32 %v5436_v19, %v3140_v34 }
0x2276   :  { %v3169_v41 = vmul.f32 %v5438_v25, %v3167_v37 }
0x22d3   :  { %v3145_v20 = vpop.permute.xlu1 %3144 }
0x22d4   :  { %v3147_v23 = vmul.f32 %v5436_v19, %v3145_v20 }
0x22d6   :  { %3149 = vrot.lane.b32.xlu1 %v3147_v23, %s5619_s20 }
0x22d9   :  { %v3172_v26 = vpop.permute.xlu0 %3171 }
0x22da   :  { %v3174_v28 = vmul.f32 %v5438_v25, %v3172_v26 }
0x22dc   :  { %3176 = vrot.lane.b32.xlu0 %v3174_v28, %s5619_s20 }
0x2348   :  { %v3150_v36 = vpop.permute.xlu1 %3149 }
0x2349   :  { %v6392_v16 = vadd.f32 %v3150_v36, %v3142_v35 }
0x234b   :  { %5439 = vtanh.f32 %v6392_v16  ;;  %v3359_v21 = vrot.slane %v6392_v16, 6 }
0x234e   :  { %v3177_v8 = vpop.permute.xlu0 %3176 }
0x234f   :  { %v6396_v42 = vadd.f32 %v3177_v8, %v3169_v41 }
0x2351   :  { %5441 = vtanh.f32 %v6396_v42  ;;  %v3386_v12 = vrot.slane %v6396_v42, 2 }
0x2355   :  { %v5440_v43 = vpop.eup %5439 }
0x2356   :  { %3155 = vrot.lane.b32.xlu1 %v5440_v43, %s5618_s2 }
0x235b   :  { %v5442_v44 = vpop.eup %5441 }
0x235c   :  { %3182 = vrot.lane.b32.xlu0 %v5442_v44, %s5618_s2 }
0x23c8   :  { %v3156_v45 = vpop.permute.xlu1 %3155 }
0x23c9   :  { %v3158_v46 = vmul.f32 %v5436_v19, %v3156_v45 }
0x23cb   :  { %v6402_v47 = vadd.f32 %v3158_v46, %v6360_v61  ;;  %v6407_v48 = vmax.f32 %v2975_v24, %v3158_v46  ;;  %3192 = vrot.lane.b32.xlu1 %v3158_v46, %s5619_s20 }
0x23ce   :  { %v3183_v50 = vpop.permute.xlu0 %3182 }
0x23cf   :  { %v6410_v51 = vmul.f32 %v5438_v25, %v3183_v50 }
0x23d1   :  { %v6414_v53 = vadd.f32 %v6410_v51, %v6368_v60  ;;  %v3189_v33 = vmax.f32 %v6371_v62, %v6410_v51  ;;  %v3272_v54 = vrot.slane %v6410_v51, 6 }
0x23d3   :  { %3273 = vrot.lane.b32.xlu0 %v3272_v54, %s5619_s20 }
0x243d   :  { %v3193_v55 = vpop.permute.xlu1 %3192 }
0x243e   :  { %4851 = vmatmul.mubr.msk.f32.vlgmr.msra.gmra.mrb[28].mxu1 %vm122_vm1, %v3193_v55 }
0x243f   :  { %5165 = vmatpush3.bf16.msra.mxu1 %v6168_v17  ;;  %4872 = vmatprep.mubr.msk.f32.mxu1 %vm5617_vm0, %v5615_v0 }
0x2440   :  { %5166 = vmatprep.subr.bf16.mxu1 %v5616_v1 }
0x2443   :  { %5168 = vmatpush3.bf16.msra.mxu1 %v6173_v22 }
0x2444   :  { %5175 = vmatprep.subr.bf16.mxu1 %v5616_v1 }
0x2445   :  { %v3274_v4 = vpop.permute.xlu0 %3273 }
0x2446   :  { %4862 = vmatmul.mubr.msk.f32.vlgmr.msra.gmra.mrb[32].mxu0 %vm122_vm1, %v3274_v4 }
0x2447   :  { %5171 = vmatpush3.bf16.msra.mxu0 %v6179_v31  ;;  %4883 = vmatprep.mubr.msk.f32.mxu0 %vm5617_vm0, %v5615_v0 }
0x2448   :  { %5172 = vmatprep.subr.bf16.mxu0 %v5616_v1 }
0x244b   :  { %5174 = vmatpush3.bf16.msra.mxu0 %v6185_v39 }
0x244c   :  { %5181 = vmatprep.subr.bf16.mxu0 %v5616_v1 }
0x2511   :  { %v3262_v56 = vpop.f32.mrb[28].mxu1 }
0x2512   :  { %v3267_v2 = vrot.slane %v3262_v56, 6  ;;  %v4852_v40 = vpop.f32.mrb[29].mxu1 }
0x2514   :  { %v3269_v14 = vadd.f32 %v3267_v2, %v3190_v52 }
0x2516   :  { %5443 = vtanh.f32 %v3269_v14  ;;  %v4350_v3 = vmul.f32 -1.442695, %v3269_v14 }
0x2519   :  { %v3343_v61 = vpop.f32.mrb[32].mxu0 }
0x251a   :  { %v3348_v24 = vrot.slane %v3343_v61, 4  ;;  %v4863_v57 = vpop.f32.mrb[33].mxu0 }
0x251c   :  { %v3350_v59 = vadd.f32 %v3348_v24, %v3270_v58 }
0x251e   :  { %5445 = vtanh.f32 %v3350_v59  ;;  %v4351_v38 = vmul.f32 -1.442695, %v3350_v59 }
0x251f   :  { %5447 = vpow2.f32 %v4350_v3 }
0x2520   :  { %v5444_v60 = vpop.eup %5443  ;;  %5449 = vpow2.f32 %v4351_v38 }
0x2521   :  { %3363 = vrot.lane.b32.xlu1 %v5444_v60, %s5618_s2 }
0x2528   :  { %v5446_v63 = vpop.eup %5445 }
0x2529   :  { %3390 = vrot.lane.b32.xlu0 %v5446_v63, %s5618_s2  ;;  %v5448_v30 = vpop.eup %5447 }
0x252a   :  { %v3354_v13 = vadd.f32 1.0, %v5448_v30  ;;  %v5450_v29 = vpop.eup %5449 }
0x252b   :  { %v3381_v32 = vadd.f32 1.0, %v5450_v29 }
0x252c   :  { %5451 = vrcp.f32 %v3354_v13 }
0x252d   :  { %5453 = vrcp.f32 %v3381_v32 }
0x2536   :  { %v5452_v49 = vpop.eup %5451 }
0x2537   :  { %v5454_v6 = vpop.eup %5453  ;;  %v3361_v9 = vmul.f32 %v5452_v49, %v3359_v21 }
0x2538   :  { %v3388_v15 = vmul.f32 %v5454_v6, %v3386_v12 }
0x2593   :  { %v3364_v5 = vpop.permute.xlu1 %3363 }
0x2594   :  { %v3366_v18 = vmul.f32 %v5452_v49, %v3364_v5 }
0x2596   :  { %3368 = vrot.lane.b32.xlu1 %v3366_v18, %s5619_s20 }
0x259b   :  { %v3391_v27 = vpop.permute.xlu0 %3390 }
0x259c   :  { %v3393_v7 = vmul.f32 %v5454_v6, %v3391_v27 }
0x259e   :  { %3395 = vrot.lane.b32.xlu0 %v3393_v7, %s5619_s20 }
0x2608   :  { %v3369_v10 = vpop.permute.xlu1 %3368 }
0x2609   :  { %v6439_v11 = vadd.f32 %v3369_v10, %v3361_v9 }
0x260b   :  { %5455 = vtanh.f32 %v6439_v11  ;;  %v3582_v60 = vrot.slane %v6439_v11, 6 }
0x2610   :  { %v3396_v19 = vpop.permute.xlu0 %3395 }
0x2611   :  { %v6443_v20 = vadd.f32 %v3396_v19, %v3388_v15 }
0x2613   :  { %5457 = vtanh.f32 %v6443_v20  ;;  %v3609_v30 = vrot.slane %v6443_v20, 2 }
0x2615   :  { %v5456_v23 = vpop.eup %5455 }
0x2616   :  { %3374 = vrot.lane.b32.xlu1 %v5456_v23, %s5618_s2 }
0x261d   :  { %v5458_v25 = vpop.eup %5457 }
0x261e   :  { %3401 = vrot.lane.b32.xlu0 %v5458_v25, %s5618_s2 }
0x2688   :  { %v3375_v26 = vpop.permute.xlu1 %3374 }
0x2689   :  { %v3377_v28 = vmul.f32 %v5452_v49, %v3375_v26 }
0x268b   :  { %v6448_v34 = vrot.slane %v3377_v28, 2  ;;  %v3638_v28 = vld [vmem:[#allocation2 + $0x10] sm:$0xc0] }
0x268d   :  { %v6452_v35 = vadd.f32 %v6448_v34, %v6402_v47  ;;  %v3413_v36 = vmax.f32 %v6407_v48, %v6448_v34  ;;  %3416 = vrot.lane.b32.xlu1 %v6448_v34, %s5619_s20 }
0x2690   :  { %v3402_v16 = vpop.permute.xlu0 %3401 }
0x2691   :  { %v3404_v37 = vmul.f32 %v5454_v6, %v3402_v16 }
0x2693   :  { %v3410_v41 = vrot.slane %v3404_v37, 6  ;;  %v3495_v8 = vrot.slane %v3404_v37, 4 }
0x2695   :  { %v6459_v42 = vadd.f32 %v3410_v41, %v6414_v53  ;;  %v6464_v43 = vmax.f32 %v3189_v33, %v3410_v41  ;;  %3496 = vrot.lane.b32.xlu0 %v3495_v8, %s5619_s20  ;;  %v3494_v33 = vld [vmem:[#allocation2 + $0x8] sm:$0xc] }
0x26ff   :  { %v3417_v44 = vpop.permute.xlu1 %3416 }
0x2700   :  { %4873 = vmatmul.mubr.msk.f32.vlgmr.msra.gmra.mrb[30].mxu1 %vm122_vm1, %v3417_v44 }
0x2701   :  { %5177 = vmatpush3.bf16.msra.mxu1 %v6168_v17  ;;  %4894 = vmatprep.mubr.msk.f32.mxu1 %vm5617_vm0, %v5615_v0 }
0x2702   :  { %5178 = vmatprep.subr.bf16.mxu1 %v5616_v1 }
0x2705   :  { %5180 = vmatpush3.bf16.msra.mxu1 %v6173_v22  ;;  %v3415_v22 = vld [vmem:[#allocation2 + $0x10] sm:$0x30] }
0x2706   :  { %5187 = vmatprep.subr.bf16.mxu1 %v5616_v1 }
0x2707   :  { %v3497_v45 = vpop.permute.xlu0 %3496 }
0x2708   :  { %4884 = vmatmul.mubr.msk.f32.vlgmr.msra.gmra.mrb[34].mxu0 %vm122_vm1, %v3497_v45 }
0x2709   :  { %5183 = vmatpush3.bf16.msra.mxu0 %v6179_v31  ;;  %4905 = vmatprep.mubr.msk.f32.mxu0 %vm5617_vm0, %v5615_v0 }
0x270a   :  { %5184 = vmatprep.subr.bf16.mxu0 %v5616_v1 }
0x270d   :  { %5186 = vmatpush3.bf16.msra.mxu0 %v6185_v39 }
0x270e   :  { %5193 = vmatprep.subr.bf16.mxu0 %v5616_v1 }
0x27d3   :  { %v3486_v17 = vpop.f32.mrb[30].mxu1 }
0x27d4   :  { %v3491_v62 = vrot.slane %v3486_v17, 4  ;;  %v4874_v46 = vpop.f32.mrb[31].mxu1 }
0x27d6   :  { %v3493_v47 = vadd.f32 %v3491_v62, %v3415_v22 }
0x27d8   :  { %5459 = vtanh.f32 %v3493_v47  ;;  %v4354_v39 = vmul.f32 -1.442695, %v3493_v47 }
0x27db   :  { %v3566_v50 = vpop.f32.mrb[34].mxu0 }
0x27dc   :  { %v3571_v51 = vrot.slane %v3566_v50, 6  ;;  %v4885_v53 = vpop.f32.mrb[35].mxu0 }
0x27de   :  { %v3573_v31 = vadd.f32 %v3571_v51, %v3494_v33 }
0x27e0   :  { %5461 = vtanh.f32 %v3573_v31  ;;  %v4355_v4 = vmul.f32 -1.442695, %v3573_v31 }
0x27e1   :  { %5463 = vpow2.f32 %v4354_v39 }
0x27e2   :  { %v5460_v54 = vpop.eup %5459  ;;  %5465 = vpow2.f32 %v4355_v4 }
0x27e3   :  { %3586 = vrot.lane.b32.xlu1 %v5460_v54, %s5618_s2 }
0x27ea   :  { %v5462_v55 = vpop.eup %5461 }
0x27eb   :  { %3613 = vrot.lane.b32.xlu0 %v5462_v55, %s5618_s2  ;;  %v5464_v56 = vpop.eup %5463 }
0x27ec   :  { %v3577_v2 = vadd.f32 1.0, %v5464_v56  ;;  %v5466_v40 = vpop.eup %5465 }
0x27ed   :  { %v3604_v52 = vadd.f32 1.0, %v5466_v40 }
0x27ee   :  { %5467 = vrcp.f32 %v3577_v2 }
0x27ef   :  { %5469 = vrcp.f32 %v3604_v52 }
0x27f8   :  { %v5468_v14 = vpop.eup %5467 }
0x27f9   :  { %v5470_v57 = vpop.eup %5469  ;;  %v3584_v63 = vmul.f32 %v5468_v14, %v3582_v60  ;;  %v3863_v60 = vld [vmem:[%s6653_s9 + $0x28] sm:$0xff] }
0x27fa   :  { %v3611_v13 = vmul.f32 %v5470_v57, %v3609_v30  ;;  %v3865_v30 = vld [vmem:[%s6653_s9 + $0x38] sm:$0xff] }
0x2855   :  { %v3587_v61 = vpop.permute.xlu1 %3586 }
0x2856   :  { %v3589_v24 = vmul.f32 %v5468_v14, %v3587_v61  ;;  %v3859_v61 = vld [vmem:[%s6653_s9 + $0x8] sm:$0xff] }
0x2858   :  { %3591 = vrot.lane.b32.xlu1 %v3589_v24, %s5619_s20  ;;  %v3860_v24 = vld [vmem:[%s6653_s9 + $0x10] sm:$0xff] }
0x285d   :  { %v3614_v58 = vpop.permute.xlu0 %3613 }
0x285e   :  { %v3616_v59 = vmul.f32 %v5470_v57, %v3614_v58  ;;  %v3861_v58 = vld [vmem:[%s6653_s9 + $0x18] sm:$0xff] }
0x2860   :  { %3618 = vrot.lane.b32.xlu0 %v3616_v59, %s5619_s20  ;;  %v3862_v59 = vld [vmem:[%s6653_s9 + $0x20] sm:$0xff] }
0x28ca   :  { %v3592_v3 = vpop.permute.xlu1 %3591 }
0x28cb   :  { %v6486_v38 = vadd.f32 %v3592_v3, %v3584_v63  ;;  %v5188_v63 = vpack.c.bf16 %v3863_v60, %v3862_v59  ;;  %v5197_v3 = vpack.c.bf16 %v3861_v58, %v3860_v24  ;;  %v4365_v58 = vld [vmem:[%s6656_s12] ss:$0 sm:$0xff] }
0x28cd   :  { %5471 = vtanh.f32 %v6486_v38  ;;  %v3802_v33 = vrot.slane %v6486_v38, 6  ;;  %v3864_v38 = vld [vmem:[%s6653_s9 + $0x30] sm:$0xff] }
0x28d2   :  { %v3619_v29 = vpop.permute.xlu0 %3618 }
0x28d3   :  { %v6490_v32 = vadd.f32 %v3619_v29, %v3611_v13  ;;  %v5191_v13 = vpack.c.bf16 %v3865_v30, %v3864_v38 }
0x28d5   :  { %5473 = vtanh.f32 %v6490_v32  ;;  %v3829_v39 = vrot.slane %v6490_v32, 2 }
0x28d7   :  { %v5472_v49 = vpop.eup %5471 }
0x28d8   :  { %3597 = vrot.lane.b32.xlu1 %v5472_v49, %s5618_s2 }
0x28df   :  { %v5474_v5 = vpop.eup %5473 }
0x28e0   :  { %3624 = vrot.lane.b32.xlu0 %v5474_v5, %s5618_s2 }
0x294a   :  { %v3598_v18 = vpop.permute.xlu1 %3597 }
0x294b   :  { %v3600_v6 = vmul.f32 %v5468_v14, %v3598_v18  ;;  %v3858_v14 = vld [vmem:[%s6653_s9] sm:$0xff] }
0x294d   :  { %v3629_v27 = vrot.slane %v3600_v6, 4 }
0x294f   :  { %3639 = vrot.lane.b32.xlu1 %v3629_v27, %s5619_s20  ;;  %v6497_v7 = vadd.f32 %v3629_v27, %v6452_v35  ;;  %v6502_v21 = vmax.f32 %v3413_v36, %v3629_v27  ;;  %v3717_v35 = vld [vmem:[#allocation2 + $0x8] sm:$0x3] }
0x2952   :  { %v3625_v9 = vpop.permute.xlu0 %3624 }
0x2953   :  { %v3627_v10 = vmul.f32 %v5470_v57, %v3625_v9  ;;  %v5194_v57 = vpack.c.bf16 %v3859_v61, %v3858_v14  ;;  %v4364_v14 = vld [vmem:[%s6654_s10] ss:$0 sm:$0xff] }
0x2955   :  { %v3633_v11 = vrot.slane %v3627_v10, 4  ;;  %v3718_v12 = vrot.slane %v3627_v10, 2 }
0x2957   :  { %v6505_v15 = vadd.f32 %v3633_v11, %v6459_v42  ;;  %v6508_v19 = vmax.f32 %v6464_v43, %v3633_v11  ;;  %3719 = vrot.lane.b32.xlu0 %v3718_v12, %s5619_s20 }
0x29c1   :  { %v3640_v20 = vpop.permute.xlu1 %3639 }
0x29c2   :  { %4895 = vmatmul.mubr.msk.f32.vlgmr.msra.gmra.mrb[32].mxu1 %vm122_vm1, %v3640_v20 }
0x29c3   :  { %4916 = vmatprep.mubr.msk.f32.mxu1 %vm5617_vm0, %v5615_v0  ;;  %5189 = vmatpush3.bf16.msra.mxu1 %v5188_v63 }
0x29c4   :  { %5190 = vmatprep.subr.bf16.mxu1 %v5616_v1 }
0x29c7   :  { %5192 = vmatpush3.bf16.msra.mxu1 %v5191_v13 }
0x29c8   :  { %5199 = vmatprep.subr.bf16.mxu1 %v5616_v1 }
0x29c9   :  { %v3720_v48 = vpop.permute.xlu0 %3719 }
0x29ca   :  { %4906 = vmatmul.mubr.msk.f32.vlgmr.msra.gmra.mrb[36].mxu0 %vm122_vm1, %v3720_v48 }
0x29cb   :  { %4927 = vmatprep.mubr.msk.f32.mxu0 %vm5617_vm0, %v5615_v0  ;;  %5195 = vmatpush3.bf16.msra.mxu0 %v5194_v57 }
0x29cc   :  { %5196 = vmatprep.subr.bf16.mxu0 %v5616_v1 }
0x29cf   :  { %5198 = vmatpush3.bf16.msra.mxu0 %v5197_v3 }
0x29d0   :  { %5205 = vmatprep.subr.bf16.mxu0 %v5616_v1 }
0x2a95   :  { %v3709_v23 = vpop.f32.mrb[32].mxu1 }
0x2a96   :  { %v3714_v25 = vrot.slane %v3709_v23, 2  ;;  %v4896_v26 = vpop.f32.mrb[33].mxu1 }
0x2a97   :  { %v3873_v26 = vld [vmem:[%s6653_s9 + $0x78] sm:$0xff] }
0x2a98   :  { %v3716_v34 = vadd.f32 %v3714_v25, %v3638_v28  ;;  %v3872_v25 = vld [vmem:[%s6653_s9 + $0x70] sm:$0xff] }
0x2a99   :  { %v5209_v28 = vpack.c.bf16 %v3873_v26, %v3872_v25 }
0x2a9a   :  { %5475 = vtanh.f32 %v3716_v34  ;;  %v4358_v42 = vmul.f32 -1.442695, %v3716_v34  ;;  %v3866_v34 = vld [vmem:[%s6653_s9 + $0x40] sm:$0xff] }
0x2a9d   :  { %v3789_v36 = vpop.f32.mrb[36].mxu0 }
0x2a9e   :  { %v3793_v16 = vadd.f32 %v3789_v36, %v3717_v35  ;;  %v4907_v37 = vpop.f32.mrb[37].mxu0  ;;  %v3867_v35 = vld [vmem:[%s6653_s9 + $0x48] sm:$0xff] }
0x2a9f   :  { %v5200_v36 = vpack.c.bf16 %v3867_v35, %v3866_v34  ;;  %v3869_v37 = vld [vmem:[%s6653_s9 + $0x58] sm:$0xff] }
0x2aa0   :  { %5477 = vtanh.f32 %v3793_v16  ;;  %v4359_v43 = vmul.f32 -1.442695, %v3793_v16  ;;  %v3868_v16 = vld [vmem:[%s6653_s9 + $0x50] sm:$0xff] }
0x2aa1   :  { %5479 = vpow2.f32 %v4358_v42  ;;  %v5203_v42 = vpack.c.bf16 %v3869_v37, %v3868_v16 }
0x2aa2   :  { %5481 = vpow2.f32 %v4359_v43 }
0x2aa4   :  { %v5476_v41 = vpop.eup %5475 }
0x2aa5   :  { %3806 = vrot.lane.b32.xlu1 %v5476_v41, %s5618_s2 }
0x2aaa   :  { %v5478_v8 = vpop.eup %5477 }
0x2aab   :  { %3833 = vrot.lane.b32.xlu0 %v5478_v8, %s5618_s2  ;;  %v5480_v44 = vpop.eup %5479 }
0x2aac   :  { %v3797_v45 = vadd.f32 1.0, %v5480_v44  ;;  %v5482_v17 = vpop.eup %5481  ;;  %v4189_v44 = vld [vmem:[%s6655_s11] sm:$0xff] }
0x2aad   :  { %v3824_v62 = vadd.f32 1.0, %v5482_v17 }
0x2aae   :  { %5483 = vrcp.f32 %v3797_v45  ;;  %v4190_v45 = vld [vmem:[%s6655_s11 + $0x8] sm:$0xff] }
0x2aaf   :  { %5485 = vrcp.f32 %v3824_v62  ;;  %v5212_v17 = vpack.c.bf16 %v4190_v45, %v4189_v44  ;;  %v4191_v62 = vld [vmem:[%s6655_s11 + $0x10] sm:$0xff] }
0x2ab8   :  { %v5484_v46 = vpop.eup %5483 }
0x2ab9   :  { %v5486_v50 = vpop.eup %5485  ;;  %v3804_v31 = vmul.f32 %v5484_v46, %v3802_v33 }
0x2aba   :  { %v3831_v4 = vmul.f32 %v5486_v50, %v3829_v39 }
0x2b17   :  { %v3807_v22 = vpop.permute.xlu1 %3806 }
0x2b18   :  { %v3809_v47 = vmul.f32 %v5484_v46, %v3807_v22 }
0x2b1a   :  { %3811 = vrot.lane.b32.xlu1 %v3809_v47, %s5619_s20  ;;  %v4194_v47 = vld [vmem:[%s6655_s11 + $0x28] sm:$0xff] }
0x2b1d   :  { %v3834_v51 = vpop.permute.xlu0 %3833 }
0x2b1e   :  { %v3836_v53 = vmul.f32 %v5486_v50, %v3834_v51  ;;  %v4195_v51 = vld [vmem:[%s6655_s11 + $0x30] sm:$0xff] }
0x2b20   :  { %3838 = vrot.lane.b32.xlu0 %v3836_v53, %s5619_s20  ;;  %v4196_v53 = vld [vmem:[%s6655_s11 + $0x38] sm:$0xff] }
0x2b21   :  { %v5221_v33 = vpack.c.bf16 %v4196_v53, %v4195_v51 }
0x2b8c   :  { %v3812_v54 = vpop.permute.xlu1 %3811 }
0x2b8d   :  { %v3814_v55 = vadd.f32 %v3812_v54, %v3804_v31 }
0x2b8f   :  { %5487 = vtanh.f32 %v3814_v55 }
0x2b92   :  { %v3839_v56 = vpop.permute.xlu0 %3838 }
0x2b93   :  { %v3841_v2 = vadd.f32 %v3839_v56, %v3831_v4 }
0x2b95   :  { %5489 = vtanh.f32 %v3841_v2 }
0x2b99   :  { %v5488_v40 = vpop.eup %5487 }
0x2b9a   :  { %3817 = vrot.lane.b32.xlu1 %v5488_v40, %s5618_s2 }
0x2b9f   :  { %v5490_v52 = vpop.eup %5489 }
0x2ba0   :  { %3844 = vrot.lane.b32.xlu0 %v5490_v52, %s5618_s2 }
0x2c0c   :  { %v3818_v29 = vpop.permute.xlu1 %3817 }
0x2c0d   :  { %v3820_v32 = vmul.f32 %v5484_v46, %v3818_v29  ;;  %v4192_v46 = vld [vmem:[%s6655_s11 + $0x18] sm:$0xff] }
0x2c0e   :  { %v5215_v22 = vpack.c.bf16 %v4192_v46, %v4191_v62 }
0x2c0f   :  { %v3849_v49 = vrot.slane %v3820_v32, 6 }
0x2c11   :  { %v3851_v5 = vadd.f32 %v3849_v49, %v6497_v7  ;;  %v3856_v23 = vmax.f32 %v6502_v21, %v3849_v49  ;;  %v3870_v7 = vld [vmem:[%s6653_s9 + $0x60] sm:$0xff] }
0x2c12   :  { %v3845_v18 = vpop.permute.xlu0 %3844 }
0x2c13   :  { %v3874_v6 = vmul.f32 0.125, %v3851_v5  ;;  %v3847_v27 = vmul.f32 %v5486_v50, %v3845_v18 }
0x2c15   :  { %v3853_v9 = vrot.slane %v3847_v27, 2  ;;  %3953 = vrot.lane.b32.xlu1 %v3874_v6, %s5619_s20 }
0x2c17   :  { %v3855_v10 = vadd.f32 %v3853_v9, %v6505_v15  ;;  %v3857_v11 = vmax.f32 %v6508_v19, %v3853_v9  ;;  %v3871_v15 = vld [vmem:[%s6653_s9 + $0x68] sm:$0xff] }
0x2c18   :  { %v5206_v19 = vpack.c.bf16 %v3871_v15, %v3870_v7 }
0x2c19   :  { %v3875_v12 = vmul.f32 0.125, %v3855_v10  ;;  %v4104_v20 = vrot.slane %v3857_v11, 6 }
0x2c1b   :  { %v3877_v48 = vrot.slane %v3875_v12, 6  ;;  %4105 = vrot.lane.b32.xlu1 %v4104_v20, %s5619_s20 }
0x2c1d   :  { %3878 = vrot.lane.b32.xlu0 %v3877_v48, %s5619_s20 }
0x2c21   :  { %4028 = vrot.lane.b32.xlu0 %v3856_v23, %s5619_s20  ;;  %s5620_s20 = smov [#allocation12]  }
0x2c22   :  { %s4285_s17 = sshll.u32 %s5620_s20, 4  ;;  %s4286_s17 = int_to_ptr.vmem [resolvable:$true] %s4285_s17 }
0x2c23   :  { %s5579_s6 = scalar_lea.vmem %s4286_s17, 32  ;;  %p5584_p5 = scmp.lt.s32.totalorder %s4286_s17, %s4286_s17 }
0x2c24   :  { %p5580_p4 = scmp.ne.s32.totalorder %s4286_s17, %s5579_s6  ;;  %p5585_p6 = scmp.lt.s32.totalorder %s5579_s6, %s5579_s6 }
0x2c26   :  { %p5586_p7 = por %p5585_p6, %p5584_p5 }
0x2c28   :  { %p5587_p8 = pnand %p5586_p7, %p5580_p4 }
0x2c87   :  { %v3954_v21 = vpop.permute.xlu1 %3953 }
0x2c88   :  { %4928 = vmatmul.mubr.msk.f32.vlgmr.msra.gmra.mrb[38].mxu0 %vm122_vm1, %v3954_v21 }
0x2c89   :  { %5207 = vmatpush3.bf16.msra.mxu0 %v5206_v19  ;;  %4949 = vmatprep.mubr.msk.f32.mxu0 %vm5617_vm0, %v5615_v0 }
0x2c8a   :  { %5208 = vmatprep.subr.bf16.mxu0 %v5616_v1 }
0x2c8d   :  { %5210 = vmatpush3.bf16.msra.mxu0 %v5209_v28  ;;  %v4106_v41 = vpop.permute.xlu1 %4105 }
0x2c8f   :  { %v3879_v8 = vpop.permute.xlu0 %3878 }
0x2c90   :  { %4917 = vmatmul.mubr.msk.f32.vlgmr.msra.gmra.mrb[34].mxu1 %vm122_vm1, %v3879_v8  ;;  %4950 = vmatmul.mubr.msk.f32.vlgmr.msra.gmra.mrb[40].mxu0 %vm122_vm1, %v4106_v41 }
0x2c91   :  { %5201 = vmatpush3.bf16.msra.mxu1 %v5200_v36  ;;  %4938 = vmatprep.mubr.msk.f32.mxu1 %vm5617_vm0, %v5615_v0 }
0x2c92   :  { %5202 = vmatprep.subr.bf16.mxu1 %v5616_v1 }
0x2c93   :  { %v4029_v43 = vpop.permute.xlu0 %4028 }
0x2c95   :  { %5204 = vmatpush3.bf16.msra.mxu1 %v5203_v42 }
0x2c96   :  { %5211 = vmatprep.subr.bf16.mxu1 %v5616_v1 }
0x2c98   :  { %4939 = vmatmul.mubr.msk.f32.vlgmr.msra.gmra.mrb[36].mxu1 %vm122_vm1, %v4029_v43 }
0x2c99   :  { %4968 = vmatprep.mubr.msk.f32.mxu1 %vm5617_vm0, %v5615_v0  ;;  %5213 = vmatpush3.bf16.msra.mxu1 %v5212_v17  ;;  %v4193_v0 = vld [vmem:[%s6655_s11 + $0x20] sm:$0xff] }
0x2c9a   :  { %5214 = vmatprep.subr.bf16.mxu1 %v5616_v1  ;;  %v5218_v50 = vpack.c.bf16 %v4194_v47, %v4193_v0 }
0x2c9d   :  { %5216 = vmatpush3.bf16.msra.mxu1 %v5215_v22 }
0x2c9e   :  { %5217 = vmatprep.subr.bf16.mxu1 %v5616_v1 }
0x2ca1   :  { %5219 = vmatpush3.bf16.msra.mxu1 %v5218_v50 }
0x2ca2   :  { %5220 = vmatprep.subr.bf16.mxu1 %v5616_v1 }
0x2ca5   :  { %5222 = vmatpush3.bf16.msra.mxu1 %v5221_v33 }
0x2d5b   :  { %v4023_v31 = vpop.f32.mrb[38].mxu0 }
0x2d5c   :  { %v4929_v54 = vpop.f32.mrb[39].mxu0 }
0x2d63   :  { %v3948_v55 = vpop.f32.mrb[34].mxu1  ;;  %v4175_v39 = vpop.f32.mrb[40].mxu0 }
0x2d64   :  { %v4024_v4 = vadd.f32 %v4023_v31, %v3948_v55  ;;  %v4918_v56 = vpop.f32.mrb[35].mxu1  ;;  %v4951_v2 = vpop.f32.mrb[41].mxu0 }
0x2d6b   :  { %v4098_v40 = vpop.f32.mrb[36].mxu1 }
0x2d6c   :  { %v4102_v52 = vadd.f32 %v4098_v40, %v4024_v4  ;;  %v4940_v1 = vpop.f32.mrb[37].mxu1 }
0x2d6e   :  { %v4179_v61 = vadd.f32 %v4175_v39, %v4102_v52 }
0x2d70   :  { %v4187_v24 = vadd.f32 %v4364_v14, %v4179_v61 }
0x2d72   :  { %v4188_v57 = vmax.f32 %v4187_v24, 0.0 }
0x2d74   :  { %4969 = vmatmul.mubr.msk.f32.vlgmr.msra.gmra.mrb[38].mxu1 %vm2016_vm10, %v4188_v57 }
0x2e47   :  { %v4273_v59 = vpop.f32.mrb[38].mxu1 }
0x2e48   :  { %v4274_v60 = vadd.f32 %v4365_v58, %v4273_v59  ;;  %v4970_v63 = vpop.f32.mrb[39].mxu1 }
0x2e4a   :  { %4278 = vst.msk [vmem:[#allocation12] sm:$0x3] %vm4277_vm11, %v4274_v60 }
0x2e4b   :  { %5590 = shalt.err (!%p5587_p8)
}
0x2e4c   :  { %s5591_s23 = scalar_lea.hbm %s6657_s13, 32 }
0x2e4d   :  { %p5592_p9 = scmp.ne.s32.totalorder %s6657_s13, %s5591_s23  ;;  %p5595_p10 = scmp.lt.u32.totalorder %s5591_s23, %s6657_s13 }
0x2e4f   :  { %p5597_p11 = pnand %p5595_p10, %p5592_p9 }
0x2e51   :  { %5600 = shalt.err (!%p5597_p11)
}
0x2e52   :  { %4288 = dma.vmem_to_hbm [thread:$0]  %s4286_s17, 32, %s6657_s13, [#allocation6]  }
0x2e53   :  { %5607 = dma.done.wait [#allocation6], 32  }
0x2e54   :  { %5608 = vsyncadd [#allocation6], 4294967264 }
0x2e55   :  { %4292 = vsyncpa [#allocation5], 1 }
0x2e56   :  { %4293 = vsyncpa [#allocation8], 1 }
0x2e57   :  { %4294 = vsyncpa [#allocation11], 1 }
0x2e58   :  { %4295 = vsyncpa [#allocation6], 1 }

</bundles_post_ra>
